<compile_context>
chip_gen: v6e
topology: v6e:2x2x1
jax: 0.10.0
libtpu: 0.0.40
codegen_flags: <defaults>
</compile_context>

<pallas_src>
import jax
import jax.numpy as jnp
from jax import lax
from jax.experimental import pallas as pl
from jax.experimental.pallas import tpu as pltpu


def _residual_conv_kernel(xpad_ref, w_ref, b3_ref, b1_ref, out_ref, acc_ref):
    # xpad_ref : (1, H+2, W+2, Cin)       padded input tile (one batch element)
    # w_ref    : (9, Cin, 2*Cout_p)       fused, BN-scaled weights per 3x3 tap;
    #                                     tap 4 (centre) also holds the 1x1 branch
    #                                     in columns [Cout_p : 2*Cout_p).
    # b3_ref   : (1, 1, Cout_p)           folded bias (3x3 branch)
    # b1_ref   : (1, 1, Cout_p)           folded bias (1x1 branch)
    # out_ref  : (1, H, W, Cout_p)        lane-dense output block
    # acc_ref  : (H, W, 2*Cout_p) f32     VMEM scratch accumulator
    H = out_ref.shape[1]
    W = out_ref.shape[2]
    cout_p = out_ref.shape[3]

    xp = xpad_ref[0]                       # (H+2, W+2, Cin)

    # 9 taps of the 3x3 conv, each a wide (N = 2*Cout_p) MXU pass into one
    # f32 accumulator.  First tap stores (no separate zero-init pass).
    for t in range(9):
        ky, kx = t // 3, t % 3
        patch = xp[ky:ky + H, kx:kx + W, :]            # (H, W, Cin), static slice
        contrib = jnp.einsum('hwc,co->hwo', patch, w_ref[t],
                             preferred_element_type=jnp.float32)
        if t == 0:
            acc_ref[...] = contrib
        else:
            acc_ref[...] += contrib

    # Epilogue in f32: bias add, ReLU on the 3x3 branch only, residual add.
    y3 = jnp.maximum(acc_ref[:, :, :cout_p] + b3_ref[0], 0.0)
    y1 = acc_ref[:, :, cout_p:] + b1_ref[0]
    out_ref[0] = (y3 + y1).astype(out_ref.dtype)


def residual_conv_block(x_nchw, params, *, compute_dtype=jnp.float32):
    """x_nchw: (N, Cin, H, W) float32. Returns (N, Cout, H, W).

    compute_dtype: dtype of the matmul inputs (weights + activations).  Use
    jnp.bfloat16 on v6e/v7x for the fast MXU path and halved HBM traffic
    (accumulation stays f32 either way).  The demo uses f32 so the strict
    correctness check below holds.
    """
    w3 = params['w3']          # (Cout, Cin, 3, 3)  -- PyTorch layout
    b3 = params['b3']          # (Cout,)
    w1 = params['w1']          # (Cout, Cin, 1, 1)
    b1 = params['b1']          # (Cout,)
    eps = 1e-5

    # Fold conv bias + BatchNorm (running stats) into per-channel scale/bias.
    def fold(bias, gamma, beta, mean, var):
        scale = gamma * lax.rsqrt(var + eps)
        bias_eff = (bias - mean) * scale + beta
        return scale, bias_eff

    s3, b3e = fold(b3, params['bn3_gamma'], params['bn3_beta'],
                   params['bn3_mean'], params['bn3_var'])
    s1, b1e = fold(b1, params['bn1_gamma'], params['bn1_beta'],
                   params['bn1_mean'], params['bn1_var'])

    N, cin, H, W = x_nchw.shape
    cout = w3.shape[0]
    cout_p = ((cout + 127) // 128) * 128           # lane-dense output channels

    # NCHW -> NHWC and 1-px spatial pad, fused into one HBM pass by XLA.
    x_pad = jnp.pad(jnp.transpose(x_nchw, (0, 2, 3, 1)),
                    ((0, 0), (1, 1), (1, 1), (0, 0))).astype(compute_dtype)

    # BN scale folded into weights (trace-time, zero runtime cost).
    # (Cout, Cin, 3, 3) -> (9, Cin, Cout), scaled per output channel.
    w3_k = jnp.transpose(w3, (2, 3, 1, 0)).reshape(9, cin, cout) * s3[None, None, :]
    # (Cout, Cin, 1, 1) -> (Cin, Cout), scaled.
    w1_k = jnp.transpose(w1[:, :, 0, 0], (1, 0)) * s1[None, :]

    # Fused wide weight: first Cout_p columns = 3x3 branch, second Cout_p
    # columns = 1x1 branch (centre tap only).  Padded channels are zero.
    w_fused = jnp.zeros((9, cin, 2 * cout_p), jnp.float32)
    w_fused = w_fused.at[:, :, :cout].set(w3_k)
    w_fused = w_fused.at[4, :, cout_p:cout_p + cout].set(w1_k)
    w_fused = w_fused.astype(compute_dtype)

    b3_k = jnp.zeros((1, 1, cout_p), jnp.float32).at[0, 0, :cout].set(b3e)
    b1_k = jnp.zeros((1, 1, cout_p), jnp.float32).at[0, 0, :cout].set(b1e)

    out_nhwc = pl.pallas_call(
        _residual_conv_kernel,
        out_shape=jax.ShapeDtypeStruct((N, H, W, cout_p), x_nchw.dtype),
        grid=(N,),
        in_specs=[
            pl.BlockSpec((1, H + 2, W + 2, cin), lambda n: (n, 0, 0, 0)),
            pl.BlockSpec((9, cin, 2 * cout_p), lambda n: (0, 0, 0)),
            pl.BlockSpec((1, 1, cout_p), lambda n: (0, 0, 0)),
            pl.BlockSpec((1, 1, cout_p), lambda n: (0, 0, 0)),
        ],
        out_specs=pl.BlockSpec((1, H, W, cout_p), lambda n: (n, 0, 0, 0)),
        scratch_shapes=[pltpu.VMEM((H, W, 2 * cout_p), jnp.float32)],
        compiler_params=pltpu.CompilerParams(
            dimension_semantics=("parallel",)),
    )(x_pad, w_fused, b3_k, b1_k)

    # Drop channel padding, back to NCHW for the PyTorch-style interface.
    return jnp.transpose(out_nhwc[..., :cout], (0, 3, 1, 2))


def _reference(x_nchw, params):
    """Plain-JAX reference (lax.conv) for correctness checking."""
    eps = 1e-5

    def conv(x, w, b, pad):
        y = lax.conv_general_dilated(
            x, w, window_strides=(1, 1), padding=[(pad, pad), (pad, pad)],
            dimension_numbers=('NCHW', 'OIHW', 'NCHW'))
        return y + b.reshape(1, -1, 1, 1)

    def bn(x, g, bt, m, v):
        s = g * lax.rsqrt(v + eps)
        return x * s.reshape(1, -1, 1, 1) + (bt - m * s).reshape(1, -1, 1, 1)

    y3 = conv(x_nchw, params['w3'], params['b3'], 1)
    y3 = bn(y3, params['bn3_gamma'], params['bn3_beta'],
            params['bn3_mean'], params['bn3_var'])
    y3 = jnp.maximum(y3, 0.0)
    y1 = conv(x_nchw, params['w1'], params['b1'], 0)
    y1 = bn(y1, params['bn1_gamma'], params['bn1_beta'],
            params['bn1_mean'], params['bn1_var'])
    return y3 + y1


if __name__ == "__main__":
    key = jax.random.PRNGKey(0)
    N, Cin, Cout, H, W = 2, 4, 8, 16, 16

    ks = jax.random.split(key, 12)
    params = {
        'w3': jax.random.normal(ks[0], (Cout, Cin, 3, 3), jnp.float32) * 0.1,
        'b3': jax.random.normal(ks[1], (Cout,), jnp.float32) * 0.1,
        'w1': jax.random.normal(ks[2], (Cout, Cin, 1, 1), jnp.float32) * 0.1,
        'b1': jax.random.normal(ks[3], (Cout,), jnp.float32) * 0.1,
        'bn3_gamma': 1.0 + 0.1 * jax.random.normal(ks[4], (Cout,), jnp.float32),
        'bn3_beta': 0.1 * jax.random.normal(ks[5], (Cout,), jnp.float32),
        'bn3_mean': 0.1 * jax.random.normal(ks[6], (Cout,), jnp.float32),
        'bn3_var': 1.0 + 0.1 * jax.nn.softplus(
            jax.random.normal(ks[7], (Cout,), jnp.float32)),
        'bn1_gamma': 1.0 + 0.1 * jax.random.normal(ks[8], (Cout,), jnp.float32),
        'bn1_beta': 0.1 * jax.random.normal(ks[9], (Cout,), jnp.float32),
        'bn1_mean': 0.1 * jax.random.normal(ks[10], (Cout,), jnp.float32),
        'bn1_var': 1.0 + 0.1 * jax.nn.softplus(
            jax.random.normal(ks[11], (Cout,), jnp.float32)),
    }

    x = jax.random.normal(key, (N, Cin, H, W), jnp.float32)

    out = residual_conv_block(x, params)
    out = jax.block_until_ready(out)

    ref = jax.block_until_ready(_reference(x, params))
    assert out.shape == (N, Cout, H, W)
    assert jnp.max(jnp.abs(out - ref)) < 1e-4, "mismatch vs reference"

    print("KERNEL_OK")
</pallas_src>

<mosaic_0001>
module attributes {stable_mosaic.version = 11 : i64} {
  func.func @_residual_conv_kernel(%arg0: i32, %arg1: memref<1x18x18x4xf32, #tpu.memory_space<vmem>>, %arg2: memref<9x4x256xf32, #tpu.memory_space<vmem>>, %arg3: memref<1x1x128xf32, #tpu.memory_space<vmem>>, %arg4: memref<1x1x128xf32, #tpu.memory_space<vmem>>, %arg5: memref<1x16x16x128xf32, #tpu.memory_space<vmem>>, %arg6: memref<16x16x256xf32, #tpu.memory_space<vmem>>) attributes {dimension_semantics = [#tpu.dimension_semantics<parallel>], iteration_bounds = array<i64: 2>, scalar_prefetch = 0 : i64, scratch_operands = 1 : i64, tpu.core_type = #tpu.core_type<tc>, window_params = [{transform_indices = @transform_0, window_bounds = array<i64: 1, 18, 18, 4>}, {pipeline_mode = #tpu.pipeline_mode<synchronous>, transform_indices = @transform_1, window_bounds = array<i64: 9, 4, 256>}, {pipeline_mode = #tpu.pipeline_mode<synchronous>, transform_indices = @transform_2, window_bounds = array<i64: 1, 1, 128>}, {pipeline_mode = #tpu.pipeline_mode<synchronous>, transform_indices = @transform_3, window_bounds = array<i64: 1, 1, 128>}, {transform_indices = @transform_4, window_bounds = array<i64: 1, 16, 16, 128>}]} {
    %c0 = arith.constant 0 : index
    %c0_0 = arith.constant 0 : index
    %c0_1 = arith.constant 0 : index
    %c0_2 = arith.constant 0 : index
    %0 = vector.load %arg1[%c0, %c0_0, %c0_1, %c0_2] : memref<1x18x18x4xf32, #tpu.memory_space<vmem>>, vector<1x18x18x4xf32>
    %1 = vector.shape_cast %0 : vector<1x18x18x4xf32> to vector<18x18x4xf32>
    %2 = vector.extract_strided_slice %1 {offsets = [0, 0, 0], sizes = [16, 16, 4], strides = [1, 1, 1]} : vector<18x18x4xf32> to vector<16x16x4xf32>
    %c0_3 = arith.constant 0 : index
    %c0_4 = arith.constant 0 : index
    %c0_5 = arith.constant 0 : index
    %3 = vector.load %arg2[%c0_3, %c0_4, %c0_5] : memref<9x4x256xf32, #tpu.memory_space<vmem>>, vector<1x4x256xf32>
    %4 = vector.shape_cast %3 : vector<1x4x256xf32> to vector<4x256xf32>
    "tpu.trace_start"() <{level = 10 : i32, message = "hwc,co->hwo"}> : () -> ()
    %cst = arith.constant dense<0.000000e+00> : vector<16x16x256xf32>
    %5 = tpu.matmul %2, %4, %cst {dimension_numbers = #tpu.dot_dimension_numbers<[2], [0], [0, 1], [1], [0, 0, 0, 1, 1, 1], [], []>} : vector<16x16x4xf32>, vector<4x256xf32>, vector<16x16x256xf32> -> vector<16x16x256xf32>
    "tpu.trace_stop"() : () -> ()
    %c0_6 = arith.constant 0 : index
    %c0_7 = arith.constant 0 : index
    %c0_8 = arith.constant 0 : index
    %6 = vector.load %arg6[%c0_6, %c0_7, %c0_8] : memref<16x16x256xf32, #tpu.memory_space<vmem>>, vector<16x16x256xf32>
    tpu.vector_store %arg6[%c0_6, %c0_7, %c0_8], %5 {strides = array<i32>} : memref<16x16x256xf32, #tpu.memory_space<vmem>>, vector<16x16x256xf32>,
    %7 = vector.extract_strided_slice %1 {offsets = [0, 1, 0], sizes = [16, 16, 4], strides = [1, 1, 1]} : vector<18x18x4xf32> to vector<16x16x4xf32>
    %c1 = arith.constant 1 : index
    %c0_9 = arith.constant 0 : index
    %c0_10 = arith.constant 0 : index
    %8 = vector.load %arg2[%c1, %c0_9, %c0_10] : memref<9x4x256xf32, #tpu.memory_space<vmem>>, vector<1x4x256xf32>
    %9 = vector.shape_cast %8 : vector<1x4x256xf32> to vector<4x256xf32>
    "tpu.trace_start"() <{level = 10 : i32, message = "hwc,co->hwo"}> : () -> ()
    %cst_11 = arith.constant dense<0.000000e+00> : vector<16x16x256xf32>
    %10 = tpu.matmul %7, %9, %cst_11 {dimension_numbers = #tpu.dot_dimension_numbers<[2], [0], [0, 1], [1], [0, 0, 0, 1, 1, 1], [], []>} : vector<16x16x4xf32>, vector<4x256xf32>, vector<16x16x256xf32> -> vector<16x16x256xf32>
    "tpu.trace_stop"() : () -> ()
    %c0_12 = arith.constant 0 : index
    %c0_13 = arith.constant 0 : index
    %c0_14 = arith.constant 0 : index
    %11 = vector.load %arg6[%c0_12, %c0_13, %c0_14] : memref<16x16x256xf32, #tpu.memory_space<vmem>>, vector<16x16x256xf32>
    %12 = arith.addf %11, %10 : vector<16x16x256xf32>
    %c0_15 = arith.constant 0 : index
    %c0_16 = arith.constant 0 : index
    %c0_17 = arith.constant 0 : index
    %13 = vector.load %arg6[%c0_15, %c0_16, %c0_17] : memref<16x16x256xf32, #tpu.memory_space<vmem>>, vector<16x16x256xf32>
    tpu.vector_store %arg6[%c0_15, %c0_16, %c0_17], %12 {strides = array<i32>} : memref<16x16x256xf32, #tpu.memory_space<vmem>>, vector<16x16x256xf32>,
    %14 = vector.extract_strided_slice %1 {offsets = [0, 2, 0], sizes = [16, 16, 4], strides = [1, 1, 1]} : vector<18x18x4xf32> to vector<16x16x4xf32>
    %c2 = arith.constant 2 : index
    %c0_18 = arith.constant 0 : index
    %c0_19 = arith.constant 0 : index
    %15 = vector.load %arg2[%c2, %c0_18, %c0_19] : memref<9x4x256xf32, #tpu.memory_space<vmem>>, vector<1x4x256xf32>
    %16 = vector.shape_cast %15 : vector<1x4x256xf32> to vector<4x256xf32>
    "tpu.trace_start"() <{level = 10 : i32, message = "hwc,co->hwo"}> : () -> ()
    %cst_20 = arith.constant dense<0.000000e+00> : vector<16x16x256xf32>
    %17 = tpu.matmul %14, %16, %cst_20 {dimension_numbers = #tpu.dot_dimension_numbers<[2], [0], [0, 1], [1], [0, 0, 0, 1, 1, 1], [], []>} : vector<16x16x4xf32>, vector<4x256xf32>, vector<16x16x256xf32> -> vector<16x16x256xf32>
    "tpu.trace_stop"() : () -> ()
    %c0_21 = arith.constant 0 : index
    %c0_22 = arith.constant 0 : index
    %c0_23 = arith.constant 0 : index
    %18 = vector.load %arg6[%c0_21, %c0_22, %c0_23] : memref<16x16x256xf32, #tpu.memory_space<vmem>>, vector<16x16x256xf32>
    %19 = arith.addf %18, %17 : vector<16x16x256xf32>
    %c0_24 = arith.constant 0 : index
    %c0_25 = arith.constant 0 : index
    %c0_26 = arith.constant 0 : index
    %20 = vector.load %arg6[%c0_24, %c0_25, %c0_26] : memref<16x16x256xf32, #tpu.memory_space<vmem>>, vector<16x16x256xf32>
    tpu.vector_store %arg6[%c0_24, %c0_25, %c0_26], %19 {strides = array<i32>} : memref<16x16x256xf32, #tpu.memory_space<vmem>>, vector<16x16x256xf32>,
    %21 = vector.extract_strided_slice %1 {offsets = [1, 0, 0], sizes = [16, 16, 4], strides = [1, 1, 1]} : vector<18x18x4xf32> to vector<16x16x4xf32>
    %c3 = arith.constant 3 : index
    %c0_27 = arith.constant 0 : index
    %c0_28 = arith.constant 0 : index
    %22 = vector.load %arg2[%c3, %c0_27, %c0_28] : memref<9x4x256xf32, #tpu.memory_space<vmem>>, vector<1x4x256xf32>
    %23 = vector.shape_cast %22 : vector<1x4x256xf32> to vector<4x256xf32>
    "tpu.trace_start"() <{level = 10 : i32, message = "hwc,co->hwo"}> : () -> ()
    %cst_29 = arith.constant dense<0.000000e+00> : vector<16x16x256xf32>
    %24 = tpu.matmul %21, %23, %cst_29 {dimension_numbers = #tpu.dot_dimension_numbers<[2], [0], [0, 1], [1], [0, 0, 0, 1, 1, 1], [], []>} : vector<16x16x4xf32>, vector<4x256xf32>, vector<16x16x256xf32> -> vector<16x16x256xf32>
    "tpu.trace_stop"() : () -> ()
    %c0_30 = arith.constant 0 : index
    %c0_31 = arith.constant 0 : index
    %c0_32 = arith.constant 0 : index
    %25 = vector.load %arg6[%c0_30, %c0_31, %c0_32] : memref<16x16x256xf32, #tpu.memory_space<vmem>>, vector<16x16x256xf32>
    %26 = arith.addf %25, %24 : vector<16x16x256xf32>
    %c0_33 = arith.constant 0 : index
    %c0_34 = arith.constant 0 : index
    %c0_35 = arith.constant 0 : index
    %27 = vector.load %arg6[%c0_33, %c0_34, %c0_35] : memref<16x16x256xf32, #tpu.memory_space<vmem>>, vector<16x16x256xf32>
    tpu.vector_store %arg6[%c0_33, %c0_34, %c0_35], %26 {strides = array<i32>} : memref<16x16x256xf32, #tpu.memory_space<vmem>>, vector<16x16x256xf32>,
    %28 = vector.extract_strided_slice %1 {offsets = [1, 1, 0], sizes = [16, 16, 4], strides = [1, 1, 1]} : vector<18x18x4xf32> to vector<16x16x4xf32>
    %c4 = arith.constant 4 : index
    %c0_36 = arith.constant 0 : index
    %c0_37 = arith.constant 0 : index
    %29 = vector.load %arg2[%c4, %c0_36, %c0_37] : memref<9x4x256xf32, #tpu.memory_space<vmem>>, vector<1x4x256xf32>
    %30 = vector.shape_cast %29 : vector<1x4x256xf32> to vector<4x256xf32>
    "tpu.trace_start"() <{level = 10 : i32, message = "hwc,co->hwo"}> : () -> ()
    %cst_38 = arith.constant dense<0.000000e+00> : vector<16x16x256xf32>
    %31 = tpu.matmul %28, %30, %cst_38 {dimension_numbers = #tpu.dot_dimension_numbers<[2], [0], [0, 1], [1], [0, 0, 0, 1, 1, 1], [], []>} : vector<16x16x4xf32>, vector<4x256xf32>, vector<16x16x256xf32> -> vector<16x16x256xf32>
    "tpu.trace_stop"() : () -> ()
    %c0_39 = arith.constant 0 : index
    %c0_40 = arith.constant 0 : index
    %c0_41 = arith.constant 0 : index
    %32 = vector.load %arg6[%c0_39, %c0_40, %c0_41] : memref<16x16x256xf32, #tpu.memory_space<vmem>>, vector<16x16x256xf32>
    %33 = arith.addf %32, %31 : vector<16x16x256xf32>
    %c0_42 = arith.constant 0 : index
    %c0_43 = arith.constant 0 : index
    %c0_44 = arith.constant 0 : index
    %34 = vector.load %arg6[%c0_42, %c0_43, %c0_44] : memref<16x16x256xf32, #tpu.memory_space<vmem>>, vector<16x16x256xf32>
    tpu.vector_store %arg6[%c0_42, %c0_43, %c0_44], %33 {strides = array<i32>} : memref<16x16x256xf32, #tpu.memory_space<vmem>>, vector<16x16x256xf32>,
    %35 = vector.extract_strided_slice %1 {offsets = [1, 2, 0], sizes = [16, 16, 4], strides = [1, 1, 1]} : vector<18x18x4xf32> to vector<16x16x4xf32>
    %c5 = arith.constant 5 : index
    %c0_45 = arith.constant 0 : index
    %c0_46 = arith.constant 0 : index
    %36 = vector.load %arg2[%c5, %c0_45, %c0_46] : memref<9x4x256xf32, #tpu.memory_space<vmem>>, vector<1x4x256xf32>
    %37 = vector.shape_cast %36 : vector<1x4x256xf32> to vector<4x256xf32>
    "tpu.trace_start"() <{level = 10 : i32, message = "hwc,co->hwo"}> : () -> ()
    %cst_47 = arith.constant dense<0.000000e+00> : vector<16x16x256xf32>
    %38 = tpu.matmul %35, %37, %cst_47 {dimension_numbers = #tpu.dot_dimension_numbers<[2], [0], [0, 1], [1], [0, 0, 0, 1, 1, 1], [], []>} : vector<16x16x4xf32>, vector<4x256xf32>, vector<16x16x256xf32> -> vector<16x16x256xf32>
    "tpu.trace_stop"() : () -> ()
    %c0_48 = arith.constant 0 : index
    %c0_49 = arith.constant 0 : index
    %c0_50 = arith.constant 0 : index
    %39 = vector.load %arg6[%c0_48, %c0_49, %c0_50] : memref<16x16x256xf32, #tpu.memory_space<vmem>>, vector<16x16x256xf32>
    %40 = arith.addf %39, %38 : vector<16x16x256xf32>
    %c0_51 = arith.constant 0 : index
    %c0_52 = arith.constant 0 : index
    %c0_53 = arith.constant 0 : index
    %41 = vector.load %arg6[%c0_51, %c0_52, %c0_53] : memref<16x16x256xf32, #tpu.memory_space<vmem>>, vector<16x16x256xf32>
    tpu.vector_store %arg6[%c0_51, %c0_52, %c0_53], %40 {strides = array<i32>} : memref<16x16x256xf32, #tpu.memory_space<vmem>>, vector<16x16x256xf32>,
    %42 = vector.extract_strided_slice %1 {offsets = [2, 0, 0], sizes = [16, 16, 4], strides = [1, 1, 1]} : vector<18x18x4xf32> to vector<16x16x4xf32>
    %c6 = arith.constant 6 : index
    %c0_54 = arith.constant 0 : index
    %c0_55 = arith.constant 0 : index
    %43 = vector.load %arg2[%c6, %c0_54, %c0_55] : memref<9x4x256xf32, #tpu.memory_space<vmem>>, vector<1x4x256xf32>
    %44 = vector.shape_cast %43 : vector<1x4x256xf32> to vector<4x256xf32>
    "tpu.trace_start"() <{level = 10 : i32, message = "hwc,co->hwo"}> : () -> ()
    %cst_56 = arith.constant dense<0.000000e+00> : vector<16x16x256xf32>
    %45 = tpu.matmul %42, %44, %cst_56 {dimension_numbers = #tpu.dot_dimension_numbers<[2], [0], [0, 1], [1], [0, 0, 0, 1, 1, 1], [], []>} : vector<16x16x4xf32>, vector<4x256xf32>, vector<16x16x256xf32> -> vector<16x16x256xf32>
    "tpu.trace_stop"() : () -> ()
    %c0_57 = arith.constant 0 : index
    %c0_58 = arith.constant 0 : index
    %c0_59 = arith.constant 0 : index
    %46 = vector.load %arg6[%c0_57, %c0_58, %c0_59] : memref<16x16x256xf32, #tpu.memory_space<vmem>>, vector<16x16x256xf32>
    %47 = arith.addf %46, %45 : vector<16x16x256xf32>
    %c0_60 = arith.constant 0 : index
    %c0_61 = arith.constant 0 : index
    %c0_62 = arith.constant 0 : index
    %48 = vector.load %arg6[%c0_60, %c0_61, %c0_62] : memref<16x16x256xf32, #tpu.memory_space<vmem>>, vector<16x16x256xf32>
    tpu.vector_store %arg6[%c0_60, %c0_61, %c0_62], %47 {strides = array<i32>} : memref<16x16x256xf32, #tpu.memory_space<vmem>>, vector<16x16x256xf32>,
    %49 = vector.extract_strided_slice %1 {offsets = [2, 1, 0], sizes = [16, 16, 4], strides = [1, 1, 1]} : vector<18x18x4xf32> to vector<16x16x4xf32>
    %c7 = arith.constant 7 : index
    %c0_63 = arith.constant 0 : index
    %c0_64 = arith.constant 0 : index
    %50 = vector.load %arg2[%c7, %c0_63, %c0_64] : memref<9x4x256xf32, #tpu.memory_space<vmem>>, vector<1x4x256xf32>
    %51 = vector.shape_cast %50 : vector<1x4x256xf32> to vector<4x256xf32>
    "tpu.trace_start"() <{level = 10 : i32, message = "hwc,co->hwo"}> : () -> ()
    %cst_65 = arith.constant dense<0.000000e+00> : vector<16x16x256xf32>
    %52 = tpu.matmul %49, %51, %cst_65 {dimension_numbers = #tpu.dot_dimension_numbers<[2], [0], [0, 1], [1], [0, 0, 0, 1, 1, 1], [], []>} : vector<16x16x4xf32>, vector<4x256xf32>, vector<16x16x256xf32> -> vector<16x16x256xf32>
    "tpu.trace_stop"() : () -> ()
    %c0_66 = arith.constant 0 : index
    %c0_67 = arith.constant 0 : index
    %c0_68 = arith.constant 0 : index
    %53 = vector.load %arg6[%c0_66, %c0_67, %c0_68] : memref<16x16x256xf32, #tpu.memory_space<vmem>>, vector<16x16x256xf32>
    %54 = arith.addf %53, %52 : vector<16x16x256xf32>
    %c0_69 = arith.constant 0 : index
    %c0_70 = arith.constant 0 : index
    %c0_71 = arith.constant 0 : index
    %55 = vector.load %arg6[%c0_69, %c0_70, %c0_71] : memref<16x16x256xf32, #tpu.memory_space<vmem>>, vector<16x16x256xf32>
    tpu.vector_store %arg6[%c0_69, %c0_70, %c0_71], %54 {strides = array<i32>} : memref<16x16x256xf32, #tpu.memory_space<vmem>>, vector<16x16x256xf32>,
    %56 = vector.extract_strided_slice %1 {offsets = [2, 2, 0], sizes = [16, 16, 4], strides = [1, 1, 1]} : vector<18x18x4xf32> to vector<16x16x4xf32>
    %c8 = arith.constant 8 : index
    %c0_72 = arith.constant 0 : index
    %c0_73 = arith.constant 0 : index
    %57 = vector.load %arg2[%c8, %c0_72, %c0_73] : memref<9x4x256xf32, #tpu.memory_space<vmem>>, vector<1x4x256xf32>
    %58 = vector.shape_cast %57 : vector<1x4x256xf32> to vector<4x256xf32>
    "tpu.trace_start"() <{level = 10 : i32, message = "hwc,co->hwo"}> : () -> ()
    %cst_74 = arith.constant dense<0.000000e+00> : vector<16x16x256xf32>
    %59 = tpu.matmul %56, %58, %cst_74 {dimension_numbers = #tpu.dot_dimension_numbers<[2], [0], [0, 1], [1], [0, 0, 0, 1, 1, 1], [], []>} : vector<16x16x4xf32>, vector<4x256xf32>, vector<16x16x256xf32> -> vector<16x16x256xf32>
    "tpu.trace_stop"() : () -> ()
    %c0_75 = arith.constant 0 : index
    %c0_76 = arith.constant 0 : index
    %c0_77 = arith.constant 0 : index
    %60 = vector.load %arg6[%c0_75, %c0_76, %c0_77] : memref<16x16x256xf32, #tpu.memory_space<vmem>>, vector<16x16x256xf32>
    %61 = arith.addf %60, %59 : vector<16x16x256xf32>
    %c0_78 = arith.constant 0 : index
    %c0_79 = arith.constant 0 : index
    %c0_80 = arith.constant 0 : index
    %62 = vector.load %arg6[%c0_78, %c0_79, %c0_80] : memref<16x16x256xf32, #tpu.memory_space<vmem>>, vector<16x16x256xf32>
    tpu.vector_store %arg6[%c0_78, %c0_79, %c0_80], %61 {strides = array<i32>} : memref<16x16x256xf32, #tpu.memory_space<vmem>>, vector<16x16x256xf32>,
    %c0_81 = arith.constant 0 : index
    %c0_82 = arith.constant 0 : index
    %c0_83 = arith.constant 0 : index
    %63 = vector.load %arg6[%c0_81, %c0_82, %c0_83] : memref<16x16x256xf32, #tpu.memory_space<vmem>>, vector<16x16x128xf32>
    %c0_84 = arith.constant 0 : index
    %c0_85 = arith.constant 0 : index
    %c0_86 = arith.constant 0 : index
    %64 = vector.load %arg3[%c0_84, %c0_85, %c0_86] : memref<1x1x128xf32, #tpu.memory_space<vmem>>, vector<1x1x128xf32>
    %65 = vector.shape_cast %64 : vector<1x1x128xf32> to vector<1x128xf32>
    %66 = vector.shape_cast %65 : vector<1x128xf32> to vector<1x1x128xf32>
    %67 = vector.broadcast %66 : vector<1x1x128xf32> to vector<16x16x128xf32>
    %68 = arith.addf %63, %67 : vector<16x16x128xf32>
    %cst_87 = arith.constant 0.000000e+00 : f32
    %69 = vector.broadcast %cst_87 : f32 to vector<16x16x128xf32>
    %70 = arith.maximumf %68, %69 : vector<16x16x128xf32>
    %c0_88 = arith.constant 0 : index
    %c0_89 = arith.constant 0 : index
    %c128 = arith.constant 128 : index
    %71 = vector.load %arg6[%c0_88, %c0_89, %c128] : memref<16x16x256xf32, #tpu.memory_space<vmem>>, vector<16x16x128xf32>
    %c0_90 = arith.constant 0 : index
    %c0_91 = arith.constant 0 : index
    %c0_92 = arith.constant 0 : index
    %72 = vector.load %arg4[%c0_90, %c0_91, %c0_92] : memref<1x1x128xf32, #tpu.memory_space<vmem>>, vector<1x1x128xf32>
    %73 = vector.shape_cast %72 : vector<1x1x128xf32> to vector<1x128xf32>
    %74 = vector.shape_cast %73 : vector<1x128xf32> to vector<1x1x128xf32>
    %75 = vector.broadcast %74 : vector<1x1x128xf32> to vector<16x16x128xf32>
    %76 = arith.addf %71, %75 : vector<16x16x128xf32>
    %77 = arith.addf %70, %76 : vector<16x16x128xf32>
    %c0_93 = arith.constant 0 : index
    %c0_94 = arith.constant 0 : index
    %c0_95 = arith.constant 0 : index
    %c0_96 = arith.constant 0 : index
    %78 = vector.load %arg5[%c0_93, %c0_94, %c0_95, %c0_96] : memref<1x16x16x128xf32, #tpu.memory_space<vmem>>, vector<1x16x16x128xf32>
    %79 = vector.shape_cast %78 : vector<1x16x16x128xf32> to vector<16x16x128xf32>
    %80 = vector.shape_cast %77 : vector<16x16x128xf32> to vector<1x16x16x128xf32>
    tpu.vector_store %arg5[%c0_93, %c0_94, %c0_95, %c0_96], %80 {strides = array<i32>} : memref<1x16x16x128xf32, #tpu.memory_space<vmem>>, vector<1x16x16x128xf32>,
    return
  }
  func.func @transform_0(%arg0: i32) -> (i32, i32, i32, i32) {
    %c0_i32 = arith.constant 0 : i32
    %c0_i32_0 = arith.constant 0 : i32
    %c0_i32_1 = arith.constant 0 : i32
    %c0_i32_2 = arith.constant 0 : i32
    return %arg0, %c0_i32, %c0_i32_0, %c0_i32_1 : i32, i32, i32, i32
  }
  func.func @transform_1(%arg0: i32) -> (i32, i32, i32) {
    %c0_i32 = arith.constant 0 : i32
    %c0_i32_0 = arith.constant 0 : i32
    %c0_i32_1 = arith.constant 0 : i32
    %c0_i32_2 = arith.constant 0 : i32
    return %c0_i32, %c0_i32_0, %c0_i32_1 : i32, i32, i32
  }
  func.func @transform_2(%arg0: i32) -> (i32, i32, i32) {
    %c0_i32 = arith.constant 0 : i32
    %c0_i32_0 = arith.constant 0 : i32
    %c0_i32_1 = arith.constant 0 : i32
    %c0_i32_2 = arith.constant 0 : i32
    return %c0_i32, %c0_i32_0, %c0_i32_1 : i32, i32, i32
  }
  func.func @transform_3(%arg0: i32) -> (i32, i32, i32) {
    %c0_i32 = arith.constant 0 : i32
    %c0_i32_0 = arith.constant 0 : i32
    %c0_i32_1 = arith.constant 0 : i32
    %c0_i32_2 = arith.constant 0 : i32
    return %c0_i32, %c0_i32_0, %c0_i32_1 : i32, i32, i32
  }
  func.func @transform_4(%arg0: i32) -> (i32, i32, i32, i32) {
    %c0_i32 = arith.constant 0 : i32
    %c0_i32_0 = arith.constant 0 : i32
    %c0_i32_1 = arith.constant 0 : i32
    %c0_i32_2 = arith.constant 0 : i32
    return %arg0, %c0_i32, %c0_i32_0, %c0_i32_1 : i32, i32, i32, i32
  }
}

</mosaic_0001>

<bundles_post_ra>
// kernel: tpu_custom_call.1
= control target key start
LH: loop header
LB: loop body
LE: loop exit
PB: predicated region body
PF: predicated region fallthrough
CT: control target
= control target key end

     0   :  { %9 = vsyncpa [#allocation4], 0  ;;  %s7871_s0 = inlined_call_operand.vmem [shape: f32[2,18,18,4], index: 0, kind: input, shape index: {}]   ;;  %s7872_s1 = inlined_call_operand.vmem [shape: f32[9,4,256], index: 1, kind: input, shape index: {}]   ;;  %s7873_s2 = inlined_call_operand.vmem [shape: f32[1,1,128], index: 2, kind: input, shape index: {}]   ;;  %s7874_s3 = inlined_call_operand.vmem [shape: f32[1,1,128], index: 3, kind: input, shape index: {}]   ;;  %s7875_s4 = inlined_call_operand.hbm [shape: f32[2,16,16,128], index: 4, kind: output, shape index: {}]  }
   0x1   :  { %11 = vsyncpa [#allocation4 + $0x1], 0  ;;  %s5503_s15 = smov 0   ;;  %s5505_s16 = smov 0  }
   0x2   :  { %s5507_s17 = smov 0   ;;  %s5509_s18 = smov 0  }
   0x3 LB: > { %s5524_s19 = sadd.s32 4294967295, %s5472_s18   ;;  %s5002_s20 = sadd.s32 4294967294, %s5472_s18   ;;  %s5472_s18 = sphi %s5509_s18, %s8333_s18   ;;  %s5468_s17 = sphi %s5507_s17, %s8332_s17   ;;  %s5464_s16 = sphi %s5505_s16, %s8331_s16   ;;  %s5460_s15 = sphi %s5503_s15, %s8330_s15  }
   0x4   : > { %s5528_s21 = sadd.s32 1, %s5472_s18   ;;  %s113_s22 = sadd.s32 1, %s5468_s17 }
   0x5   : > { %s110_s23 = ssub.s32 %s5472_s18, %s5528_s21  ;;  %p123_p0 = scmp.ne.s32.totalorder %s5468_s17, %s5464_s16 }
   0x6   : > { %p111_p1 = scmp.eq.s32.totalorder %s110_s23, 0  ;;  %p124_p2 = scmp.eq.s32.totalorder %s5524_s19, 1 }
   0x7   : > { %p129_p3 = scmp.ne.s32.totalorder %s5464_s16, %s5460_s15  ;;  %p130_p4 = scmp.eq.s32.totalorder %s5002_s20, 1 }
   0x8   : > { %s5539_s24 = scalar_select %p111_p1, %s5468_s17, %s113_s22  }
   0x9   : > { %p5541_p5 = por %p124_p2, %p123_p0  ;;  %p5545_p6 = por %p130_p4, %p129_p3 }
   0xa   : > { %p5005_p7 = scmp.ge.s32.totalorder %s5472_s18, 1  ;;  %p165_p8 = scmp.lt.s32.totalorder %s5472_s18, 3 }
   0xc   : > { %p166_p9 = pnand %p5005_p7, %p165_p8 }
   0xe   : > { %169 = sbr.rel (%p166_p9) target bundleno = 817 (0x331), region = 36 }
  0x13   : > { %v250_v0 = vld [vmem:[%s7872_s1] sm:$0xff]  ;;  %vm350_vm0 = vcmask 1043456   ;;  %v5042_v1 = vld [vmem:[%s7872_s1 + $0x8] sm:$0xff]  ;;  %p191_p10 = scmp.lt.s32.totalorder %s5524_s19, 1  ;;  %v7906_v3 = vmov 0.0   ;;  %v5077_v5 = vld [vmem:[%s7872_s1 + $0x10] sm:$0xff] }
  0x14   : > { %v252_v2 = vcombine.high %v250_v0, %v250_v0  ;;  %419 = vmatprep.mubr.f32.mxu0 %v7906_v3  ;;  %515 = vmatprep.mubr.f32.mxu1 %v7906_v3  ;;  %v776_v4 = vcombine.high %v5042_v1, %v5042_v1  ;;  %v1378_v6 = vcombine.high %v5077_v5, %v5077_v5  ;;  %v5571_v7 = vld [vmem:[%s7872_s1 + $0x18] sm:$0xff]  ;;  %v5576_v8 = vld [vmem:[%s7872_s1 + $0x20] sm:$0xff]  ;;  %vm253_vm1 = vcmask 31744   ;;  %v5795_v52 = vld [vmem:[%s7872_s1 + $0x28] sm:$0xff]  ;;  %s188_s9 = sand.u32 1, %s5464_s16   ;;  %s5329_s14 = sshll.u32 %s5524_s19, 12 }
  0x15   : > { %s192_s7 = scalar_select %p191_p10, %s5524_s19, 1  ;;  %v1899_v11 = vcombine.high %v5571_v7, %v5571_v7  ;;  %v2368_v12 = vcombine.high %v5576_v8, %v5576_v8  ;;  %vm694_vm2 = vcmask 1046528   ;;  %vm1296_vm3 = vcmask 1045504   ;;  %v5814_v60 = vld [vmem:[%s7872_s1 + $0x30] sm:$0xff] }
  0x16   : > { %5330 = vmatprep.subr.msk.mxu1 %vm350_vm0, %v252_v2  ;;  %5008 = vmatprep.subr.msk.mxu0 %vm350_vm0, %v252_v2  ;;  %v2834_v53 = vcombine.high %v5795_v52, %v5795_v52  ;;  %v3295_v62 = vcombine.high %v5814_v60, %v5814_v60  ;;  %s5006_s12 = sshll.u32 %s188_s9, 8  ;;  %s7824_s27 = scalar_lea.hbm %s7875_s4, %s5329_s14 }
  0x17   : > { %5331 = vmatpush1.msk.msra.mxu1 %vm350_vm0, %v250_v0  ;;  %5009 = vmatpush1.msk.msra.mxu0 %vm350_vm0, %v250_v0  ;;  %s5332_s8 = smul.u32 432, %s192_s7  ;;  %s7666_s13 = scalar_lea.vmem [#allocation3], %s5006_s12 }
  0x18   : > { %5043 = vmatprep.subr.msk.mxu1 %vm350_vm0, %v776_v4  ;;  %5078 = vmatprep.subr.msk.mxu0 %vm350_vm0, %v1378_v6  ;;  %s7831_s28 = scalar_lea.sflag [#allocation4], %s188_s9  ;;  %s5475_s29 = smov [#allocation3]  }
  0x19   : > { %s5583_s20 = scalar_lea.vmem %s7871_s0, %s5332_s8  ;;  %s5416_s30 = sshll.u32 %s5475_s29, 4  ;;  %s5417_s30 = int_to_ptr.vmem [resolvable:$false] %s5416_s30 }
  0x1a   : > { %v5586_v9 = vld [vmem:[%s5583_s20] sm:$0xff]  ;;  %v5602_v13 = vld [vmem:[%s5583_s20 + $0x8] sm:$0xff]  ;;  %v5618_v15 = vld [vmem:[%s5583_s20 + $0x18] sm:$0xff]  ;;  %s5418_s5 = scalar_lea.vmem %s5417_s30, 8192 }
  0x1b   : > { %v5589_v10 = vld [vmem:[%s5583_s20 + $0xc0] sm:$0xff]  ;;  %5010 = vmatmul.mubr.msk.f32.vlgmr.msra.gmra.mxu0 %vm253_vm1, %v5586_v9  ;;  %v5605_v14 = vld [vmem:[%s5583_s20 + $0xc8] sm:$0xff]  ;;  %v5621_v16 = vld [vmem:[%s5583_s20 + $0xd8] sm:$0xff]  ;;  %v695_v41 = vrot.slane %v5586_v9, 1  ;;  %v1297_v42 = vrot.slane %v5586_v9, 2  ;;  %v696_v43 = vrot.slane %v5602_v13, 1 }
  0x1c   : > { %5026 = vmatmul.mubr.msk.f32.vlgmr.msra.gmra.mxu1 %vm253_vm1, %v5589_v10  ;;  %5079 = vmatpush1.msk.msra.mxu0 %vm350_vm0, %v5077_v5  ;;  %v5630_v17 = vld [vmem:[%s5583_s20 + $0x20] sm:$0xff]  ;;  %v5642_v19 = vld [vmem:[%s5583_s20 + $0x30] sm:$0xff]  ;;  %v5654_v21 = vld [vmem:[%s5583_s20 + $0x38] sm:$0xff]  ;;  %v1298_v44 = vrot.slane %v5602_v13, 2  ;;  %v700_v54 = vrot.slane %v5618_v15, 1  ;;  %v1302_v55 = vrot.slane %v5618_v15, 2 }
  0x1d   : > { %5044 = vmatpush1.msk.msra.mxu1 %vm350_vm0, %v5042_v1  ;;  %425 = vmatprep.mubr.f32.mxu0 %v7906_v3  ;;  %v5633_v18 = vld [vmem:[%s5583_s20 + $0xe0] sm:$0xff]  ;;  %v5645_v20 = vld [vmem:[%s5583_s20 + $0xf0] sm:$0xff]  ;;  %v5657_v22 = vld [vmem:[%s5583_s20 + $0xf8] sm:$0xff]  ;;  %v697_v48 = vsel %vm694_vm2, %v695_v41, %v696_v43  ;;  %v701_v56 = vrot.slane %v5630_v17, 1  ;;  %v1303_v57 = vrot.slane %v5630_v17, 2  ;;  %v705_v4 = vrot.slane %v5642_v19, 1 }
  0x1e   : > { %521 = vmatprep.mubr.f32.mxu1 %v7906_v3  ;;  %5113 = vmatprep.subr.msk.mxu1 %vm350_vm0, %v1899_v11  ;;  %v5666_v23 = vld [vmem:[%s5583_s20 + $0x48] sm:$0xff]  ;;  %v5678_v25 = vld [vmem:[%s5583_s20 + $0x50] sm:$0xff]  ;;  %v5690_v27 = vld [vmem:[%s5583_s20 + $0x60] sm:$0xff]  ;;  %v1299_v49 = vsel %vm1296_vm3, %v1297_v42, %v1298_v44  ;;  %v706_v5 = vrot.slane %v5654_v21, 1  ;;  %v1308_v9 = vrot.slane %v5654_v21, 2 }
  0x1f   : > { %5148 = vmatprep.subr.msk.mxu0 %vm350_vm0, %v2368_v12  ;;  %5011 = vmatmul.mubr.msk.f32.gmra.mxu0 %vm253_vm1, %v5602_v13  ;;  %v5669_v24 = vld [vmem:[%s5583_s20 + $0x108] sm:$0xff]  ;;  %v5681_v26 = vld [vmem:[%s5583_s20 + $0x110] sm:$0xff]  ;;  %v5693_v28 = vld [vmem:[%s5583_s20 + $0x120] sm:$0xff]  ;;  %v5827_v63 = vsel %vm694_vm2, %v700_v54, %v701_v56  ;;  %v5830_v0 = vsel %vm1296_vm3, %v1302_v55, %v1303_v57 }
  0x20   : > { %5027 = vmatmul.mubr.msk.f32.gmra.mxu1 %vm253_vm1, %v5605_v14  ;;  %431 = vmatprep.mubr.f32.mxu0 %v7906_v3  ;;  %v5702_v29 = vld [vmem:[%s5583_s20 + $0x68] sm:$0xff]  ;;  %v5714_v31 = vld [vmem:[%s5583_s20 + $0x78] sm:$0xff]  ;;  %v5726_v33 = vld [vmem:[%s5583_s20 + $0x80] sm:$0xff]  ;;  %v5857_v12 = vsel %vm694_vm2, %v705_v4, %v706_v5 }
  0x21   : > { %527 = vmatprep.mubr.f32.mxu1 %v7906_v3  ;;  %v5705_v30 = vld [vmem:[%s5583_s20 + $0x128] sm:$0xff]  ;;  %v5717_v32 = vld [vmem:[%s5583_s20 + $0x138] sm:$0xff]  ;;  %v5729_v34 = vld [vmem:[%s5583_s20 + $0x140] sm:$0xff]  ;;  %7970 = vst [vmem:[#allocation6_spill] sm:$0xff] %v5857_v12 }
  0x22   : > { %v5738_v35 = vld [vmem:[%s5583_s20 + $0x90] sm:$0xff]  ;;  %v5750_v37 = vld [vmem:[%s5583_s20 + $0x98] sm:$0xff]  ;;  %v5762_v39 = vld [vmem:[%s5583_s20 + $0xa8] sm:$0xff] }
  0x23   : > { %5012 = vmatmul.mubr.msk.f32.gmra.mxu0 %vm253_vm1, %v5618_v15  ;;  %v5741_v36 = vld [vmem:[%s5583_s20 + $0x150] sm:$0xff]  ;;  %v5753_v38 = vld [vmem:[%s5583_s20 + $0x158] sm:$0xff]  ;;  %v5765_v40 = vld [vmem:[%s5583_s20 + $0x168] sm:$0xff] }
  0x24   : > { %5028 = vmatmul.mubr.msk.f32.gmra.mxu1 %vm253_vm1, %v5621_v16  ;;  %437 = vmatprep.mubr.f32.mxu0 %v7906_v3  ;;  %v5778_v45 = vld [vmem:[%s5583_s20 + $0xb0] sm:$0xff]  ;;  %v201_v61 = vld [vmem:[%s5583_s20 + $0x28] sm:$0x3]  ;;  %v204_v11 = vld [vmem:[%s5583_s20 + $0x40] sm:$0x3] }
  0x25   : > { %533 = vmatprep.mubr.f32.mxu1 %v7906_v3  ;;  %v5781_v46 = vld [vmem:[%s5583_s20 + $0x170] sm:$0xff]  ;;  %v703_v1 = vrot.slane %v201_v61, 1  ;;  %v1305_v2 = vrot.slane %v201_v61, 2  ;;  %v708_v41 = vrot.slane %v204_v11, 1  ;;  %v1310_v42 = vrot.slane %v204_v11, 2 }
  0x26   : > { %v198_v47 = vld [vmem:[%s5583_s20 + $0x10] sm:$0x3]  ;;  %v720_v11 = vrot.slane %v5714_v31, 1 }
  0x27   : > { %5013 = vmatmul.mubr.msk.f32.gmra.mxu0 %vm253_vm1, %v5630_v17  ;;  %v698_v50 = vrot.slane %v198_v47, 1  ;;  %v1300_v51 = vrot.slane %v198_v47, 2  ;;  %v5842_v6 = vsel %vm694_vm2, %v701_v56, %v703_v1  ;;  %v5871_v47 = vsel %vm694_vm2, %v706_v5, %v708_v41 }
  0x28   : > { %5029 = vmatmul.mubr.msk.f32.gmra.mxu1 %vm253_vm1, %v5633_v18  ;;  %443 = vmatprep.mubr.f32.mxu0 %v7906_v3  ;;  %7972 = vst [vmem:[#allocation8_spill] sm:$0xff] %v5871_v47  ;;  %v1318_v1 = vrot.slane %v5702_v29, 2  ;;  %v721_v41 = vrot.slane %v5726_v33, 1 }
  0x29   : > { %539 = vmatprep.mubr.f32.mxu1 %v7906_v3  ;;  %v699_v58 = vsel %vm694_vm2, %v696_v43, %v698_v50  ;;  %v1301_v59 = vsel %vm1296_vm3, %v1298_v44, %v1300_v51  ;;  %v710_v43 = vrot.slane %v5666_v23, 1  ;;  %v711_v44 = vrot.slane %v5678_v25, 1  ;;  %v207_v51 = vld [vmem:[%s5583_s20 + $0x58] sm:$0x3] }
  0x2a   : > { %v1313_v50 = vrot.slane %v5678_v25, 2  ;;  %v713_v55 = vrot.slane %v207_v51, 1  ;;  %v1315_v56 = vrot.slane %v207_v51, 2  ;;  %v5944_v51 = vsel %vm694_vm2, %v720_v11, %v721_v41  ;;  %v216_v11 = vld [vmem:[%s5583_s20 + $0xa0] sm:$0x3] }
  0x2b   : > { %5014 = vmatmul.mubr.msk.f32.gmra.mxu0 %vm253_vm1, %v5642_v19  ;;  %7982 = vst [vmem:[#allocation18_spill] sm:$0xff] %v5944_v51 }
  0x2c   : > { %5030 = vmatmul.mubr.msk.f32.gmra.mxu1 %vm253_vm1, %v5645_v20  ;;  %449 = vmatprep.mubr.f32.mxu0 %v7906_v3  ;;  %v5903_v61 = vsel %vm1296_vm3, %v1313_v50, %v1315_v56 }
  0x2d   : > { %545 = vmatprep.mubr.f32.mxu1 %v7906_v3  ;;  %7977 = vst [vmem:[#allocation13_spill] sm:$0xff] %v5903_v61 }
  0x2f   : > { %5015 = vmatmul.mubr.msk.f32.gmra.mxu0 %vm253_vm1, %v5654_v21 }
  0x30   : > { %5031 = vmatmul.mubr.msk.f32.gmra.mxu1 %vm253_vm1, %v5657_v22  ;;  %455 = vmatprep.mubr.f32.mxu0 %v7906_v3 }
  0x31   : > { %551 = vmatprep.mubr.f32.mxu1 %v7906_v3 }
  0x33   : > { %5016 = vmatmul.mubr.msk.f32.gmra.mxu0 %vm253_vm1, %v5666_v23 }
  0x34   : > { %5032 = vmatmul.mubr.msk.f32.gmra.mxu1 %vm253_vm1, %v5669_v24  ;;  %461 = vmatprep.mubr.f32.mxu0 %v7906_v3 }
  0x35   : > { %557 = vmatprep.mubr.f32.mxu1 %v7906_v3 }
  0x37   : > { %5017 = vmatmul.mubr.msk.f32.gmra.mxu0 %vm253_vm1, %v5678_v25 }
  0x38   : > { %5033 = vmatmul.mubr.msk.f32.gmra.mxu1 %vm253_vm1, %v5681_v26  ;;  %467 = vmatprep.mubr.f32.mxu0 %v7906_v3 }
  0x39   : > { %563 = vmatprep.mubr.f32.mxu1 %v7906_v3 }
  0x3b   : > { %5018 = vmatmul.mubr.msk.f32.gmra.mxu0 %vm253_vm1, %v5690_v27 }
  0x3c   : > { %5034 = vmatmul.mubr.msk.f32.gmra.mxu1 %vm253_vm1, %v5693_v28  ;;  %473 = vmatprep.mubr.f32.mxu0 %v7906_v3 }
  0x3d   : > { %569 = vmatprep.mubr.f32.mxu1 %v7906_v3 }
  0x3f   : > { %5019 = vmatmul.mubr.msk.f32.gmra.mxu0 %vm253_vm1, %v5702_v29 }
  0x40   : > { %5035 = vmatmul.mubr.msk.f32.gmra.mxu1 %vm253_vm1, %v5705_v30  ;;  %479 = vmatprep.mubr.f32.mxu0 %v7906_v3 }
  0x41   : > { %575 = vmatprep.mubr.f32.mxu1 %v7906_v3 }
  0x43   : > { %5020 = vmatmul.mubr.msk.f32.gmra.mxu0 %vm253_vm1, %v5714_v31 }
  0x44   : > { %5036 = vmatmul.mubr.msk.f32.gmra.mxu1 %vm253_vm1, %v5717_v32  ;;  %485 = vmatprep.mubr.f32.mxu0 %v7906_v3 }
  0x45   : > { %581 = vmatprep.mubr.f32.mxu1 %v7906_v3 }
  0x47   : > { %5021 = vmatmul.mubr.msk.f32.gmra.mxu0 %vm253_vm1, %v5726_v33 }
  0x48   : > { %5037 = vmatmul.mubr.msk.f32.gmra.mxu1 %vm253_vm1, %v5729_v34  ;;  %491 = vmatprep.mubr.f32.mxu0 %v7906_v3 }
  0x49   : > { %587 = vmatprep.mubr.f32.mxu1 %v7906_v3 }
  0x4b   : > { %5022 = vmatmul.mubr.msk.f32.gmra.mxu0 %vm253_vm1, %v5738_v35 }
  0x4c   : > { %5038 = vmatmul.mubr.msk.f32.gmra.mxu1 %vm253_vm1, %v5741_v36  ;;  %497 = vmatprep.mubr.f32.mxu0 %v7906_v3 }
  0x4d   : > { %593 = vmatprep.mubr.f32.mxu1 %v7906_v3 }
  0x4f   : > { %5023 = vmatmul.mubr.msk.f32.gmra.mxu0 %vm253_vm1, %v5750_v37 }
  0x50   : > { %5039 = vmatmul.mubr.msk.f32.gmra.mxu1 %vm253_vm1, %v5753_v38  ;;  %503 = vmatprep.mubr.f32.mxu0 %v7906_v3 }
  0x51   : > { %599 = vmatprep.mubr.f32.mxu1 %v7906_v3 }
  0x53   : > { %5024 = vmatmul.mubr.msk.f32.gmra.mxu0 %vm253_vm1, %v5762_v39 }
  0x54   : > { %5040 = vmatmul.mubr.msk.f32.gmra.mxu1 %vm253_vm1, %v5765_v40  ;;  %509 = vmatprep.mubr.f32.mxu0 %v7906_v3 }
  0x55   : > { %605 = vmatprep.mubr.f32.mxu1 %v7906_v3 }
  0x57   : > { %5025 = vmatmul.mubr.msk.f32.gmra.mxu0 %vm253_vm1, %v5778_v45 }
  0x58   : > { %5041 = vmatmul.mubr.msk.f32.gmra.mxu1 %vm253_vm1, %v5781_v46  ;;  %1511 = vmatprep.mubr.f32.mxu0 %v7906_v3 }
  0x59   : > { %909 = vmatprep.mubr.f32.mxu1 %v7906_v3 }
  0x5b   : > { %5080 = vmatmul.mubr.msk.f32.vlgmr.msra.gmra.mxu0 %vm253_vm1, %v1299_v49  ;;  %v1312_v49 = vrot.slane %v5666_v23, 2 }
  0x5c   : > { %5045 = vmatmul.mubr.msk.f32.vlgmr.msra.gmra.mxu1 %vm253_vm1, %v697_v48  ;;  %5149 = vmatpush1.msk.msra.mxu0 %vm350_vm0, %v5576_v8  ;;  %v1307_v8 = vrot.slane %v5642_v19, 2  ;;  %v5874_v48 = vsel %vm1296_vm3, %v1308_v9, %v1310_v42 }
  0x5d   : > { %5114 = vmatpush1.msk.msra.mxu1 %vm350_vm0, %v5571_v7  ;;  %915 = vmatprep.mubr.f32.mxu1 %v7906_v3  ;;  %v5845_v7 = vsel %vm1296_vm3, %v1303_v57, %v1305_v2  ;;  %7973 = vst [vmem:[#allocation9_spill] sm:$0xff] %v5874_v48  ;;  %v5889_v54 = vsel %vm1296_vm3, %v1312_v49, %v1313_v50  ;;  %v715_v57 = vrot.slane %v5690_v27, 1  ;;  %v210_v2 = vld [vmem:[%s5583_s20 + $0x70] sm:$0x3]  ;;  %v1323_v49 = vrot.slane %v5726_v33, 2 }
  0x5e   : > { %1517 = vmatprep.mubr.f32.mxu0 %v7906_v3  ;;  %5183 = vmatprep.subr.msk.mxu1 %vm350_vm0, %v2834_v53  ;;  %v5860_v13 = vsel %vm1296_vm3, %v1307_v8, %v1308_v9  ;;  %v5886_v53 = vsel %vm694_vm2, %v710_v43, %v711_v44  ;;  %7975 = vst [vmem:[#allocation11_spill] sm:$0xff] %v5889_v54  ;;  %v718_v8 = vrot.slane %v210_v2, 1  ;;  %v1320_v9 = vrot.slane %v210_v2, 2  ;;  %v213_v50 = vld [vmem:[%s5583_s20 + $0x88] sm:$0x3] }
  0x5f   : > { %5081 = vmatmul.mubr.msk.f32.gmra.mxu0 %vm253_vm1, %v1301_v59  ;;  %5218 = vmatprep.subr.msk.mxu0 %vm350_vm0, %v3295_v62  ;;  %7971 = vst [vmem:[#allocation7_spill] sm:$0xff] %v5860_v13  ;;  %7974 = vst [vmem:[#allocation10_spill] sm:$0xff] %v5886_v53  ;;  %v5900_v59 = vsel %vm694_vm2, %v711_v44, %v713_v55  ;;  %v1317_v62 = vrot.slane %v5690_v27, 2  ;;  %v1322_v44 = vrot.slane %v5714_v31, 2  ;;  %v723_v56 = vrot.slane %v213_v50, 1 }
  0x60   : > { %5046 = vmatmul.mubr.msk.f32.gmra.mxu1 %vm253_vm1, %v699_v58  ;;  %1523 = vmatprep.mubr.f32.mxu0 %v7906_v3  ;;  %v716_v58 = vrot.slane %v5702_v29, 1  ;;  %7976 = vst [vmem:[#allocation12_spill] sm:$0xff] %v5900_v59  ;;  %v5932_v43 = vsel %vm1296_vm3, %v1318_v1, %v1320_v9  ;;  %v1328_v9 = vrot.slane %v5750_v37, 2 }
  0x61   : > { %921 = vmatprep.mubr.f32.mxu1 %v7906_v3  ;;  %v5918_v5 = vsel %vm1296_vm3, %v1317_v62, %v1318_v1  ;;  %7981 = vst [vmem:[#allocation17_spill] sm:$0xff] %v5932_v43  ;;  %v5947_v55 = vsel %vm1296_vm3, %v1322_v44, %v1323_v49  ;;  %v726_v62 = vrot.slane %v5750_v37, 1  ;;  %v5958_v1 = vsel %vm694_vm2, %v721_v41, %v723_v56 }
  0x62   : > { %v5915_v4 = vsel %vm694_vm2, %v715_v57, %v716_v58  ;;  %7979 = vst [vmem:[#allocation15_spill] sm:$0xff] %v5918_v5  ;;  %v5929_v42 = vsel %vm694_vm2, %v716_v58, %v718_v8  ;;  %7983 = vst [vmem:[#allocation19_spill] sm:$0xff] %v5947_v55  ;;  %v1325_v57 = vrot.slane %v213_v50, 2  ;;  %v725_v58 = vrot.slane %v5738_v35, 1 }
  0x63   : > { %5082 = vmatmul.mubr.msk.f32.gmra.mxu0 %vm253_vm1, %v5830_v0  ;;  %7978 = vst [vmem:[#allocation14_spill] sm:$0xff] %v5915_v4  ;;  %7980 = vst [vmem:[#allocation16_spill] sm:$0xff] %v5929_v42  ;;  %v1327_v8 = vrot.slane %v5738_v35, 2  ;;  %v728_v44 = vrot.slane %v216_v11, 1  ;;  %v1330_v50 = vrot.slane %v216_v11, 2  ;;  %v1332_v11 = vrot.slane %v5762_v39, 2 }
  0x64   : > { %5047 = vmatmul.mubr.msk.f32.gmra.mxu1 %vm253_vm1, %v5827_v63  ;;  %1529 = vmatprep.mubr.f32.mxu0 %v7906_v3  ;;  %7984 = vst [vmem:[#allocation20_spill] sm:$0xff] %v5958_v1  ;;  %v5961_v2 = vsel %vm1296_vm3, %v1323_v49, %v1325_v57  ;;  %v5973_v41 = vsel %vm694_vm2, %v725_v58, %v726_v62  ;;  %v730_v57 = vrot.slane %v5762_v39, 1 }
  0x65   : > { %927 = vmatprep.mubr.f32.mxu1 %v7906_v3  ;;  %7985 = vst [vmem:[#allocation21_spill] sm:$0xff] %v5961_v2  ;;  %7986 = vst [vmem:[#allocation22_spill] sm:$0xff] %v5973_v41  ;;  %v5976_v49 = vsel %vm1296_vm3, %v1327_v8, %v1328_v9  ;;  %v5983_v56 = vsel %vm694_vm2, %v726_v62, %v728_v44  ;;  %v5989_v58 = vsel %vm1296_vm3, %v1328_v9, %v1330_v50 }
  0x66   : > { %7987 = vst [vmem:[#allocation23_spill] sm:$0xff] %v5976_v49  ;;  %7988 = vst [vmem:[#allocation24_spill] sm:$0xff] %v5983_v56  ;;  %v731_v8 = vrot.slane %v5778_v45, 1 }
  0x67   : > { %5083 = vmatmul.mubr.msk.f32.gmra.mxu0 %vm253_vm1, %v5845_v7  ;;  %7989 = vst [vmem:[#allocation25_spill] sm:$0xff] %v5989_v58 }
  0x68   : > { %5048 = vmatmul.mubr.msk.f32.gmra.mxu1 %vm253_vm1, %v5842_v6  ;;  %1535 = vmatprep.mubr.f32.mxu0 %v7906_v3  ;;  %v6002_v62 = vsel %vm694_vm2, %v730_v57, %v731_v8 }
  0x69   : > { %933 = vmatprep.mubr.f32.mxu1 %v7906_v3  ;;  %7990 = vst [vmem:[#allocation26_spill] sm:$0xff] %v6002_v62 }
  0x6b   : > { %5084 = vmatmul.mubr.msk.f32.gmra.mxu0 %vm253_vm1, %v5860_v13 }
  0x6c   : > { %5049 = vmatmul.mubr.msk.f32.gmra.mxu1 %vm253_vm1, %v5857_v12  ;;  %1541 = vmatprep.mubr.f32.mxu0 %v7906_v3 }
  0x6d   : > { %939 = vmatprep.mubr.f32.mxu1 %v7906_v3 }
  0x6f   : > { %5085 = vmatmul.mubr.msk.f32.gmra.mxu0 %vm253_vm1, %v5874_v48 }
  0x70   : > { %5050 = vmatmul.mubr.msk.f32.gmra.mxu1 %vm253_vm1, %v5871_v47  ;;  %1547 = vmatprep.mubr.f32.mxu0 %v7906_v3 }
  0x71   : > { %945 = vmatprep.mubr.f32.mxu1 %v7906_v3 }
  0x73   : > { %5086 = vmatmul.mubr.msk.f32.gmra.mxu0 %vm253_vm1, %v5889_v54 }
  0x74   : > { %5051 = vmatmul.mubr.msk.f32.gmra.mxu1 %vm253_vm1, %v5886_v53  ;;  %1553 = vmatprep.mubr.f32.mxu0 %v7906_v3 }
  0x75   : > { %951 = vmatprep.mubr.f32.mxu1 %v7906_v3 }
  0x77   : > { %5087 = vmatmul.mubr.msk.f32.gmra.mxu0 %vm253_vm1, %v5903_v61  ;;  %v8010_v61 = vmov 0.0  }
  0x78   : > { %5052 = vmatmul.mubr.msk.f32.gmra.mxu1 %vm253_vm1, %v5900_v59  ;;  %1559 = vmatprep.mubr.f32.mxu0 %v7906_v3 }
  0x79   : > { %957 = vmatprep.mubr.f32.mxu1 %v7906_v3 }
  0x7b   : > { %5088 = vmatmul.mubr.msk.f32.gmra.mxu0 %vm253_vm1, %v5918_v5  ;;  %v222_v5 = vld [vmem:[%s5583_s20 + $0xd0] sm:$0x3] }
  0x7c   : > { %5053 = vmatmul.mubr.msk.f32.gmra.mxu1 %vm253_vm1, %v5915_v4  ;;  %1565 = vmatprep.mubr.f32.mxu0 %v7906_v3 }
  0x7d   : > { %963 = vmatprep.mubr.f32.mxu1 %v7906_v3 }
  0x7f   : > { %5089 = vmatmul.mubr.msk.f32.gmra.mxu0 %vm253_vm1, %v5932_v43  ;;  %v1338_v43 = vrot.slane %v5605_v14, 2 }
  0x80   : > { %5054 = vmatmul.mubr.msk.f32.gmra.mxu1 %vm253_vm1, %v5929_v42  ;;  %1571 = vmatprep.mubr.f32.mxu0 %v7906_v3 }
  0x81   : > { %969 = vmatprep.mubr.f32.mxu1 %v7906_v3 }
  0x83   : > { %5090 = vmatmul.mubr.msk.f32.gmra.mxu0 %vm253_vm1, %v5947_v55  ;;  %v219_v55 = vld [vmem:[%s5583_s20 + $0xb8] sm:$0x3] }
  0x84   : > { %5055 = vmatmul.mubr.msk.f32.gmra.mxu1 %vm253_vm1, %v5944_v51  ;;  %1577 = vmatprep.mubr.f32.mxu0 %v7906_v3  ;;  %v733_v44 = vrot.slane %v219_v55, 1  ;;  %v1335_v50 = vrot.slane %v219_v55, 2  ;;  %v1337_v55 = vrot.slane %v5589_v10, 2 }
  0x85   : > { %975 = vmatprep.mubr.f32.mxu1 %v7906_v3 }
  0x86   : > { %v6016_v57 = vsel %vm694_vm2, %v731_v8, %v733_v44  ;;  %v740_v44 = vrot.slane %v5621_v16, 1 }
  0x87   : > { %5091 = vmatmul.mubr.msk.f32.gmra.mxu0 %vm253_vm1, %v5961_v2  ;;  %v1333_v2 = vrot.slane %v5778_v45, 2  ;;  %7992 = vst [vmem:[#allocation28_spill] sm:$0xff] %v6016_v57 }
  0x88   : > { %5056 = vmatmul.mubr.msk.f32.gmra.mxu1 %vm253_vm1, %v5958_v1  ;;  %1583 = vmatprep.mubr.f32.mxu0 %v7906_v3 }
  0x89   : > { %981 = vmatprep.mubr.f32.mxu1 %v7906_v3  ;;  %v6005_v9 = vsel %vm1296_vm3, %v1332_v11, %v1333_v2  ;;  %v6019_v11 = vsel %vm1296_vm3, %v1333_v2, %v1335_v50  ;;  %v1342_v50 = vrot.slane %v5621_v16, 2 }
  0x8a   : > { %7991 = vst [vmem:[#allocation27_spill] sm:$0xff] %v6005_v9  ;;  %7993 = vst [vmem:[#allocation29_spill] sm:$0xff] %v6019_v11 }
  0x8b   : > { %5092 = vmatmul.mubr.msk.f32.gmra.mxu0 %vm253_vm1, %v5976_v49  ;;  %v736_v49 = vrot.slane %v5605_v14, 1  ;;  %v1340_v14 = vrot.slane %v222_v5, 2 }
  0x8c   : > { %5057 = vmatmul.mubr.msk.f32.gmra.mxu1 %vm253_vm1, %v5973_v41  ;;  %1589 = vmatprep.mubr.f32.mxu0 %v7906_v3 }
  0x8d   : > { %987 = vmatprep.mubr.f32.mxu1 %v7906_v3 }
  0x8f   : > { %5093 = vmatmul.mubr.msk.f32.gmra.mxu0 %vm253_vm1, %v5989_v58  ;;  %v735_v58 = vrot.slane %v5589_v10, 1  ;;  %v6034_v10 = vsel %vm1296_vm3, %v1337_v55, %v1338_v43  ;;  %v1343_v55 = vrot.slane %v5633_v18, 2 }
  0x90   : > { %5058 = vmatmul.mubr.msk.f32.gmra.mxu1 %vm253_vm1, %v5983_v56  ;;  %1595 = vmatprep.mubr.f32.mxu0 %v7906_v3  ;;  %7995 = vst [vmem:[#allocation31_spill] sm:$0xff] %v6034_v10 }
  0x91   : > { %993 = vmatprep.mubr.f32.mxu1 %v7906_v3  ;;  %v6031_v2 = vsel %vm694_vm2, %v735_v58, %v736_v49  ;;  %v6047_v58 = vsel %vm1296_vm3, %v1338_v43, %v1340_v14  ;;  %v746_v14 = vrot.slane %v5657_v22, 1 }
  0x92   : > { %7994 = vst [vmem:[#allocation30_spill] sm:$0xff] %v6031_v2  ;;  %7997 = vst [vmem:[#allocation33_spill] sm:$0xff] %v6047_v58 }
  0x93   : > { %5094 = vmatmul.mubr.msk.f32.gmra.mxu0 %vm253_vm1, %v6005_v9  ;;  %v738_v9 = vrot.slane %v222_v5, 1  ;;  %v741_v5 = vrot.slane %v5633_v18, 1 }
  0x94   : > { %5059 = vmatmul.mubr.msk.f32.gmra.mxu1 %vm253_vm1, %v6002_v62  ;;  %1601 = vmatprep.mubr.f32.mxu0 %v7906_v3 }
  0x95   : > { %999 = vmatprep.mubr.f32.mxu1 %v7906_v3  ;;  %v6041_v8 = vsel %vm694_vm2, %v736_v49, %v738_v9  ;;  %v6060_v43 = vsel %vm694_vm2, %v740_v44, %v741_v5  ;;  %v6063_v49 = vsel %vm1296_vm3, %v1342_v50, %v1343_v55  ;;  %v745_v9 = vrot.slane %v5645_v20, 1 }
  0x96   : > { %7996 = vst [vmem:[#allocation32_spill] sm:$0xff] %v6041_v8  ;;  %7998 = vst [vmem:[#allocation34_spill] sm:$0xff] %v6060_v43 }
  0x97   : > { %5095 = vmatmul.mubr.msk.f32.gmra.mxu0 %vm253_vm1, %v6019_v11  ;;  %v225_v11 = vld [vmem:[%s5583_s20 + $0xe8] sm:$0x3]  ;;  %7999 = vst [vmem:[#allocation35_spill] sm:$0xff] %v6063_v49 }
  0x98   : > { %5060 = vmatmul.mubr.msk.f32.gmra.mxu1 %vm253_vm1, %v6016_v57  ;;  %1607 = vmatprep.mubr.f32.mxu0 %v7906_v3  ;;  %v743_v16 = vrot.slane %v225_v11, 1  ;;  %v1345_v18 = vrot.slane %v225_v11, 2  ;;  %v1347_v11 = vrot.slane %v5645_v20, 2 }
  0x99   : > { %1005 = vmatprep.mubr.f32.mxu1 %v7906_v3 }
  0x9a   : > { %v6074_v44 = vsel %vm694_vm2, %v741_v5, %v743_v16  ;;  %v6077_v50 = vsel %vm1296_vm3, %v1343_v55, %v1345_v18  ;;  %v6089_v5 = vsel %vm694_vm2, %v745_v9, %v746_v14  ;;  %v750_v16 = vrot.slane %v5669_v24, 1 }
  0x9b   : > { %5096 = vmatmul.mubr.msk.f32.gmra.mxu0 %vm253_vm1, %v6034_v10  ;;  %8000 = vst [vmem:[#allocation36_spill] sm:$0xff] %v6074_v44  ;;  %8001 = vst [vmem:[#allocation37_spill] sm:$0xff] %v6077_v50  ;;  %v228_v10 = vld [vmem:[%s5583_s20 + $0x100] sm:$0x3]  ;;  %v751_v18 = vrot.slane %v5681_v26, 1 }
  0x9c   : > { %5061 = vmatmul.mubr.msk.f32.gmra.mxu1 %vm253_vm1, %v6031_v2  ;;  %1613 = vmatprep.mubr.f32.mxu0 %v7906_v3  ;;  %8002 = vst [vmem:[#allocation38_spill] sm:$0xff] %v6089_v5  ;;  %v748_v20 = vrot.slane %v228_v10, 1 }
  0x9d   : > { %1011 = vmatprep.mubr.f32.mxu1 %v7906_v3 }
  0x9e   : > { %v6103_v9 = vsel %vm694_vm2, %v746_v14, %v748_v20  ;;  %v6118_v14 = vsel %vm694_vm2, %v750_v16, %v751_v18  ;;  %v755_v20 = vrot.slane %v5693_v28, 1 }
  0x9f   : > { %5097 = vmatmul.mubr.msk.f32.gmra.mxu0 %vm253_vm1, %v6047_v58  ;;  %v1348_v58 = vrot.slane %v5657_v22, 2  ;;  %v1350_v22 = vrot.slane %v228_v10, 2  ;;  %8004 = vst [vmem:[#allocation40_spill] sm:$0xff] %v6103_v9  ;;  %v1352_v10 = vrot.slane %v5669_v24, 2  ;;  %8006 = vst [vmem:[#allocation42_spill] sm:$0xff] %v6118_v14 }
  0xa0   : > { %5062 = vmatmul.mubr.msk.f32.gmra.mxu1 %vm253_vm1, %v6041_v8  ;;  %1619 = vmatprep.mubr.f32.mxu0 %v7906_v3 }
  0xa1   : > { %1017 = vmatprep.mubr.f32.mxu1 %v7906_v3  ;;  %v6092_v55 = vsel %vm1296_vm3, %v1347_v11, %v1348_v58  ;;  %v6106_v11 = vsel %vm1296_vm3, %v1348_v58, %v1350_v22  ;;  %v756_v22 = vrot.slane %v5705_v30, 1 }
  0xa2   : > { %8003 = vst [vmem:[#allocation39_spill] sm:$0xff] %v6092_v55  ;;  %8005 = vst [vmem:[#allocation41_spill] sm:$0xff] %v6106_v11 }
  0xa3   : > { %5098 = vmatmul.mubr.msk.f32.gmra.mxu0 %vm253_vm1, %v6063_v49  ;;  %v231_v49 = vld [vmem:[%s5583_s20 + $0x118] sm:$0x3] }
  0xa4   : > { %5063 = vmatmul.mubr.msk.f32.gmra.mxu1 %vm253_vm1, %v6060_v43  ;;  %1625 = vmatprep.mubr.f32.mxu0 %v7906_v3  ;;  %v753_v24 = vrot.slane %v231_v49, 1 }
  0xa5   : > { %1023 = vmatprep.mubr.f32.mxu1 %v7906_v3 }
  0xa6   : > { %v6132_v16 = vsel %vm694_vm2, %v751_v18, %v753_v24  ;;  %v760_v18 = vrot.slane %v5717_v32, 1  ;;  %v761_v24 = vrot.slane %v5729_v34, 1 }
  0xa7   : > { %5099 = vmatmul.mubr.msk.f32.gmra.mxu0 %vm253_vm1, %v6077_v50  ;;  %v1353_v50 = vrot.slane %v5681_v26, 2  ;;  %v1355_v26 = vrot.slane %v231_v49, 2  ;;  %8008 = vst [vmem:[#allocation44_spill] sm:$0xff] %v6132_v16  ;;  %v1357_v49 = vrot.slane %v5693_v28, 2 }
  0xa8   : > { %5064 = vmatmul.mubr.msk.f32.gmra.mxu1 %vm253_vm1, %v6074_v44  ;;  %1631 = vmatprep.mubr.f32.mxu0 %v7906_v3 }
  0xa9   : > { %1029 = vmatprep.mubr.f32.mxu1 %v7906_v3  ;;  %v6121_v58 = vsel %vm1296_vm3, %v1352_v10, %v1353_v50  ;;  %v6135_v10 = vsel %vm1296_vm3, %v1353_v50, %v1355_v26  ;;  %v6147_v50 = vsel %vm694_vm2, %v755_v20, %v756_v22  ;;  %v1362_v26 = vrot.slane %v5717_v32, 2 }
  0xaa   : > { %8007 = vst [vmem:[#allocation43_spill] sm:$0xff] %v6121_v58  ;;  %8009 = vst [vmem:[#allocation45_spill] sm:$0xff] %v6135_v10  ;;  %v1363_v20 = vrot.slane %v5729_v34, 2 }
  0xab   : > { %5100 = vmatmul.mubr.msk.f32.gmra.mxu0 %vm253_vm1, %v6092_v55  ;;  %v234_v55 = vld [vmem:[%s5583_s20 + $0x130] sm:$0x3]  ;;  %8011 = vst [vmem:[#allocation46_spill] sm:$0xff] %v6147_v50 }
  0xac   : > { %5065 = vmatmul.mubr.msk.f32.gmra.mxu1 %vm253_vm1, %v6089_v5  ;;  %1637 = vmatprep.mubr.f32.mxu0 %v7906_v3  ;;  %v6179_v32 = vsel %vm1296_vm3, %v1362_v26, %v1363_v20  ;;  %v766_v26 = vrot.slane %v5753_v38, 1 }
  0xad   : > { %1035 = vmatprep.mubr.f32.mxu1 %v7906_v3  ;;  %8016 = vst [vmem:[#allocation51_spill] sm:$0xff] %v6179_v32 }
  0xaf   : > { %5101 = vmatmul.mubr.msk.f32.gmra.mxu0 %vm253_vm1, %v6106_v11  ;;  %v1358_v11 = vrot.slane %v5705_v30, 2 }
  0xb0   : > { %5066 = vmatmul.mubr.msk.f32.gmra.mxu1 %vm253_vm1, %v6103_v9  ;;  %1643 = vmatprep.mubr.f32.mxu0 %v7906_v3 }
  0xb1   : > { %1041 = vmatprep.mubr.f32.mxu1 %v7906_v3  ;;  %v6150_v28 = vsel %vm1296_vm3, %v1357_v49, %v1358_v11  ;;  %v237_v49 = vld [vmem:[%s5583_s20 + $0x148] sm:$0x3] }
  0xb2   : > { %8012 = vst [vmem:[#allocation47_spill] sm:$0xff] %v6150_v28 }
  0xb3   : > { %5102 = vmatmul.mubr.msk.f32.gmra.mxu0 %vm253_vm1, %v6121_v58  ;;  %v758_v58 = vrot.slane %v234_v55, 1 }
  0xb4   : > { %5067 = vmatmul.mubr.msk.f32.gmra.mxu1 %vm253_vm1, %v6118_v14  ;;  %1649 = vmatprep.mubr.f32.mxu0 %v7906_v3 }
  0xb5   : > { %1047 = vmatprep.mubr.f32.mxu1 %v7906_v3  ;;  %v1360_v3 = vrot.slane %v234_v55, 2  ;;  %v6157_v30 = vsel %vm694_vm2, %v756_v22, %v758_v58  ;;  %v6176_v58 = vsel %vm694_vm2, %v760_v18, %v761_v24  ;;  %v765_v18 = vrot.slane %v5741_v36, 1 }
  0xb6   : > { %8013 = vst [vmem:[#allocation48_spill] sm:$0xff] %v6157_v30  ;;  %8015 = vst [vmem:[#allocation50_spill] sm:$0xff] %v6176_v58 }
  0xb7   : > { %5103 = vmatmul.mubr.msk.f32.gmra.mxu0 %vm253_vm1, %v6135_v10  ;;  %v6160_v55 = vsel %vm1296_vm3, %v1358_v11, %v1360_v3  ;;  %v763_v3 = vrot.slane %v237_v49, 1  ;;  %v1365_v11 = vrot.slane %v237_v49, 2  ;;  %v1367_v49 = vrot.slane %v5741_v36, 2 }
  0xb8   : > { %5068 = vmatmul.mubr.msk.f32.gmra.mxu1 %vm253_vm1, %v6132_v16  ;;  %1655 = vmatprep.mubr.f32.mxu0 %v8010_v61  ;;  %8014 = vst [vmem:[#allocation49_spill] sm:$0xff] %v6160_v55 }
  0xb9   : > { %1053 = vmatprep.mubr.f32.mxu1 %v8010_v61  ;;  %v6186_v34 = vsel %vm694_vm2, %v761_v24, %v763_v3  ;;  %v6189_v22 = vsel %vm1296_vm3, %v1363_v20, %v1365_v11  ;;  %v6205_v3 = vsel %vm694_vm2, %v765_v18, %v766_v26  ;;  %v770_v11 = vrot.slane %v5765_v40, 1 }
  0xba   : > { %8017 = vst [vmem:[#allocation52_spill] sm:$0xff] %v6186_v34  ;;  %8018 = vst [vmem:[#allocation53_spill] sm:$0xff] %v6189_v22  ;;  %v771_v18 = vrot.slane %v5781_v46, 1 }
  0xbb   : > { %5104 = vmatmul.mubr.msk.f32.gmra.mxu0 %vm253_vm1, %v6150_v28  ;;  %v240_v28 = vld [vmem:[%s5583_s20 + $0x160] sm:$0x3]  ;;  %8019 = vst [vmem:[#allocation54_spill] sm:$0xff] %v6205_v3 }
  0xbc   : > { %5069 = vmatmul.mubr.msk.f32.gmra.mxu1 %vm253_vm1, %v6147_v50  ;;  %1661 = vmatprep.mubr.f32.mxu0 %v8010_v61  ;;  %v768_v24 = vrot.slane %v240_v28, 1  ;;  %v1370_v20 = vrot.slane %v240_v28, 2 }
  0xbd   : > { %1059 = vmatprep.mubr.f32.mxu1 %v8010_v61 }
  0xbf   : > { %5105 = vmatmul.mubr.msk.f32.gmra.mxu0 %vm253_vm1, %v6160_v55  ;;  %v1368_v55 = vrot.slane %v5753_v38, 2  ;;  %v6215_v38 = vsel %vm694_vm2, %v766_v26, %v768_v24 }
  0xc0   : > { %5070 = vmatmul.mubr.msk.f32.gmra.mxu1 %vm253_vm1, %v6157_v30  ;;  %1667 = vmatprep.mubr.f32.mxu0 %v8010_v61  ;;  %8021 = vst [vmem:[#allocation56_spill] sm:$0xff] %v6215_v38 }
  0xc1   : > { %1065 = vmatprep.mubr.f32.mxu1 %v8010_v61  ;;  %v6208_v36 = vsel %vm1296_vm3, %v1367_v49, %v1368_v55  ;;  %v6218_v28 = vsel %vm1296_vm3, %v1368_v55, %v1370_v20  ;;  %v1372_v49 = vrot.slane %v5765_v40, 2  ;;  %v6234_v55 = vsel %vm694_vm2, %v770_v11, %v771_v18 }
  0xc2   : > { %8020 = vst [vmem:[#allocation55_spill] sm:$0xff] %v6208_v36  ;;  %8022 = vst [vmem:[#allocation57_spill] sm:$0xff] %v6218_v28 }
  0xc3   : > { %5106 = vmatmul.mubr.msk.f32.gmra.mxu0 %vm253_vm1, %v6179_v32  ;;  %v243_v32 = vld [vmem:[%s5583_s20 + $0x178] sm:$0x3]  ;;  %8023 = vst [vmem:[#allocation58_spill] sm:$0xff] %v6234_v55 }
  0xc4   : > { %5071 = vmatmul.mubr.msk.f32.gmra.mxu1 %vm253_vm1, %v6176_v58  ;;  %1673 = vmatprep.mubr.f32.mxu0 %v8010_v61  ;;  %v773_v40 = vrot.slane %v243_v32, 1  ;;  %v1375_v24 = vrot.slane %v243_v32, 2 }
  0xc5   : > { %1071 = vmatprep.mubr.f32.mxu1 %v8010_v61 }
  0xc7   : > { %5107 = vmatmul.mubr.msk.f32.gmra.mxu0 %vm253_vm1, %v6189_v22  ;;  %v1373_v22 = vrot.slane %v5781_v46, 2  ;;  %v6246_v46 = vsel %vm694_vm2, %v771_v18, %v773_v40 }
  0xc8   : > { %5072 = vmatmul.mubr.msk.f32.gmra.mxu1 %vm253_vm1, %v6186_v34  ;;  %1679 = vmatprep.mubr.f32.mxu0 %v8010_v61  ;;  %8025 = vst [vmem:[#allocation60_spill] sm:$0xff] %v6246_v46 }
  0xc9   : > { %1077 = vmatprep.mubr.f32.mxu1 %v8010_v61  ;;  %v6237_v26 = vsel %vm1296_vm3, %v1372_v49, %v1373_v22  ;;  %v6249_v20 = vsel %vm1296_vm3, %v1373_v22, %v1375_v24  ;;  %v6272_v22 = vld [vmem:[%s7872_s1 + $0x38] sm:$0xff] }
  0xca   : > { %8024 = vst [vmem:[#allocation59_spill] sm:$0xff] %v6237_v26  ;;  %8026 = vst [vmem:[#allocation61_spill] sm:$0xff] %v6249_v20 }
  0xcb   : > { %5108 = vmatmul.mubr.msk.f32.gmra.mxu0 %vm253_vm1, %v6208_v36 }
  0xcc   : > { %5073 = vmatmul.mubr.msk.f32.gmra.mxu1 %vm253_vm1, %v6205_v3  ;;  %1685 = vmatprep.mubr.f32.mxu0 %v8010_v61 }
  0xcd   : > { %1083 = vmatprep.mubr.f32.mxu1 %v8010_v61 }
  0xcf   : > { %5109 = vmatmul.mubr.msk.f32.gmra.mxu0 %vm253_vm1, %v6218_v28 }
  0xd0   : > { %5074 = vmatmul.mubr.msk.f32.gmra.mxu1 %vm253_vm1, %v6215_v38  ;;  %1691 = vmatprep.mubr.f32.mxu0 %v8010_v61 }
  0xd1   : > { %1089 = vmatprep.mubr.f32.mxu1 %v8010_v61 }
  0xd3   : > { %5110 = vmatmul.mubr.msk.f32.gmra.mxu0 %vm253_vm1, %v6237_v26 }
  0xd4   : > { %5075 = vmatmul.mubr.msk.f32.gmra.mxu1 %vm253_vm1, %v6234_v55  ;;  %1697 = vmatprep.mubr.f32.mxu0 %v8010_v61 }
  0xd5   : > { %1095 = vmatprep.mubr.f32.mxu1 %v8010_v61 }
  0xd7   : > { %5111 = vmatmul.mubr.msk.f32.gmra.mxu0 %vm253_vm1, %v6249_v20 }
  0xd8   : > { %5076 = vmatmul.mubr.msk.f32.gmra.mxu1 %vm253_vm1, %v6246_v46  ;;  %2441 = vmatprep.mubr.f32.mxu0 %v8010_v61 }
  0xd9   : > { %1974 = vmatprep.mubr.f32.mxu1 %v8010_v61 }
  0xdb   : > { %v6257_v32 = vpop.f32.mrf.mxu0  ;;  %5150 = vmatmul.mubr.msk.f32.vlgmr.msra.gmra.mxu0 %vm253_vm1, %v5827_v63 }
  0xdc   : > { %v6259_v11 = vpop.f32.mrf.mxu1  ;;  %5115 = vmatmul.mubr.msk.f32.vlgmr.msra.gmra.mxu1 %vm253_vm1, %v5618_v15  ;;  %5219 = vmatpush1.msk.msra.mxu0 %vm350_vm0, %v5814_v60  ;;  %v3764_v15 = vcombine.high %v6272_v22, %v6272_v22 }
  0xdd   : > { %5184 = vmatpush1.msk.msra.mxu1 %vm350_vm0, %v5795_v52  ;;  %v6274_v18 = vpop.f32.mrf.mxu0  ;;  %1980 = vmatprep.mubr.f32.mxu1 %v8010_v61  ;;  %v6285_v52 = vld [vmem:[%s7872_s1 + $0x40] sm:$0xff] }
  0xde   : > { %v6276_v49 = vpop.f32.mrf.mxu1  ;;  %2447 = vmatprep.mubr.f32.mxu0 %v8010_v61  ;;  %v4230_v40 = vcombine.high %v6285_v52, %v6285_v52  ;;  %5253 = vmatprep.subr.msk.mxu1 %vm350_vm0, %v3764_v15 }
  0xdf   : > { %v6287_v60 = vpop.f32.mrf.mxu0  ;;  %5151 = vmatmul.mubr.msk.f32.gmra.mxu0 %vm253_vm1, %v5842_v6 }
  0xe0   : > { %v6289_v63 = vpop.f32.mrf.mxu1  ;;  %5116 = vmatmul.mubr.msk.f32.gmra.mxu1 %vm253_vm1, %v5630_v17  ;;  %2453 = vmatprep.mubr.f32.mxu0 %v8010_v61 }
  0xe1   : > { %8027 = vst [vmem:[#allocation62_spill] sm:$0xff] %v6289_v63  ;;  %1986 = vmatprep.mubr.f32.mxu1 %v8010_v61  ;;  %v6299_v24 = vpop.f32.mrf.mxu0  ;;  %5288 = vmatprep.subr.msk.mxu0 %vm350_vm0, %v4230_v40  ;;  %v6521_v63 = vld [vmem:[%s5583_s20 + $0xe0] sm:$0xff] }
  0xe2   : > { %v6301_v20 = vpop.f32.mrf.mxu1  ;;  %8060 = vst [vmem:[#allocation95_spill] sm:$0xff] %v6521_v63 }
  0xe3   : > { %8028 = vst [vmem:[#allocation63_spill] sm:$0xff] %v6301_v20  ;;  %v6305_v26 = vpop.f32.mrf.mxu0  ;;  %5152 = vmatmul.mubr.msk.f32.gmra.mxu0 %vm253_vm1, %v5857_v12 }
  0xe4   : > { %v6307_v17 = vpop.f32.mrf.mxu1  ;;  %5117 = vmatmul.mubr.msk.f32.gmra.mxu1 %vm253_vm1, %v5642_v19  ;;  %2459 = vmatprep.mubr.f32.mxu0 %v8010_v61 }
  0xe5   : > { %8029 = vst [vmem:[#allocation64_spill] sm:$0xff] %v6307_v17  ;;  %1992 = vmatprep.mubr.f32.mxu1 %v8010_v61  ;;  %v6315_v6 = vpop.f32.mrf.mxu0 }
  0xe6   : > { %v6317_v28 = vpop.f32.mrf.mxu1 }
  0xe7   : > { %8030 = vst [vmem:[#allocation65_spill] sm:$0xff] %v6317_v28  ;;  %v6319_v15 = vpop.f32.mrf.mxu0  ;;  %5153 = vmatmul.mubr.msk.f32.gmra.mxu0 %vm253_vm1, %v5871_v47 }
  0xe8   : > { %v6321_v40 = vpop.f32.mrf.mxu1  ;;  %5118 = vmatmul.mubr.msk.f32.gmra.mxu1 %vm253_vm1, %v5654_v21  ;;  %2465 = vmatprep.mubr.f32.mxu0 %v8010_v61 }
  0xe9   : > { %8031 = vst [vmem:[#allocation66_spill] sm:$0xff] %v6321_v40  ;;  %1998 = vmatprep.mubr.f32.mxu1 %v8010_v61  ;;  %v6329_v19 = vpop.f32.mrf.mxu0  ;;  %v6495_v40 = vld [vmem:[%s5583_s20 + $0xc8] sm:$0xff] }
  0xea   : > { %v6331_v12 = vpop.f32.mrf.mxu1  ;;  %8057 = vst [vmem:[#allocation92_spill] sm:$0xff] %v6495_v40 }
  0xeb   : > { %8032 = vst [vmem:[#allocation67_spill] sm:$0xff] %v6331_v12  ;;  %v6333_v36 = vpop.f32.mrf.mxu0  ;;  %5154 = vmatmul.mubr.msk.f32.gmra.mxu0 %vm253_vm1, %v5886_v53 }
  0xec   : > { %v6335_v10 = vpop.f32.mrf.mxu1  ;;  %5119 = vmatmul.mubr.msk.f32.gmra.mxu1 %vm253_vm1, %v5666_v23  ;;  %2471 = vmatprep.mubr.f32.mxu0 %v8010_v61 }
  0xed   : > { %8033 = vst [vmem:[#allocation68_spill] sm:$0xff] %v6335_v10  ;;  %2004 = vmatprep.mubr.f32.mxu1 %v8010_v61  ;;  %v6343_v21 = vpop.f32.mrf.mxu0 }
  0xee   : > { %v6345_v47 = vpop.f32.mrf.mxu1 }
  0xef   : > { %8034 = vst [vmem:[#allocation69_spill] sm:$0xff] %v6345_v47  ;;  %v6347_v54 = vpop.f32.mrf.mxu0  ;;  %5155 = vmatmul.mubr.msk.f32.gmra.mxu0 %vm253_vm1, %v5900_v59 }
  0xf0   : > { %v6349_v12 = vpop.f32.mrf.mxu1  ;;  %5120 = vmatmul.mubr.msk.f32.gmra.mxu1 %vm253_vm1, %v5678_v25  ;;  %2477 = vmatprep.mubr.f32.mxu0 %v8010_v61 }
  0xf1   : > { %8035 = vst [vmem:[#allocation70_spill] sm:$0xff] %v6349_v12  ;;  %2010 = vmatprep.mubr.f32.mxu1 %v8010_v61  ;;  %v6357_v23 = vpop.f32.mrf.mxu0 }
  0xf2   : > { %v6359_v53 = vpop.f32.mrf.mxu1 }
  0xf3   : > { %8036 = vst [vmem:[#allocation71_spill] sm:$0xff] %v6359_v53  ;;  %v6361_v10 = vpop.f32.mrf.mxu0  ;;  %5156 = vmatmul.mubr.msk.f32.gmra.mxu0 %vm253_vm1, %v5915_v4 }
  0xf4   : > { %v6363_v47 = vpop.f32.mrf.mxu1  ;;  %5121 = vmatmul.mubr.msk.f32.gmra.mxu1 %vm253_vm1, %v5690_v27  ;;  %2483 = vmatprep.mubr.f32.mxu0 %v8010_v61 }
  0xf5   : > { %8037 = vst [vmem:[#allocation72_spill] sm:$0xff] %v6363_v47  ;;  %2016 = vmatprep.mubr.f32.mxu1 %v8010_v61  ;;  %v6371_v25 = vpop.f32.mrf.mxu0 }
  0xf6   : > { %v6373_v59 = vpop.f32.mrf.mxu1 }
  0xf7   : > { %8038 = vst [vmem:[#allocation73_spill] sm:$0xff] %v6373_v59  ;;  %v6375_v12 = vpop.f32.mrf.mxu0  ;;  %5157 = vmatmul.mubr.msk.f32.gmra.mxu0 %vm253_vm1, %v5929_v42 }
  0xf8   : > { %v6377_v53 = vpop.f32.mrf.mxu1  ;;  %5122 = vmatmul.mubr.msk.f32.gmra.mxu1 %vm253_vm1, %v5702_v29  ;;  %2489 = vmatprep.mubr.f32.mxu0 %v8010_v61 }
  0xf9   : > { %8039 = vst [vmem:[#allocation74_spill] sm:$0xff] %v6377_v53  ;;  %2022 = vmatprep.mubr.f32.mxu1 %v8010_v61  ;;  %v6385_v27 = vpop.f32.mrf.mxu0 }
  0xfa   : > { %v6387_v4 = vpop.f32.mrf.mxu1 }
  0xfb   : > { %8040 = vst [vmem:[#allocation75_spill] sm:$0xff] %v6387_v4  ;;  %v6389_v47 = vpop.f32.mrf.mxu0  ;;  %5158 = vmatmul.mubr.msk.f32.gmra.mxu0 %vm253_vm1, %v5944_v51 }
  0xfc   : > { %v6391_v59 = vpop.f32.mrf.mxu1  ;;  %5123 = vmatmul.mubr.msk.f32.gmra.mxu1 %vm253_vm1, %v5714_v31  ;;  %2495 = vmatprep.mubr.f32.mxu0 %v8010_v61 }
  0xfd   : > { %8041 = vst [vmem:[#allocation76_spill] sm:$0xff] %v6391_v59  ;;  %2028 = vmatprep.mubr.f32.mxu1 %v8010_v61  ;;  %v6399_v29 = vpop.f32.mrf.mxu0 }
  0xfe   : > { %v6401_v42 = vpop.f32.mrf.mxu1 }
  0xff   : > { %8042 = vst [vmem:[#allocation77_spill] sm:$0xff] %v6401_v42  ;;  %v6403_v53 = vpop.f32.mrf.mxu0  ;;  %5159 = vmatmul.mubr.msk.f32.gmra.mxu0 %vm253_vm1, %v5958_v1 }
 0x100   : > { %v6405_v4 = vpop.f32.mrf.mxu1  ;;  %5124 = vmatmul.mubr.msk.f32.gmra.mxu1 %vm253_vm1, %v5726_v33  ;;  %2501 = vmatprep.mubr.f32.mxu0 %v8010_v61 }
 0x101   : > { %8043 = vst [vmem:[#allocation78_spill] sm:$0xff] %v6405_v4  ;;  %2034 = vmatprep.mubr.f32.mxu1 %v8010_v61  ;;  %v6413_v31 = vpop.f32.mrf.mxu0 }
 0x102   : > { %v6415_v51 = vpop.f32.mrf.mxu1 }
 0x103   : > { %8044 = vst [vmem:[#allocation79_spill] sm:$0xff] %v6415_v51  ;;  %v6417_v59 = vpop.f32.mrf.mxu0  ;;  %5160 = vmatmul.mubr.msk.f32.gmra.mxu0 %vm253_vm1, %v5973_v41 }
 0x104   : > { %v6419_v42 = vpop.f32.mrf.mxu1  ;;  %5125 = vmatmul.mubr.msk.f32.gmra.mxu1 %vm253_vm1, %v5738_v35  ;;  %2507 = vmatprep.mubr.f32.mxu0 %v8010_v61 }
 0x105   : > { %8045 = vst [vmem:[#allocation80_spill] sm:$0xff] %v6419_v42  ;;  %2040 = vmatprep.mubr.f32.mxu1 %v8010_v61  ;;  %v6427_v33 = vpop.f32.mrf.mxu0 }
 0x106   : > { %v6429_v1 = vpop.f32.mrf.mxu1 }
 0x107   : > { %8046 = vst [vmem:[#allocation81_spill] sm:$0xff] %v6429_v1  ;;  %v6431_v4 = vpop.f32.mrf.mxu0  ;;  %5161 = vmatmul.mubr.msk.f32.gmra.mxu0 %vm253_vm1, %v5983_v56 }
 0x108   : > { %v6433_v51 = vpop.f32.mrf.mxu1  ;;  %5126 = vmatmul.mubr.msk.f32.gmra.mxu1 %vm253_vm1, %v5750_v37  ;;  %2513 = vmatprep.mubr.f32.mxu0 %v8010_v61 }
 0x109   : > { %8047 = vst [vmem:[#allocation82_spill] sm:$0xff] %v6433_v51  ;;  %2046 = vmatprep.mubr.f32.mxu1 %v8010_v61  ;;  %v6441_v35 = vpop.f32.mrf.mxu0 }
 0x10a   : > { %v6443_v41 = vpop.f32.mrf.mxu1 }
 0x10b   : > { %8048 = vst [vmem:[#allocation83_spill] sm:$0xff] %v6443_v41  ;;  %v6445_v42 = vpop.f32.mrf.mxu0  ;;  %5162 = vmatmul.mubr.msk.f32.gmra.mxu0 %vm253_vm1, %v6002_v62 }
 0x10c   : > { %v6447_v1 = vpop.f32.mrf.mxu1  ;;  %5127 = vmatmul.mubr.msk.f32.gmra.mxu1 %vm253_vm1, %v5762_v39  ;;  %2519 = vmatprep.mubr.f32.mxu0 %v8010_v61 }
 0x10d   : > { %8049 = vst [vmem:[#allocation84_spill] sm:$0xff] %v6447_v1  ;;  %2052 = vmatprep.mubr.f32.mxu1 %v8010_v61  ;;  %v6455_v37 = vpop.f32.mrf.mxu0 }
 0x10e   : > { %v6457_v56 = vpop.f32.mrf.mxu1 }
 0x10f   : > { %8050 = vst [vmem:[#allocation85_spill] sm:$0xff] %v6457_v56  ;;  %v6459_v41 = vpop.f32.mrf.mxu0  ;;  %5163 = vmatmul.mubr.msk.f32.gmra.mxu0 %vm253_vm1, %v6016_v57 }
 0x110   : > { %v6461_v51 = vpop.f32.mrf.mxu1  ;;  %5128 = vmatmul.mubr.msk.f32.gmra.mxu1 %vm253_vm1, %v5778_v45  ;;  %2525 = vmatprep.mubr.f32.mxu0 %v8010_v61 }
 0x111   : > { %8051 = vst [vmem:[#allocation86_spill] sm:$0xff] %v6461_v51  ;;  %2058 = vmatprep.mubr.f32.mxu1 %v8010_v61  ;;  %v6469_v39 = vpop.f32.mrf.mxu0  ;;  %v6478_v51 = vld [vmem:[%s5583_s20 + $0xc0] sm:$0xff] }
 0x112   : > { %v6471_v62 = vpop.f32.mrf.mxu1  ;;  %8054 = vst [vmem:[#allocation89_spill] sm:$0xff] %v6478_v51 }
 0x113   : > { %8052 = vst [vmem:[#allocation87_spill] sm:$0xff] %v6471_v62  ;;  %v6473_v56 = vpop.f32.mrf.mxu0  ;;  %5164 = vmatmul.mubr.msk.f32.gmra.mxu0 %vm253_vm1, %v6031_v2 }
 0x114   : > { %v6475_v1 = vpop.f32.mrf.mxu1  ;;  %5129 = vmatmul.mubr.msk.f32.gmra.mxu1 %vm253_vm1, %v6478_v51  ;;  %2531 = vmatprep.mubr.f32.mxu0 %v8010_v61 }
 0x115   : > { %8053 = vst [vmem:[#allocation88_spill] sm:$0xff] %v6475_v1  ;;  %2064 = vmatprep.mubr.f32.mxu1 %v8010_v61  ;;  %v6486_v45 = vpop.f32.mrf.mxu0 }
 0x116   : > { %v6488_v57 = vpop.f32.mrf.mxu1 }
 0x117   : > { %8055 = vst [vmem:[#allocation90_spill] sm:$0xff] %v6488_v57  ;;  %v6490_v62 = vpop.f32.mrf.mxu0  ;;  %5165 = vmatmul.mubr.msk.f32.gmra.mxu0 %vm253_vm1, %v6041_v8 }
 0x118   : > { %v6492_v1 = vpop.f32.mrf.mxu1  ;;  %5130 = vmatmul.mubr.msk.f32.gmra.mxu1 %vm253_vm1, %v6495_v40  ;;  %2537 = vmatprep.mubr.f32.mxu0 %v8010_v61 }
 0x119   : > { %8056 = vst [vmem:[#allocation91_spill] sm:$0xff] %v6492_v1  ;;  %2070 = vmatprep.mubr.f32.mxu1 %v8010_v61  ;;  %v6503_v2 = vpop.f32.mrf.mxu0  ;;  %v6508_v1 = vld [vmem:[%s5583_s20 + $0xd8] sm:$0xff] }
 0x11a   : > { %v6505_v57 = vpop.f32.mrf.mxu1 }
 0x11b   : > { %8058 = vst [vmem:[#allocation93_spill] sm:$0xff] %v6505_v57  ;;  %v1513_v48 = vpop.f32.mrf.mxu0  ;;  %5166 = vmatmul.mubr.msk.f32.gmra.mxu0 %vm253_vm1, %v6060_v43 }
 0x11c   : > { %v911_v51 = vpop.f32.mrf.mxu1  ;;  %5131 = vmatmul.mubr.msk.f32.gmra.mxu1 %vm253_vm1, %v6508_v1  ;;  %2543 = vmatprep.mubr.f32.mxu0 %v8010_v61 }
 0x11d   : > { %v1166_v8 = vadd.f32 %v911_v51, %v6257_v32  ;;  %2076 = vmatprep.mubr.f32.mxu1 %v8010_v61  ;;  %v1515_v28 = vpop.f32.mrf.mxu0 }
 0x11e   : > { %v913_v40 = vpop.f32.mrf.mxu1 }
 0x11f   : > { %v6517_v17 = vadd.f32 %v1513_v48, %v1166_v8  ;;  %v1167_v57 = vadd.f32 %v913_v40, %v6274_v18  ;;  %v1519_v20 = vpop.f32.mrf.mxu0  ;;  %5167 = vmatmul.mubr.msk.f32.gmra.mxu0 %vm253_vm1, %v6074_v44  ;;  %v6551_v44 = vld [vmem:[%s5583_s20 + $0xf8] sm:$0xff] }
 0x120   : > { %v917_v13 = vpop.f32.mrf.mxu1  ;;  %5132 = vmatmul.mubr.msk.f32.gmra.mxu1 %vm253_vm1, %v6521_v63  ;;  %2549 = vmatprep.mubr.f32.mxu0 %v8010_v61  ;;  %v6536_v63 = vld [vmem:[%s5583_s20 + $0xf0] sm:$0xff] }
 0x121   : > { %8059 = vst [vmem:[#allocation94_spill] sm:$0xff] %v6517_v17  ;;  %v6527_v51 = vadd.f32 %v1515_v28, %v1167_v57  ;;  %v1168_v32 = vadd.f32 %v917_v13, %v6287_v60  ;;  %2082 = vmatprep.mubr.f32.mxu1 %v8010_v61  ;;  %v1521_v8 = vpop.f32.mrf.mxu0 }
 0x122   : > { %v919_v48 = vpop.f32.mrf.mxu1 }
 0x123   : > { %v6532_v18 = vadd.f32 %v1519_v20, %v1168_v32  ;;  %v1169_v40 = vadd.f32 %v919_v48, %v6299_v24  ;;  %v1525_v17 = vpop.f32.mrf.mxu0  ;;  %5168 = vmatmul.mubr.msk.f32.gmra.mxu0 %vm253_vm1, %v6089_v5  ;;  %v6566_v5 = vld [vmem:[%s5583_s20 + $0x108] sm:$0xff] }
 0x124   : > { %v923_v43 = vpop.f32.mrf.mxu1  ;;  %5133 = vmatmul.mubr.msk.f32.gmra.mxu1 %vm253_vm1, %v6536_v63  ;;  %2555 = vmatprep.mubr.f32.mxu0 %v8010_v61 }
 0x125   : > { %v6542_v13 = vadd.f32 %v1521_v8, %v1169_v40  ;;  %v1170_v57 = vadd.f32 %v923_v43, %v6305_v26  ;;  %2088 = vmatprep.mubr.f32.mxu1 %v8010_v61  ;;  %v1527_v20 = vpop.f32.mrf.mxu0 }
 0x126   : > { %v925_v28 = vpop.f32.mrf.mxu1 }
 0x127   : > { %v6547_v60 = vadd.f32 %v1525_v17, %v1170_v57  ;;  %v1171_v24 = vadd.f32 %v925_v28, %v6315_v6  ;;  %v1531_v48 = vpop.f32.mrf.mxu0  ;;  %5169 = vmatmul.mubr.msk.f32.gmra.mxu0 %vm253_vm1, %v6103_v9  ;;  %v6581_v9 = vld [vmem:[%s5583_s20 + $0x110] sm:$0xff] }
 0x128   : > { %v929_v32 = vpop.f32.mrf.mxu1  ;;  %5134 = vmatmul.mubr.msk.f32.gmra.mxu1 %vm253_vm1, %v6551_v44  ;;  %2561 = vmatprep.mubr.f32.mxu0 %v8010_v61 }
 0x129   : > { %v6557_v43 = vadd.f32 %v1527_v20, %v1171_v24  ;;  %v1172_v26 = vadd.f32 %v929_v32, %v6319_v15  ;;  %2094 = vmatprep.mubr.f32.mxu1 %v8010_v61  ;;  %v1533_v6 = vpop.f32.mrf.mxu0 }
 0x12a   : > { %v931_v17 = vpop.f32.mrf.mxu1 }
 0x12b   : > { %v6562_v8 = vadd.f32 %v1531_v48, %v1172_v26  ;;  %v1173_v40 = vadd.f32 %v931_v17, %v6329_v19  ;;  %v1537_v28 = vpop.f32.mrf.mxu0  ;;  %5170 = vmatmul.mubr.msk.f32.gmra.mxu0 %vm253_vm1, %v6118_v14  ;;  %v6596_v14 = vld [vmem:[%s5583_s20 + $0x120] sm:$0xff] }
 0x12c   : > { %v935_v57 = vpop.f32.mrf.mxu1  ;;  %5135 = vmatmul.mubr.msk.f32.gmra.mxu1 %vm253_vm1, %v6566_v5  ;;  %2567 = vmatprep.mubr.f32.mxu0 %v8010_v61 }
 0x12d   : > { %v6572_v15 = vadd.f32 %v1533_v6, %v1173_v40  ;;  %v1174_v20 = vadd.f32 %v935_v57, %v6333_v36  ;;  %2100 = vmatprep.mubr.f32.mxu1 %v8010_v61  ;;  %v1539_v24 = vpop.f32.mrf.mxu0 }
 0x12e   : > { %v937_v19 = vpop.f32.mrf.mxu1 }
 0x12f   : > { %v6577_v32 = vadd.f32 %v1537_v28, %v1174_v20  ;;  %v1175_v48 = vadd.f32 %v937_v19, %v6343_v21  ;;  %v1543_v17 = vpop.f32.mrf.mxu0  ;;  %5171 = vmatmul.mubr.msk.f32.gmra.mxu0 %vm253_vm1, %v6132_v16  ;;  %v6611_v16 = vld [vmem:[%s5583_s20 + $0x128] sm:$0xff] }
 0x130   : > { %v941_v26 = vpop.f32.mrf.mxu1  ;;  %5136 = vmatmul.mubr.msk.f32.gmra.mxu1 %vm253_vm1, %v6581_v9  ;;  %2573 = vmatprep.mubr.f32.mxu0 %v8010_v61 }
 0x131   : > { %v6587_v36 = vadd.f32 %v1539_v24, %v1175_v48  ;;  %v1176_v6 = vadd.f32 %v941_v26, %v6347_v54  ;;  %2106 = vmatprep.mubr.f32.mxu1 %v8010_v61  ;;  %v1545_v40 = vpop.f32.mrf.mxu0 }
 0x132   : > { %v943_v21 = vpop.f32.mrf.mxu1 }
 0x133   : > { %v6592_v57 = vadd.f32 %v1543_v17, %v1176_v6  ;;  %v1177_v28 = vadd.f32 %v943_v21, %v6357_v23  ;;  %v1549_v19 = vpop.f32.mrf.mxu0  ;;  %5172 = vmatmul.mubr.msk.f32.gmra.mxu0 %vm253_vm1, %v6147_v50  ;;  %v6626_v50 = vld [vmem:[%s5583_s20 + $0x138] sm:$0xff] }
 0x134   : > { %v947_v20 = vpop.f32.mrf.mxu1  ;;  %5137 = vmatmul.mubr.msk.f32.gmra.mxu1 %vm253_vm1, %v6596_v14  ;;  %2579 = vmatprep.mubr.f32.mxu0 %v8010_v61 }
 0x135   : > { %v6602_v54 = vadd.f32 %v1545_v40, %v1177_v28  ;;  %v1178_v24 = vadd.f32 %v947_v20, %v6361_v10  ;;  %2112 = vmatprep.mubr.f32.mxu1 %v8010_v61  ;;  %v1551_v48 = vpop.f32.mrf.mxu0 }
 0x136   : > { %v949_v23 = vpop.f32.mrf.mxu1 }
 0x137   : > { %v6607_v26 = vadd.f32 %v1549_v19, %v1178_v24  ;;  %v1179_v17 = vadd.f32 %v949_v23, %v6371_v25  ;;  %v1555_v21 = vpop.f32.mrf.mxu0  ;;  %5173 = vmatmul.mubr.msk.f32.gmra.mxu0 %vm253_vm1, %v6157_v30  ;;  %v6641_v30 = vld [vmem:[%s5583_s20 + $0x140] sm:$0xff] }
 0x138   : > { %v953_v6 = vpop.f32.mrf.mxu1  ;;  %5138 = vmatmul.mubr.msk.f32.gmra.mxu1 %vm253_vm1, %v6611_v16  ;;  %2585 = vmatprep.mubr.f32.mxu0 %v8010_v61 }
 0x139   : > { %v6617_v10 = vadd.f32 %v1551_v48, %v1179_v17  ;;  %v1180_v40 = vadd.f32 %v953_v6, %v6375_v12  ;;  %2118 = vmatprep.mubr.f32.mxu1 %v8010_v61  ;;  %v1557_v28 = vpop.f32.mrf.mxu0 }
 0x13a   : > { %v955_v25 = vpop.f32.mrf.mxu1 }
 0x13b   : > { %v6622_v20 = vadd.f32 %v1555_v21, %v1180_v40  ;;  %v1181_v19 = vadd.f32 %v955_v25, %v6385_v27  ;;  %v1561_v23 = vpop.f32.mrf.mxu0  ;;  %5174 = vmatmul.mubr.msk.f32.gmra.mxu0 %vm253_vm1, %v6176_v58  ;;  %v6656_v58 = vld [vmem:[%s5583_s20 + $0x150] sm:$0xff] }
 0x13c   : > { %v959_v24 = vpop.f32.mrf.mxu1  ;;  %5139 = vmatmul.mubr.msk.f32.gmra.mxu1 %vm253_vm1, %v6626_v50  ;;  %2591 = vmatprep.mubr.f32.mxu0 %v8010_v61 }
 0x13d   : > { %v6632_v12 = vadd.f32 %v1557_v28, %v1181_v19  ;;  %v1182_v48 = vadd.f32 %v959_v24, %v6389_v47  ;;  %2124 = vmatprep.mubr.f32.mxu1 %v8010_v61  ;;  %v1563_v17 = vpop.f32.mrf.mxu0 }
 0x13e   : > { %v961_v27 = vpop.f32.mrf.mxu1 }
 0x13f   : > { %v6637_v6 = vadd.f32 %v1561_v23, %v1182_v48  ;;  %v1183_v21 = vadd.f32 %v961_v27, %v6399_v29  ;;  %v1567_v25 = vpop.f32.mrf.mxu0  ;;  %5175 = vmatmul.mubr.msk.f32.gmra.mxu0 %vm253_vm1, %v6186_v34  ;;  %v6706_v34 = vld [vmem:[%s5583_s20 + $0x190] sm:$0x3] }
 0x140   : > { %v965_v40 = vpop.f32.mrf.mxu1  ;;  %5140 = vmatmul.mubr.msk.f32.gmra.mxu1 %vm253_vm1, %v6641_v30  ;;  %2597 = vmatprep.mubr.f32.mxu0 %v8010_v61 }
 0x141   : > { %v6647_v47 = vadd.f32 %v1563_v17, %v1183_v21  ;;  %v1184_v28 = vadd.f32 %v965_v40, %v6403_v53  ;;  %2130 = vmatprep.mubr.f32.mxu1 %v8010_v61  ;;  %v1569_v19 = vpop.f32.mrf.mxu0 }
 0x142   : > { %v967_v29 = vpop.f32.mrf.mxu1 }
 0x143   : > { %v6652_v24 = vadd.f32 %v1567_v25, %v1184_v28  ;;  %v1185_v23 = vadd.f32 %v967_v29, %v6413_v31  ;;  %v1573_v27 = vpop.f32.mrf.mxu0  ;;  %5176 = vmatmul.mubr.msk.f32.gmra.mxu0 %vm253_vm1, %v6205_v3  ;;  %v6671_v3 = vld [vmem:[%s5583_s20 + $0x158] sm:$0xff] }
 0x144   : > { %v971_v48 = vpop.f32.mrf.mxu1  ;;  %5141 = vmatmul.mubr.msk.f32.gmra.mxu1 %vm253_vm1, %v6656_v58  ;;  %2603 = vmatprep.mubr.f32.mxu0 %v8010_v61 }
 0x145   : > { %v6662_v53 = vadd.f32 %v1569_v19, %v1185_v23  ;;  %v1186_v17 = vadd.f32 %v971_v48, %v6417_v59  ;;  %2136 = vmatprep.mubr.f32.mxu1 %v8010_v61  ;;  %v1575_v21 = vpop.f32.mrf.mxu0  ;;  %v6683_v48 = vld [vmem:[%s5583_s20 + $0x180] sm:$0xff] }
 0x146   : > { %v973_v31 = vpop.f32.mrf.mxu1 }
 0x147   : > { %v6667_v40 = vadd.f32 %v1573_v27, %v1186_v17  ;;  %v1187_v25 = vadd.f32 %v973_v31, %v6427_v33  ;;  %v1579_v29 = vpop.f32.mrf.mxu0  ;;  %5177 = vmatmul.mubr.msk.f32.gmra.mxu0 %vm253_vm1, %v6215_v38  ;;  %v6686_v27 = vld [vmem:[%s5583_s20 + $0x188] sm:$0xff] }
 0x148   : > { %v977_v28 = vpop.f32.mrf.mxu1  ;;  %5142 = vmatmul.mubr.msk.f32.gmra.mxu1 %vm253_vm1, %v6671_v3  ;;  %2609 = vmatprep.mubr.f32.mxu0 %v8010_v61 }
 0x149   : > { %v6677_v59 = vadd.f32 %v1575_v21, %v1187_v25  ;;  %v1188_v19 = vadd.f32 %v977_v28, %v6431_v4  ;;  %2142 = vmatprep.mubr.f32.mxu1 %v8010_v61  ;;  %v1581_v23 = vpop.f32.mrf.mxu0  ;;  %v6692_v25 = vld [vmem:[%s5583_s20 + $0x168] sm:$0xff] }
 0x14a   : > { %v979_v33 = vpop.f32.mrf.mxu1 }
 0x14b   : > { %v6688_v17 = vadd.f32 %v1579_v29, %v1188_v19  ;;  %v1189_v31 = vadd.f32 %v979_v33, %v6441_v35  ;;  %v1585_v21 = vpop.f32.mrf.mxu0  ;;  %5178 = vmatmul.mubr.msk.f32.gmra.mxu0 %vm253_vm1, %v6234_v55  ;;  %v2362_v35 = vrot.slane %v6683_v48, 1  ;;  %v2363_v29 = vrot.slane %v6686_v27, 1 }
 0x14c   : > { %v983_v38 = vpop.f32.mrf.mxu1  ;;  %5143 = vmatmul.mubr.msk.f32.gmra.mxu1 %vm253_vm1, %v6692_v25  ;;  %2615 = vmatprep.mubr.f32.mxu0 %v8010_v61 }
 0x14d   : > { %8061 = vst [vmem:[#allocation96_spill] sm:$0xff] %v6688_v17  ;;  %v6698_v4 = vadd.f32 %v1581_v23, %v1189_v31  ;;  %v1190_v28 = vadd.f32 %v983_v38, %v6445_v42  ;;  %2148 = vmatprep.mubr.f32.mxu1 %v8010_v61  ;;  %v1587_v33 = vpop.f32.mrf.mxu0 }
 0x14e   : > { %v985_v19 = vpop.f32.mrf.mxu1 }
 0x14f   : > { %8062 = vst [vmem:[#allocation97_spill] sm:$0xff] %v6698_v4  ;;  %v6708_v17 = vadd.f32 %v1585_v21, %v1190_v28  ;;  %v1191_v55 = vadd.f32 %v985_v19, %v6455_v37  ;;  %v1591_v31 = vpop.f32.mrf.mxu0  ;;  %v6712_v4 = vld [vmem:[%s5583_s20 + $0x170] sm:$0xff]  ;;  %5179 = vmatmul.mubr.msk.f32.gmra.mxu0 %vm253_vm1, %v6246_v46  ;;  %v6724_v37 = vsel %vm694_vm2, %v2362_v35, %v2363_v29  ;;  %v2365_v21 = vrot.slane %v6706_v34, 1 }
 0x150   : > { %v989_v23 = vpop.f32.mrf.mxu1  ;;  %8064 = vst [vmem:[#allocation99_spill] sm:$0xff] %v6712_v4  ;;  %5144 = vmatmul.mubr.msk.f32.gmra.mxu1 %vm253_vm1, %v6712_v4  ;;  %2621 = vmatprep.mubr.f32.mxu0 %v8010_v61  ;;  %8065 = vst [vmem:[#allocation100_spill] sm:$0xff] %v6724_v37 }
 0x151   : > { %8063 = vst [vmem:[#allocation98_spill] sm:$0xff] %v6708_v17  ;;  %v6718_v42 = vadd.f32 %v1587_v33, %v1191_v55  ;;  %v1192_v38 = vadd.f32 %v989_v23, %v6459_v41  ;;  %2154 = vmatprep.mubr.f32.mxu1 %v8010_v61  ;;  %v1593_v19 = vpop.f32.mrf.mxu0  ;;  %v6740_v33 = vsel %vm694_vm2, %v2363_v29, %v2365_v21 }
 0x152   : > { %v991_v28 = vpop.f32.mrf.mxu1  ;;  %8066 = vst [vmem:[#allocation101_spill] sm:$0xff] %v6740_v33 }
 0x153   : > { %v6727_v17 = vadd.f32 %v1591_v31, %v1192_v38  ;;  %v1193_v4 = vadd.f32 %v991_v28, %v6469_v39  ;;  %v1597_v55 = vpop.f32.mrf.mxu0  ;;  %5180 = vmatmul.mubr.msk.f32.gmra.mxu0 %vm253_vm1, %v6724_v37 }
 0x154   : > { %v995_v46 = vpop.f32.mrf.mxu1  ;;  %5145 = vmatmul.mubr.msk.f32.gmra.mxu1 %vm253_vm1, %v6683_v48  ;;  %2627 = vmatprep.mubr.f32.mxu0 %v8010_v61 }
 0x155   : > { %v6734_v41 = vadd.f32 %v1593_v19, %v1193_v4  ;;  %v1194_v35 = vadd.f32 %v995_v46, %v6473_v56  ;;  %2160 = vmatprep.mubr.f32.mxu1 %v8010_v61  ;;  %v1599_v23 = vpop.f32.mrf.mxu0 }
 0x156   : > { %v997_v39 = vpop.f32.mrf.mxu1 }
 0x157   : > { %v6742_v31 = vadd.f32 %v1597_v55, %v1194_v35  ;;  %v1195_v38 = vadd.f32 %v997_v39, %v6486_v45  ;;  %v1603_v37 = vpop.f32.mrf.mxu0  ;;  %5181 = vmatmul.mubr.msk.f32.gmra.mxu0 %vm253_vm1, %v6740_v33  ;;  %v5400_v35 = vld [vmem:[%s5583_s20 + $0x30] sm:$0xff]  ;;  %v8075_v33 = vld [vmem:[#allocation9_spill] sm:$0xff] }
 0x158   : > { %v1001_v28 = vpop.f32.mrf.mxu1  ;;  %5146 = vmatmul.mubr.msk.f32.gmra.mxu1 %vm253_vm1, %v6686_v27  ;;  %3370 = vmatprep.mubr.f32.mxu0 %v8010_v61 }
 0x159   : > { %v6749_v56 = vadd.f32 %v1599_v23, %v1195_v38  ;;  %v1196_v46 = vadd.f32 %v1001_v28, %v6490_v62  ;;  %2907 = vmatprep.mubr.f32.mxu1 %v8010_v61  ;;  %v1605_v29 = vpop.f32.mrf.mxu0 }
 0x15a   : > { %v1003_v4 = vpop.f32.mrf.mxu1 }
 0x15b   : > { %v6754_v45 = vadd.f32 %v1603_v37, %v1196_v46  ;;  %v1197_v21 = vadd.f32 %v1003_v4, %v6503_v2  ;;  %v1609_v55 = vpop.f32.mrf.mxu0  ;;  %5220 = vmatmul.mubr.msk.f32.vlgmr.msra.gmra.mxu0 %vm253_vm1, %v5400_v35  ;;  %v8070_v35 = vld [vmem:[#allocation7_spill] sm:$0xff] }
 0x15c   : > { %v1007_v19 = vpop.f32.mrf.mxu1  ;;  %5185 = vmatmul.mubr.msk.f32.vlgmr.msra.gmra.mxu1 %vm253_vm1, %v5830_v0  ;;  %5289 = vmatpush1.msk.msra.mxu0 %vm350_vm0, %v6285_v52  ;;  %v8067_v52 = vld [vmem:[#allocation62_spill] sm:$0xff] }
 0x15d   : > { %v6761_v62 = vadd.f32 %v1605_v29, %v1197_v21  ;;  %v1198_v39 = vadd.f32 %v1007_v19, %v6259_v11  ;;  %5254 = vmatpush1.msk.msra.mxu1 %vm350_vm0, %v6272_v22  ;;  %v1611_v37 = vpop.f32.mrf.mxu0  ;;  %2913 = vmatprep.mubr.f32.mxu1 %v8010_v61  ;;  %v5401_v11 = vld [vmem:[%s5583_s20 + $0x38] sm:$0xff]  ;;  %v8069_v21 = vld [vmem:[#allocation63_spill] sm:$0xff] }
 0x15e   : > { %v1009_v2 = vpop.f32.mrf.mxu1  ;;  %3376 = vmatprep.mubr.f32.mxu0 %v8010_v61 }
 0x15f   : > { %v6770_v0 = vadd.f32 %v1609_v55, %v1198_v39  ;;  %v1199_v23 = vadd.f32 %v1009_v2, %v6276_v49  ;;  %v1615_v28 = vpop.f32.mrf.mxu0  ;;  %5221 = vmatmul.mubr.msk.f32.gmra.mxu0 %vm253_vm1, %v5401_v11  ;;  %v5402_v39 = vld [vmem:[%s5583_s20 + $0x48] sm:$0xff] }
 0x160   : > { %v1013_v38 = vpop.f32.mrf.mxu1  ;;  %5186 = vmatmul.mubr.msk.f32.gmra.mxu1 %vm253_vm1, %v5845_v7  ;;  %3382 = vmatprep.mubr.f32.mxu0 %v8010_v61 }
 0x161   : > { %v6777_v22 = vadd.f32 %v1611_v37, %v1199_v23  ;;  %v1200_v46 = vadd.f32 %v1013_v38, %v8067_v52  ;;  %2919 = vmatprep.mubr.f32.mxu1 %v8010_v61  ;;  %v1617_v29 = vpop.f32.mrf.mxu0  ;;  %v8072_v37 = vld [vmem:[#allocation64_spill] sm:$0xff]  ;;  %v8074_v52 = vld [vmem:[#allocation65_spill] sm:$0xff] }
 0x162   : > { %v1015_v4 = vpop.f32.mrf.mxu1 }
 0x163   : > { %v6782_v49 = vadd.f32 %v1615_v28, %v1200_v46  ;;  %v1201_v19 = vadd.f32 %v1015_v4, %v8069_v21  ;;  %v1621_v7 = vpop.f32.mrf.mxu0  ;;  %5222 = vmatmul.mubr.msk.f32.gmra.mxu0 %vm253_vm1, %v5402_v39 }
 0x164   : > { %v1019_v55 = vpop.f32.mrf.mxu1  ;;  %5187 = vmatmul.mubr.msk.f32.gmra.mxu1 %vm253_vm1, %v8070_v35  ;;  %3388 = vmatprep.mubr.f32.mxu0 %v8010_v61 }
 0x165   : > { %8068 = vst [vmem:[#allocation62_spill] sm:$0xff] %v6782_v49  ;;  %v6789_v2 = vadd.f32 %v1617_v29, %v1201_v19  ;;  %v1202_v23 = vadd.f32 %v1019_v55, %v8072_v37  ;;  %2925 = vmatprep.mubr.f32.mxu1 %v8010_v61  ;;  %v1623_v28 = vpop.f32.mrf.mxu0  ;;  %v5403_v29 = vld [vmem:[%s5583_s20 + $0x50] sm:$0xff]  ;;  %v8077_v55 = vld [vmem:[#allocation66_spill] sm:$0xff]  ;;  %v8080_v49 = vld [vmem:[#allocation11_spill] sm:$0xff] }
 0x166   : > { %v1021_v38 = vpop.f32.mrf.mxu1 }
 0x167   : > { %8071 = vst [vmem:[#allocation63_spill] sm:$0xff] %v6789_v2  ;;  %v6794_v11 = vadd.f32 %v1621_v7, %v1202_v23  ;;  %v1203_v46 = vadd.f32 %v1021_v38, %v8074_v52  ;;  %v1627_v21 = vpop.f32.mrf.mxu0  ;;  %5223 = vmatmul.mubr.msk.f32.gmra.mxu0 %vm253_vm1, %v5403_v29  ;;  %v8079_v38 = vld [vmem:[#allocation67_spill] sm:$0xff] }
 0x168   : > { %v1025_v4 = vpop.f32.mrf.mxu1  ;;  %5188 = vmatmul.mubr.msk.f32.gmra.mxu1 %vm253_vm1, %v8075_v33  ;;  %3394 = vmatprep.mubr.f32.mxu0 %v8010_v61 }
 0x169   : > { %8073 = vst [vmem:[#allocation7_spill] sm:$0xff] %v6794_v11  ;;  %v6801_v19 = vadd.f32 %v1623_v28, %v1203_v46  ;;  %v1204_v39 = vadd.f32 %v1025_v4, %v8077_v55  ;;  %2931 = vmatprep.mubr.f32.mxu1 %v8010_v61  ;;  %v1629_v37 = vpop.f32.mrf.mxu0  ;;  %v5404_v28 = vld [vmem:[%s5583_s20 + $0x60] sm:$0xff]  ;;  %v8082_v4 = vld [vmem:[#allocation68_spill] sm:$0xff] }
 0x16a   : > { %v1027_v7 = vpop.f32.mrf.mxu1 }
 0x16b   : > { %8076 = vst [vmem:[#allocation64_spill] sm:$0xff] %v6801_v19  ;;  %v6806_v23 = vadd.f32 %v1627_v21, %v1204_v39  ;;  %v1205_v52 = vadd.f32 %v1027_v7, %v8079_v38  ;;  %v1633_v2 = vpop.f32.mrf.mxu0  ;;  %5224 = vmatmul.mubr.msk.f32.gmra.mxu0 %vm253_vm1, %v5404_v28  ;;  %v8084_v7 = vld [vmem:[#allocation69_spill] sm:$0xff] }
 0x16c   : > { %v1031_v11 = vpop.f32.mrf.mxu1  ;;  %5189 = vmatmul.mubr.msk.f32.gmra.mxu1 %vm253_vm1, %v8080_v49  ;;  %3400 = vmatprep.mubr.f32.mxu0 %v8010_v61  ;;  %v8085_v49 = vld [vmem:[#allocation13_spill] sm:$0xff] }
 0x16d   : > { %8078 = vst [vmem:[#allocation65_spill] sm:$0xff] %v6806_v23  ;;  %v6813_v46 = vadd.f32 %v1629_v37, %v1205_v52  ;;  %v1206_v29 = vadd.f32 %v1031_v11, %v8082_v4  ;;  %2937 = vmatprep.mubr.f32.mxu1 %v8010_v61  ;;  %v1635_v55 = vpop.f32.mrf.mxu0  ;;  %v5405_v37 = vld [vmem:[%s5583_s20 + $0x68] sm:$0xff]  ;;  %v8087_v52 = vld [vmem:[#allocation70_spill] sm:$0xff] }
 0x16e   : > { %v1033_v21 = vpop.f32.mrf.mxu1 }
 0x16f   : > { %8081 = vst [vmem:[#allocation9_spill] sm:$0xff] %v6813_v46  ;;  %v6818_v39 = vadd.f32 %v1633_v2, %v1206_v29  ;;  %v1207_v38 = vadd.f32 %v1033_v21, %v8084_v7  ;;  %v1639_v19 = vpop.f32.mrf.mxu0  ;;  %5225 = vmatmul.mubr.msk.f32.gmra.mxu0 %vm253_vm1, %v5405_v37  ;;  %v8089_v21 = vld [vmem:[#allocation71_spill] sm:$0xff] }
 0x170   : > { %v1037_v23 = vpop.f32.mrf.mxu1  ;;  %5190 = vmatmul.mubr.msk.f32.gmra.mxu1 %vm253_vm1, %v8085_v49  ;;  %3406 = vmatprep.mubr.f32.mxu0 %v8010_v61  ;;  %v8090_v49 = vld [vmem:[#allocation15_spill] sm:$0xff] }
 0x171   : > { %8083 = vst [vmem:[#allocation66_spill] sm:$0xff] %v6818_v39  ;;  %v6825_v11 = vadd.f32 %v1635_v55, %v1207_v38  ;;  %v1208_v28 = vadd.f32 %v1037_v23, %v8087_v52  ;;  %2943 = vmatprep.mubr.f32.mxu1 %v8010_v61  ;;  %v1641_v4 = vpop.f32.mrf.mxu0  ;;  %v5406_v55 = vld [vmem:[%s5583_s20 + $0x78] sm:$0xff]  ;;  %v8092_v38 = vld [vmem:[#allocation72_spill] sm:$0xff] }
 0x172   : > { %v1039_v2 = vpop.f32.mrf.mxu1 }
 0x173   : > { %8086 = vst [vmem:[#allocation67_spill] sm:$0xff] %v6825_v11  ;;  %v6830_v29 = vadd.f32 %v1639_v19, %v1208_v28  ;;  %v1209_v7 = vadd.f32 %v1039_v2, %v8089_v21  ;;  %v1645_v46 = vpop.f32.mrf.mxu0  ;;  %5226 = vmatmul.mubr.msk.f32.gmra.mxu0 %vm253_vm1, %v5406_v55  ;;  %v8094_v2 = vld [vmem:[#allocation73_spill] sm:$0xff] }
 0x174   : > { %v1043_v39 = vpop.f32.mrf.mxu1  ;;  %5191 = vmatmul.mubr.msk.f32.gmra.mxu1 %vm253_vm1, %v8090_v49  ;;  %3412 = vmatprep.mubr.f32.mxu0 %v8010_v61  ;;  %v8095_v49 = vld [vmem:[#allocation17_spill] sm:$0xff] }
 0x175   : > { %8088 = vst [vmem:[#allocation68_spill] sm:$0xff] %v6830_v29  ;;  %v6837_v23 = vadd.f32 %v1641_v4, %v1209_v7  ;;  %v1210_v37 = vadd.f32 %v1043_v39, %v8092_v38  ;;  %2949 = vmatprep.mubr.f32.mxu1 %v8010_v61  ;;  %v1647_v52 = vpop.f32.mrf.mxu0  ;;  %v5407_v4 = vld [vmem:[%s5583_s20 + $0x80] sm:$0xff] }
 0x176   : > { %v1045_v19 = vpop.f32.mrf.mxu1  ;;  %v8097_v7 = vld [vmem:[#allocation74_spill] sm:$0xff] }
 0x177   : > { %8091 = vst [vmem:[#allocation69_spill] sm:$0xff] %v6837_v23  ;;  %v6842_v28 = vadd.f32 %v1645_v46, %v1210_v37  ;;  %v1211_v21 = vadd.f32 %v1045_v19, %v8094_v2  ;;  %v1651_v11 = vpop.f32.mrf.mxu0  ;;  %5227 = vmatmul.mubr.msk.f32.gmra.mxu0 %vm253_vm1, %v5407_v4  ;;  %v8099_v19 = vld [vmem:[#allocation75_spill] sm:$0xff] }
 0x178   : > { %v1049_v29 = vpop.f32.mrf.mxu1  ;;  %5192 = vmatmul.mubr.msk.f32.gmra.mxu1 %vm253_vm1, %v8095_v49  ;;  %3418 = vmatprep.mubr.f32.mxu0 %v8010_v61  ;;  %v8100_v49 = vld [vmem:[#allocation19_spill] sm:$0xff] }
 0x179   : > { %8093 = vst [vmem:[#allocation70_spill] sm:$0xff] %v6842_v28  ;;  %v6849_v39 = vadd.f32 %v1647_v52, %v1211_v21  ;;  %v1212_v55 = vadd.f32 %v1049_v29, %v8097_v7  ;;  %2955 = vmatprep.mubr.f32.mxu1 %v8010_v61  ;;  %v1653_v38 = vpop.f32.mrf.mxu0  ;;  %v5408_v52 = vld [vmem:[%s5583_s20 + $0x90] sm:$0xff] }
 0x17a   : > { %v1051_v46 = vpop.f32.mrf.mxu1  ;;  %v8102_v21 = vld [vmem:[#allocation76_spill] sm:$0xff] }
 0x17b   : > { %8096 = vst [vmem:[#allocation71_spill] sm:$0xff] %v6849_v39  ;;  %v6854_v37 = vadd.f32 %v1651_v11, %v1212_v55  ;;  %v1213_v2 = vadd.f32 %v1051_v46, %v8099_v19  ;;  %v1657_v23 = vpop.f32.mrf.mxu0  ;;  %5228 = vmatmul.mubr.msk.f32.gmra.mxu0 %vm253_vm1, %v5408_v52  ;;  %v8104_v46 = vld [vmem:[#allocation77_spill] sm:$0xff] }
 0x17c   : > { %v1055_v28 = vpop.f32.mrf.mxu1  ;;  %5193 = vmatmul.mubr.msk.f32.gmra.mxu1 %vm253_vm1, %v8100_v49  ;;  %3424 = vmatprep.mubr.f32.mxu0 %v8010_v61  ;;  %v8105_v49 = vld [vmem:[#allocation21_spill] sm:$0xff] }
 0x17d   : > { %8098 = vst [vmem:[#allocation72_spill] sm:$0xff] %v6854_v37  ;;  %v6861_v29 = vadd.f32 %v1653_v38, %v1213_v2  ;;  %v1214_v4 = vadd.f32 %v1055_v28, %v8102_v21  ;;  %2961 = vmatprep.mubr.f32.mxu1 %v8010_v61  ;;  %v1659_v7 = vpop.f32.mrf.mxu0  ;;  %v5409_v38 = vld [vmem:[%s5583_s20 + $0x98] sm:$0xff]  ;;  %v8107_v2 = vld [vmem:[#allocation78_spill] sm:$0xff] }
 0x17e   : > { %v1057_v11 = vpop.f32.mrf.mxu1 }
 0x17f   : > { %8101 = vst [vmem:[#allocation73_spill] sm:$0xff] %v6861_v29  ;;  %v6866_v55 = vadd.f32 %v1657_v23, %v1214_v4  ;;  %v1215_v19 = vadd.f32 %v1057_v11, %v8104_v46  ;;  %v1663_v39 = vpop.f32.mrf.mxu0  ;;  %5229 = vmatmul.mubr.msk.f32.gmra.mxu0 %vm253_vm1, %v5409_v38  ;;  %v8109_v11 = vld [vmem:[#allocation79_spill] sm:$0xff] }
 0x180   : > { %v1061_v37 = vpop.f32.mrf.mxu1  ;;  %5194 = vmatmul.mubr.msk.f32.gmra.mxu1 %vm253_vm1, %v8105_v49  ;;  %3430 = vmatprep.mubr.f32.mxu0 %v8010_v61  ;;  %v8110_v49 = vld [vmem:[#allocation23_spill] sm:$0xff] }
 0x181   : > { %8103 = vst [vmem:[#allocation74_spill] sm:$0xff] %v6866_v55  ;;  %v6873_v28 = vadd.f32 %v1659_v7, %v1215_v19  ;;  %v1216_v52 = vadd.f32 %v1061_v37, %v8107_v2  ;;  %2967 = vmatprep.mubr.f32.mxu1 %v8010_v61  ;;  %v1665_v21 = vpop.f32.mrf.mxu0  ;;  %v5410_v7 = vld [vmem:[%s5583_s20 + $0xa8] sm:$0xff]  ;;  %v8112_v19 = vld [vmem:[#allocation80_spill] sm:$0xff] }
 0x182   : > { %v1063_v23 = vpop.f32.mrf.mxu1 }
 0x183   : > { %8106 = vst [vmem:[#allocation75_spill] sm:$0xff] %v6873_v28  ;;  %v6878_v4 = vadd.f32 %v1663_v39, %v1216_v52  ;;  %v1217_v46 = vadd.f32 %v1063_v23, %v8109_v11  ;;  %v1669_v29 = vpop.f32.mrf.mxu0  ;;  %5230 = vmatmul.mubr.msk.f32.gmra.mxu0 %vm253_vm1, %v5410_v7  ;;  %v8114_v23 = vld [vmem:[#allocation81_spill] sm:$0xff]  ;;  %v5411_v7 = vld [vmem:[%s5583_s20 + $0xb0] sm:$0xff] }
 0x184   : > { %v1067_v55 = vpop.f32.mrf.mxu1  ;;  %5195 = vmatmul.mubr.msk.f32.gmra.mxu1 %vm253_vm1, %v8110_v49  ;;  %3436 = vmatprep.mubr.f32.mxu0 %v8010_v61  ;;  %v8115_v49 = vld [vmem:[#allocation25_spill] sm:$0xff] }
 0x185   : > { %8108 = vst [vmem:[#allocation76_spill] sm:$0xff] %v6878_v4  ;;  %v6885_v37 = vadd.f32 %v1665_v21, %v1217_v46  ;;  %v1218_v38 = vadd.f32 %v1067_v55, %v8112_v19  ;;  %2973 = vmatprep.mubr.f32.mxu1 %v8010_v61  ;;  %v1671_v2 = vpop.f32.mrf.mxu0  ;;  %v8117_v55 = vld [vmem:[#allocation82_spill] sm:$0xff] }
 0x186   : > { %v1069_v39 = vpop.f32.mrf.mxu1 }
 0x187   : > { %8111 = vst [vmem:[#allocation77_spill] sm:$0xff] %v6885_v37  ;;  %v6890_v52 = vadd.f32 %v1669_v29, %v1218_v38  ;;  %v1219_v11 = vadd.f32 %v1069_v39, %v8114_v23  ;;  %v1675_v28 = vpop.f32.mrf.mxu0  ;;  %5231 = vmatmul.mubr.msk.f32.gmra.mxu0 %vm253_vm1, %v5411_v7  ;;  %v8119_v39 = vld [vmem:[#allocation83_spill] sm:$0xff]  ;;  %v8121_v7 = vld [vmem:[#allocation89_spill] sm:$0xff] }
 0x188   : > { %v1073_v4 = vpop.f32.mrf.mxu1  ;;  %5196 = vmatmul.mubr.msk.f32.gmra.mxu1 %vm253_vm1, %v8115_v49  ;;  %3442 = vmatprep.mubr.f32.mxu0 %v8010_v61  ;;  %v8120_v49 = vld [vmem:[#allocation27_spill] sm:$0xff] }
 0x189   : > { %8113 = vst [vmem:[#allocation78_spill] sm:$0xff] %v6890_v52  ;;  %v6897_v21 = vadd.f32 %v1671_v2, %v1219_v11  ;;  %v1220_v46 = vadd.f32 %v1073_v4, %v8117_v55  ;;  %2979 = vmatprep.mubr.f32.mxu1 %v8010_v61  ;;  %v1677_v19 = vpop.f32.mrf.mxu0  ;;  %v8123_v4 = vld [vmem:[#allocation84_spill] sm:$0xff] }
 0x18a   : > { %v1075_v29 = vpop.f32.mrf.mxu1 }
 0x18b   : > { %8116 = vst [vmem:[#allocation79_spill] sm:$0xff] %v6897_v21  ;;  %v6902_v38 = vadd.f32 %v1675_v28, %v1220_v46  ;;  %v1221_v23 = vadd.f32 %v1075_v29, %v8119_v39  ;;  %v1681_v37 = vpop.f32.mrf.mxu0  ;;  %5232 = vmatmul.mubr.msk.f32.gmra.mxu0 %vm253_vm1, %v8121_v7  ;;  %v8125_v29 = vld [vmem:[#allocation85_spill] sm:$0xff]  ;;  %v8127_v7 = vld [vmem:[#allocation92_spill] sm:$0xff] }
 0x18c   : > { %v1079_v52 = vpop.f32.mrf.mxu1  ;;  %5197 = vmatmul.mubr.msk.f32.gmra.mxu1 %vm253_vm1, %v8120_v49  ;;  %3448 = vmatprep.mubr.f32.mxu0 %v8010_v61  ;;  %v8126_v49 = vld [vmem:[#allocation29_spill] sm:$0xff] }
 0x18d   : > { %8118 = vst [vmem:[#allocation80_spill] sm:$0xff] %v6902_v38  ;;  %v6909_v2 = vadd.f32 %v1677_v19, %v1221_v23  ;;  %v1222_v11 = vadd.f32 %v1079_v52, %v8123_v4  ;;  %2985 = vmatprep.mubr.f32.mxu1 %v8010_v61  ;;  %v1683_v55 = vpop.f32.mrf.mxu0  ;;  %v8129_v52 = vld [vmem:[#allocation86_spill] sm:$0xff] }
 0x18e   : > { %v1081_v28 = vpop.f32.mrf.mxu1 }
 0x18f   : > { %8122 = vst [vmem:[#allocation81_spill] sm:$0xff] %v6909_v2  ;;  %v6914_v46 = vadd.f32 %v1681_v37, %v1222_v11  ;;  %v1223_v39 = vadd.f32 %v1081_v28, %v8125_v29  ;;  %v1687_v21 = vpop.f32.mrf.mxu0  ;;  %5233 = vmatmul.mubr.msk.f32.gmra.mxu0 %vm253_vm1, %v8127_v7  ;;  %v8131_v28 = vld [vmem:[#allocation87_spill] sm:$0xff] }
 0x190   : > { %v1085_v38 = vpop.f32.mrf.mxu1  ;;  %5198 = vmatmul.mubr.msk.f32.gmra.mxu1 %vm253_vm1, %v8126_v49  ;;  %3454 = vmatprep.mubr.f32.mxu0 %v8010_v61  ;;  %v8132_v49 = vld [vmem:[#allocation31_spill] sm:$0xff] }
 0x191   : > { %8124 = vst [vmem:[#allocation82_spill] sm:$0xff] %v6914_v46  ;;  %v6921_v19 = vadd.f32 %v1683_v55, %v1223_v39  ;;  %v1224_v23 = vadd.f32 %v1085_v38, %v8129_v52  ;;  %2991 = vmatprep.mubr.f32.mxu1 %v8010_v61  ;;  %v1689_v4 = vpop.f32.mrf.mxu0  ;;  %v8134_v38 = vld [vmem:[#allocation88_spill] sm:$0xff] }
 0x192   : > { %v1087_v37 = vpop.f32.mrf.mxu1 }
 0x193   : > { %8128 = vst [vmem:[#allocation83_spill] sm:$0xff] %v6921_v19  ;;  %v6926_v11 = vadd.f32 %v1687_v21, %v1224_v23  ;;  %v1225_v29 = vadd.f32 %v1087_v37, %v8131_v28  ;;  %v1693_v2 = vpop.f32.mrf.mxu0  ;;  %5234 = vmatmul.mubr.msk.f32.gmra.mxu0 %vm253_vm1, %v6508_v1  ;;  %v8136_v23 = vld [vmem:[#allocation90_spill] sm:$0xff]  ;;  %v8137_v19 = vld [vmem:[#allocation33_spill] sm:$0xff]  ;;  %v8138_v1 = vld [vmem:[#allocation95_spill] sm:$0xff] }
 0x194   : > { %v1091_v46 = vpop.f32.mrf.mxu1  ;;  %5199 = vmatmul.mubr.msk.f32.gmra.mxu1 %vm253_vm1, %v8132_v49  ;;  %3460 = vmatprep.mubr.f32.mxu0 %v8010_v61 }
 0x195   : > { %8130 = vst [vmem:[#allocation89_spill] sm:$0xff] %v6926_v11  ;;  %v6933_v55 = vadd.f32 %v1689_v4, %v1225_v29  ;;  %v1226_v39 = vadd.f32 %v1091_v46, %v8134_v38  ;;  %2997 = vmatprep.mubr.f32.mxu1 %v8010_v61  ;;  %v1695_v7 = vpop.f32.mrf.mxu0  ;;  %v8139_v46 = vld [vmem:[#allocation91_spill] sm:$0xff] }
 0x196   : > { %v1093_v21 = vpop.f32.mrf.mxu1 }
 0x197   : > { %8133 = vst [vmem:[#allocation84_spill] sm:$0xff] %v6933_v55  ;;  %v6938_v52 = vadd.f32 %v1693_v2, %v1226_v39  ;;  %v1227_v37 = vadd.f32 %v1093_v21, %v8136_v23  ;;  %v1699_v11 = vpop.f32.mrf.mxu0  ;;  %5235 = vmatmul.mubr.msk.f32.gmra.mxu0 %vm253_vm1, %v8138_v1  ;;  %v8141_v21 = vld [vmem:[#allocation93_spill] sm:$0xff] }
 0x198   : > { %v1097_v28 = vpop.f32.mrf.mxu1  ;;  %5200 = vmatmul.mubr.msk.f32.gmra.mxu1 %vm253_vm1, %v8137_v19  ;;  %3466 = vmatprep.mubr.f32.mxu0 %v8010_v61  ;;  %v8142_v19 = vld [vmem:[#allocation35_spill] sm:$0xff] }
 0x199   : > { %8135 = vst [vmem:[#allocation85_spill] sm:$0xff] %v6938_v52  ;;  %v6945_v4 = vadd.f32 %v1695_v7, %v1227_v37  ;;  %v1228_v29 = vadd.f32 %v1097_v28, %v8139_v46  ;;  %3003 = vmatprep.mubr.f32.mxu1 %v8010_v61  ;;  %v1701_v38 = vpop.f32.mrf.mxu0  ;;  %v8143_v37 = vld [vmem:[#allocation94_spill] sm:$0xff] }
 0x19a   : > { %v1099_v2 = vpop.f32.mrf.mxu1 }
 0x19b   : > { %v6950_v39 = vadd.f32 %v1699_v11, %v1228_v29  ;;  %v1229_v23 = vadd.f32 %v1099_v2, %v8141_v21  ;;  %v2443_v55 = vpop.f32.mrf.mxu0  ;;  %5236 = vmatmul.mubr.msk.f32.gmra.mxu0 %vm253_vm1, %v6536_v63 }
 0x19c   : > { %v1976_v52 = vpop.f32.mrf.mxu1  ;;  %5201 = vmatmul.mubr.msk.f32.gmra.mxu1 %vm253_vm1, %v8142_v19  ;;  %3472 = vmatprep.mubr.f32.mxu0 %v8010_v61 }
 0x19d   : > { %8140 = vst [vmem:[#allocation92_spill] sm:$0xff] %v6950_v39  ;;  %v6957_v7 = vadd.f32 %v1701_v38, %v1229_v23  ;;  %v2231_v28 = vadd.f32 %v1976_v52, %v8143_v37  ;;  %3009 = vmatprep.mubr.f32.mxu1 %v8010_v61  ;;  %v2445_v1 = vpop.f32.mrf.mxu0  ;;  %v8144_v39 = vld [vmem:[#allocation37_spill] sm:$0xff] }
 0x19e   : > { %v1978_v11 = vpop.f32.mrf.mxu1 }
 0x19f   : > { %v6962_v46 = vadd.f32 %v2443_v55, %v2231_v28  ;;  %v2232_v29 = vadd.f32 %v1978_v11, %v6527_v51  ;;  %v2449_v21 = vpop.f32.mrf.mxu0  ;;  %5237 = vmatmul.mubr.msk.f32.gmra.mxu0 %vm253_vm1, %v6551_v44  ;;  %v8145_v11 = vld [vmem:[#allocation39_spill] sm:$0xff] }
 0x1a0   : > { %v1982_v2 = vpop.f32.mrf.mxu1  ;;  %5202 = vmatmul.mubr.msk.f32.gmra.mxu1 %vm253_vm1, %v8144_v39  ;;  %3478 = vmatprep.mubr.f32.mxu0 %v8010_v61 }
 0x1a1   : > { %v6969_v63 = vadd.f32 %v2445_v1, %v2232_v29  ;;  %v2233_v52 = vadd.f32 %v1982_v2, %v6532_v18  ;;  %3015 = vmatprep.mubr.f32.mxu1 %v8010_v61  ;;  %v2451_v38 = vpop.f32.mrf.mxu0 }
 0x1a2   : > { %v1984_v55 = vpop.f32.mrf.mxu1 }
 0x1a3   : > { %v6974_v23 = vadd.f32 %v2449_v21, %v2233_v52  ;;  %v2234_v51 = vadd.f32 %v1984_v55, %v6542_v13  ;;  %v2455_v28 = vpop.f32.mrf.mxu0  ;;  %5238 = vmatmul.mubr.msk.f32.gmra.mxu0 %vm253_vm1, %v6566_v5  ;;  %v8146_v55 = vld [vmem:[#allocation41_spill] sm:$0xff] }
 0x1a4   : > { %v1988_v37 = vpop.f32.mrf.mxu1  ;;  %5203 = vmatmul.mubr.msk.f32.gmra.mxu1 %vm253_vm1, %v8145_v11  ;;  %3484 = vmatprep.mubr.f32.mxu0 %v8010_v61 }
 0x1a5   : > { %v6981_v44 = vadd.f32 %v2451_v38, %v2234_v51  ;;  %v2235_v18 = vadd.f32 %v1988_v37, %v6547_v60  ;;  %3021 = vmatprep.mubr.f32.mxu1 %v8010_v61  ;;  %v2457_v29 = vpop.f32.mrf.mxu0 }
 0x1a6   : > { %v1990_v1 = vpop.f32.mrf.mxu1 }
 0x1a7   : > { %v6986_v2 = vadd.f32 %v2455_v28, %v2235_v18  ;;  %v2236_v13 = vadd.f32 %v1990_v1, %v6557_v43  ;;  %v2461_v52 = vpop.f32.mrf.mxu0  ;;  %5239 = vmatmul.mubr.msk.f32.gmra.mxu0 %vm253_vm1, %v6581_v9  ;;  %v8147_v1 = vld [vmem:[#allocation43_spill] sm:$0xff] }
 0x1a8   : > { %v1994_v21 = vpop.f32.mrf.mxu1  ;;  %5204 = vmatmul.mubr.msk.f32.gmra.mxu1 %vm253_vm1, %v8146_v55  ;;  %3490 = vmatprep.mubr.f32.mxu0 %v8010_v61 }
 0x1a9   : > { %v6993_v5 = vadd.f32 %v2457_v29, %v2236_v13  ;;  %v2237_v60 = vadd.f32 %v1994_v21, %v6562_v8  ;;  %3027 = vmatprep.mubr.f32.mxu1 %v8010_v61  ;;  %v2463_v51 = vpop.f32.mrf.mxu0 }
 0x1aa   : > { %v1996_v38 = vpop.f32.mrf.mxu1 }
 0x1ab   : > { %v6998_v37 = vadd.f32 %v2461_v52, %v2237_v60  ;;  %v2238_v43 = vadd.f32 %v1996_v38, %v6572_v15  ;;  %v2467_v18 = vpop.f32.mrf.mxu0  ;;  %5240 = vmatmul.mubr.msk.f32.gmra.mxu0 %vm253_vm1, %v6596_v14  ;;  %v8148_v38 = vld [vmem:[#allocation45_spill] sm:$0xff] }
 0x1ac   : > { %v2000_v28 = vpop.f32.mrf.mxu1  ;;  %5205 = vmatmul.mubr.msk.f32.gmra.mxu1 %vm253_vm1, %v8147_v1  ;;  %3496 = vmatprep.mubr.f32.mxu0 %v8010_v61 }
 0x1ad   : > { %v7005_v9 = vadd.f32 %v2463_v51, %v2238_v43  ;;  %v2239_v8 = vadd.f32 %v2000_v28, %v6577_v32  ;;  %3033 = vmatprep.mubr.f32.mxu1 %v8010_v61  ;;  %v2469_v13 = vpop.f32.mrf.mxu0 }
 0x1ae   : > { %v2002_v29 = vpop.f32.mrf.mxu1 }
 0x1af   : > { %v7010_v21 = vadd.f32 %v2467_v18, %v2239_v8  ;;  %v2240_v15 = vadd.f32 %v2002_v29, %v6587_v36  ;;  %v2473_v60 = vpop.f32.mrf.mxu0  ;;  %5241 = vmatmul.mubr.msk.f32.gmra.mxu0 %vm253_vm1, %v6611_v16  ;;  %v8149_v29 = vld [vmem:[#allocation47_spill] sm:$0xff] }
 0x1b0   : > { %v2006_v52 = vpop.f32.mrf.mxu1  ;;  %5206 = vmatmul.mubr.msk.f32.gmra.mxu1 %vm253_vm1, %v8148_v38  ;;  %3502 = vmatprep.mubr.f32.mxu0 %v8010_v61 }
 0x1b1   : > { %v7017_v14 = vadd.f32 %v2469_v13, %v2240_v15  ;;  %v2241_v32 = vadd.f32 %v2006_v52, %v6592_v57  ;;  %3039 = vmatprep.mubr.f32.mxu1 %v8010_v61  ;;  %v2475_v43 = vpop.f32.mrf.mxu0 }
 0x1b2   : > { %v2008_v51 = vpop.f32.mrf.mxu1 }
 0x1b3   : > { %v7022_v28 = vadd.f32 %v2473_v60, %v2241_v32  ;;  %v2242_v36 = vadd.f32 %v2008_v51, %v6602_v54  ;;  %v2479_v8 = vpop.f32.mrf.mxu0  ;;  %5242 = vmatmul.mubr.msk.f32.gmra.mxu0 %vm253_vm1, %v6626_v50  ;;  %v8150_v51 = vld [vmem:[#allocation49_spill] sm:$0xff] }
 0x1b4   : > { %v2012_v18 = vpop.f32.mrf.mxu1  ;;  %5207 = vmatmul.mubr.msk.f32.gmra.mxu1 %vm253_vm1, %v8149_v29  ;;  %3508 = vmatprep.mubr.f32.mxu0 %v8010_v61 }
 0x1b5   : > { %v7029_v16 = vadd.f32 %v2475_v43, %v2242_v36  ;;  %v2243_v57 = vadd.f32 %v2012_v18, %v6607_v26  ;;  %3045 = vmatprep.mubr.f32.mxu1 %v8010_v61  ;;  %v2481_v15 = vpop.f32.mrf.mxu0 }
 0x1b6   : > { %v2014_v13 = vpop.f32.mrf.mxu1 }
 0x1b7   : > { %v7034_v52 = vadd.f32 %v2479_v8, %v2243_v57  ;;  %v2244_v54 = vadd.f32 %v2014_v13, %v6617_v10  ;;  %v2485_v32 = vpop.f32.mrf.mxu0  ;;  %5243 = vmatmul.mubr.msk.f32.gmra.mxu0 %vm253_vm1, %v6641_v30  ;;  %v8151_v13 = vld [vmem:[#allocation51_spill] sm:$0xff] }
 0x1b8   : > { %v2018_v60 = vpop.f32.mrf.mxu1  ;;  %5208 = vmatmul.mubr.msk.f32.gmra.mxu1 %vm253_vm1, %v8150_v51  ;;  %3514 = vmatprep.mubr.f32.mxu0 %v8010_v61 }
 0x1b9   : > { %v7041_v50 = vadd.f32 %v2481_v15, %v2244_v54  ;;  %v2245_v26 = vadd.f32 %v2018_v60, %v6622_v20  ;;  %3051 = vmatprep.mubr.f32.mxu1 %v8010_v61  ;;  %v2487_v36 = vpop.f32.mrf.mxu0 }
 0x1ba   : > { %v2020_v43 = vpop.f32.mrf.mxu1 }
 0x1bb   : > { %v7046_v18 = vadd.f32 %v2485_v32, %v2245_v26  ;;  %v2246_v10 = vadd.f32 %v2020_v43, %v6632_v12  ;;  %v2491_v57 = vpop.f32.mrf.mxu0  ;;  %5244 = vmatmul.mubr.msk.f32.gmra.mxu0 %vm253_vm1, %v6656_v58  ;;  %v8152_v43 = vld [vmem:[#allocation53_spill] sm:$0xff] }
 0x1bc   : > { %v2024_v8 = vpop.f32.mrf.mxu1  ;;  %5209 = vmatmul.mubr.msk.f32.gmra.mxu1 %vm253_vm1, %v8151_v13  ;;  %3520 = vmatprep.mubr.f32.mxu0 %v8010_v61 }
 0x1bd   : > { %v7053_v30 = vadd.f32 %v2487_v36, %v2246_v10  ;;  %v2247_v20 = vadd.f32 %v2024_v8, %v6637_v6  ;;  %3057 = vmatprep.mubr.f32.mxu1 %v8010_v61  ;;  %v2493_v54 = vpop.f32.mrf.mxu0 }
 0x1be   : > { %v2026_v15 = vpop.f32.mrf.mxu1 }
 0x1bf   : > { %v7058_v60 = vadd.f32 %v2491_v57, %v2247_v20  ;;  %v2248_v12 = vadd.f32 %v2026_v15, %v6647_v47  ;;  %v2497_v26 = vpop.f32.mrf.mxu0  ;;  %5245 = vmatmul.mubr.msk.f32.gmra.mxu0 %vm253_vm1, %v6671_v3  ;;  %v8154_v15 = vld [vmem:[#allocation55_spill] sm:$0xff] }
 0x1c0   : > { %v2030_v32 = vpop.f32.mrf.mxu1  ;;  %5210 = vmatmul.mubr.msk.f32.gmra.mxu1 %vm253_vm1, %v8152_v43  ;;  %3526 = vmatprep.mubr.f32.mxu0 %v8010_v61 }
 0x1c1   : > { %v7065_v58 = vadd.f32 %v2493_v54, %v2248_v12  ;;  %v2249_v6 = vadd.f32 %v2030_v32, %v6652_v24  ;;  %3063 = vmatprep.mubr.f32.mxu1 %v8010_v61  ;;  %v2499_v10 = vpop.f32.mrf.mxu0 }
 0x1c2   : > { %v2032_v36 = vpop.f32.mrf.mxu1 }
 0x1c3   : > { %v7070_v8 = vadd.f32 %v2497_v26, %v2249_v6  ;;  %v2250_v47 = vadd.f32 %v2032_v36, %v6662_v53  ;;  %v2503_v20 = vpop.f32.mrf.mxu0  ;;  %5246 = vmatmul.mubr.msk.f32.gmra.mxu0 %vm253_vm1, %v6692_v25  ;;  %v8157_v36 = vld [vmem:[#allocation57_spill] sm:$0xff]  ;;  %v8158_v25 = vld [vmem:[#allocation99_spill] sm:$0xff] }
 0x1c4   : > { %v2036_v57 = vpop.f32.mrf.mxu1  ;;  %5211 = vmatmul.mubr.msk.f32.gmra.mxu1 %vm253_vm1, %v8154_v15  ;;  %3532 = vmatprep.mubr.f32.mxu0 %v8010_v61 }
 0x1c5   : > { %8153 = vst [vmem:[#allocation86_spill] sm:$0xff] %v7070_v8  ;;  %v7077_v3 = vadd.f32 %v2499_v10, %v2250_v47  ;;  %v2251_v24 = vadd.f32 %v2036_v57, %v6667_v40  ;;  %3069 = vmatprep.mubr.f32.mxu1 %v8010_v61  ;;  %v2505_v12 = vpop.f32.mrf.mxu0  ;;  %v8160_v40 = vld [vmem:[#allocation96_spill] sm:$0xff]  ;;  %v8163_v8 = vld [vmem:[#allocation59_spill] sm:$0xff] }
 0x1c6   : > { %v2038_v54 = vpop.f32.mrf.mxu1 }
 0x1c7   : > { %8155 = vst [vmem:[#allocation87_spill] sm:$0xff] %v7077_v3  ;;  %v7082_v32 = vadd.f32 %v2503_v20, %v2251_v24  ;;  %v2252_v53 = vadd.f32 %v2038_v54, %v6677_v59  ;;  %v2509_v6 = vpop.f32.mrf.mxu0  ;;  %5247 = vmatmul.mubr.msk.f32.gmra.mxu0 %vm253_vm1, %v8158_v25  ;;  %v8162_v59 = vld [vmem:[#allocation97_spill] sm:$0xff] }
 0x1c8   : > { %v2042_v26 = vpop.f32.mrf.mxu1  ;;  %5212 = vmatmul.mubr.msk.f32.gmra.mxu1 %vm253_vm1, %v8157_v36  ;;  %3538 = vmatprep.mubr.f32.mxu0 %v8010_v61 }
 0x1c9   : > { %8156 = vst [vmem:[#allocation31_spill] sm:$0xff] %v7082_v32  ;;  %v7089_v10 = vadd.f32 %v2505_v12, %v2252_v53  ;;  %v2253_v47 = vadd.f32 %v2042_v26, %v8160_v40  ;;  %3075 = vmatprep.mubr.f32.mxu1 %v8010_v61  ;;  %v2511_v20 = vpop.f32.mrf.mxu0  ;;  %v2828_v12 = vrot.slane %v6683_v48, 2  ;;  %v8164_v26 = vld [vmem:[#allocation98_spill] sm:$0xff] }
 0x1ca   : > { %v2044_v57 = vpop.f32.mrf.mxu1 }
 0x1cb   : > { %8159 = vst [vmem:[#allocation88_spill] sm:$0xff] %v7089_v10  ;;  %v7094_v24 = vadd.f32 %v2509_v6, %v2253_v47  ;;  %v2254_v54 = vadd.f32 %v2044_v57, %v8162_v59  ;;  %v2515_v3 = vpop.f32.mrf.mxu0  ;;  %5248 = vmatmul.mubr.msk.f32.gmra.mxu0 %vm253_vm1, %v6683_v48  ;;  %v2829_v6 = vrot.slane %v6686_v27, 2  ;;  %v8165_v48 = vld [vmem:[#allocation61_spill] sm:$0xff] }
 0x1cc   : > { %v2048_v32 = vpop.f32.mrf.mxu1  ;;  %5213 = vmatmul.mubr.msk.f32.gmra.mxu1 %vm253_vm1, %v8163_v8  ;;  %3544 = vmatprep.mubr.f32.mxu0 %v8010_v61 }
 0x1cd   : > { %8161 = vst [vmem:[#allocation90_spill] sm:$0xff] %v7094_v24  ;;  %v7102_v53 = vadd.f32 %v2511_v20, %v2254_v54  ;;  %v2255_v25 = vadd.f32 %v2048_v32, %v8164_v26  ;;  %3081 = vmatprep.mubr.f32.mxu1 %v8010_v61  ;;  %v2517_v47 = vpop.f32.mrf.mxu0  ;;  %v2831_v54 = vrot.slane %v6706_v34, 2 }
 0x1ce   : > { %v2050_v40 = vpop.f32.mrf.mxu1 }
 0x1cf   : > { %v7108_v57 = vadd.f32 %v2515_v3, %v2255_v25  ;;  %v2256_v59 = vadd.f32 %v2050_v40, %v6718_v42  ;;  %v2521_v10 = vpop.f32.mrf.mxu0  ;;  %5249 = vmatmul.mubr.msk.f32.gmra.mxu0 %vm253_vm1, %v6686_v27  ;;  %v7121_v3 = vsel %vm1296_vm3, %v2828_v12, %v2829_v6  ;;  %v7124_v42 = vld [vmem:[%s5583_s20 + $0x198] sm:$0xff]  ;;  %v7140_v34 = vsel %vm1296_vm3, %v2829_v6, %v2831_v54 }
 0x1d0   : > { %v2054_v24 = vpop.f32.mrf.mxu1  ;;  %5214 = vmatmul.mubr.msk.f32.gmra.mxu1 %vm253_vm1, %v8165_v48  ;;  %3550 = vmatprep.mubr.f32.mxu0 %v8010_v61 }
 0x1d1   : > { %v7115_v32 = vadd.f32 %v2517_v47, %v2256_v59  ;;  %v2257_v20 = vadd.f32 %v2054_v24, %v6727_v17  ;;  %3087 = vmatprep.mubr.f32.mxu1 %v8010_v61  ;;  %v2523_v25 = vpop.f32.mrf.mxu0 }
 0x1d2   : > { %v2056_v26 = vpop.f32.mrf.mxu1 }
 0x1d3   : > { %v7127_v40 = vadd.f32 %v2521_v10, %v2257_v20  ;;  %v2258_v27 = vadd.f32 %v2056_v26, %v6734_v41  ;;  %v2527_v17 = vpop.f32.mrf.mxu0  ;;  %5250 = vmatmul.mubr.msk.f32.gmra.mxu0 %vm253_vm1, %v7124_v42  ;;  %v7143_v41 = vld [vmem:[%s5583_s20 + $0x1a0] sm:$0xff] }
 0x1d4   : > { %v2060_v47 = vpop.f32.mrf.mxu1  ;;  %5215 = vmatmul.mubr.msk.f32.gmra.mxu1 %vm253_vm1, %v7121_v3  ;;  %3556 = vmatprep.mubr.f32.mxu0 %v8010_v61 }
 0x1d5   : > { %8166 = vst [vmem:[#allocation95_spill] sm:$0xff] %v7127_v40  ;;  %v7134_v24 = vadd.f32 %v2523_v25, %v2258_v27  ;;  %v2259_v12 = vadd.f32 %v2060_v47, %v6742_v31  ;;  %3093 = vmatprep.mubr.f32.mxu1 %v8010_v61  ;;  %v2529_v59 = vpop.f32.mrf.mxu0 }
 0x1d6   : > { %v2062_v10 = vpop.f32.mrf.mxu1 }
 0x1d7   : > { %v7145_v20 = vadd.f32 %v2527_v17, %v2259_v12  ;;  %v2260_v26 = vadd.f32 %v2062_v10, %v6749_v56  ;;  %v2533_v25 = vpop.f32.mrf.mxu0  ;;  %5251 = vmatmul.mubr.msk.f32.gmra.mxu0 %vm253_vm1, %v7143_v41  ;;  %v8167_v10 = vld [vmem:[#allocation6_spill] sm:$0xff] }
 0x1d8   : > { %v2066_v40 = vpop.f32.mrf.mxu1  ;;  %5216 = vmatmul.mubr.msk.f32.gmra.mxu1 %vm253_vm1, %v7140_v34  ;;  %4303 = vmatprep.mubr.f32.mxu0 %v8010_v61 }
 0x1d9   : > { %v7152_v31 = vadd.f32 %v2529_v59, %v2260_v26  ;;  %v2261_v6 = vadd.f32 %v2066_v40, %v6754_v45  ;;  %3837 = vmatprep.mubr.f32.mxu1 %v8010_v61  ;;  %v2535_v27 = vpop.f32.mrf.mxu0 }
 0x1da   : > { %v2068_v54 = vpop.f32.mrf.mxu1 }
 0x1db   : > { %v7157_v47 = vadd.f32 %v2533_v25, %v2261_v6  ;;  %v2262_v56 = vadd.f32 %v2068_v54, %v6761_v62  ;;  %v2539_v12 = vpop.f32.mrf.mxu0  ;;  %5290 = vmatmul.mubr.msk.f32.vlgmr.msra.gmra.mxu0 %vm253_vm1, %v8070_v35 }
 0x1dc   : > { %v2072_v17 = vpop.f32.mrf.mxu1  ;;  %5255 = vmatmul.mubr.msk.f32.vlgmr.msra.gmra.mxu1 %vm253_vm1, %v8167_v10  ;;  %4309 = vmatprep.mubr.f32.mxu0 %v8010_v61  ;;  %v8169_v10 = vld [vmem:[#allocation8_spill] sm:$0xff] }
 0x1dd   : > { %v7164_v59 = vadd.f32 %v2535_v27, %v2262_v56  ;;  %v2263_v45 = vadd.f32 %v2072_v17, %v6770_v0  ;;  %3843 = vmatprep.mubr.f32.mxu1 %v8010_v61  ;;  %v2541_v26 = vpop.f32.mrf.mxu0  ;;  %v8171_v0 = vld [vmem:[#allocation62_spill] sm:$0xff] }
 0x1de   : > { %v2074_v40 = vpop.f32.mrf.mxu1 }
 0x1df   : > { %v7169_v25 = vadd.f32 %v2539_v12, %v2263_v45  ;;  %v2264_v62 = vadd.f32 %v2074_v40, %v6777_v22  ;;  %v2545_v54 = vpop.f32.mrf.mxu0  ;;  %5291 = vmatmul.mubr.msk.f32.gmra.mxu0 %vm253_vm1, %v8075_v33  ;;  %v8173_v22 = vld [vmem:[#allocation63_spill] sm:$0xff] }
 0x1e0   : > { %v2078_v6 = vpop.f32.mrf.mxu1  ;;  %5256 = vmatmul.mubr.msk.f32.gmra.mxu1 %vm253_vm1, %v8169_v10  ;;  %4315 = vmatprep.mubr.f32.mxu0 %v8010_v61  ;;  %v8174_v10 = vld [vmem:[#allocation10_spill] sm:$0xff]  ;;  %v8175_v33 = vld [vmem:[#allocation11_spill] sm:$0xff] }
 0x1e1   : > { %8168 = vst [vmem:[#allocation91_spill] sm:$0xff] %v7169_v25  ;;  %v7176_v35 = vadd.f32 %v2541_v26, %v2264_v62  ;;  %v2265_v27 = vadd.f32 %v2078_v6, %v8171_v0  ;;  %3849 = vmatprep.mubr.f32.mxu1 %v8010_v61  ;;  %v2547_v17 = vpop.f32.mrf.mxu0  ;;  %v8177_v62 = vld [vmem:[#allocation7_spill] sm:$0xff] }
 0x1e2   : > { %v2080_v56 = vpop.f32.mrf.mxu1 }
 0x1e3   : > { %8170 = vst [vmem:[#allocation93_spill] sm:$0xff] %v7176_v35  ;;  %v7181_v12 = vadd.f32 %v2545_v54, %v2265_v27  ;;  %v2266_v45 = vadd.f32 %v2080_v56, %v8173_v22  ;;  %v2551_v25 = vpop.f32.mrf.mxu0  ;;  %5292 = vmatmul.mubr.msk.f32.gmra.mxu0 %vm253_vm1, %v8175_v33  ;;  %v8179_v56 = vld [vmem:[#allocation64_spill] sm:$0xff]  ;;  %v8181_v33 = vld [vmem:[#allocation13_spill] sm:$0xff] }
 0x1e4   : > { %v2084_v40 = vpop.f32.mrf.mxu1  ;;  %5257 = vmatmul.mubr.msk.f32.gmra.mxu1 %vm253_vm1, %v8174_v10  ;;  %4321 = vmatprep.mubr.f32.mxu0 %v8010_v61  ;;  %v8180_v10 = vld [vmem:[#allocation12_spill] sm:$0xff] }
 0x1e5   : > { %8172 = vst [vmem:[#allocation35_spill] sm:$0xff] %v7181_v12  ;;  %v7188_v26 = vadd.f32 %v2547_v17, %v2266_v45  ;;  %v2267_v6 = vadd.f32 %v2084_v40, %v8177_v62  ;;  %3855 = vmatprep.mubr.f32.mxu1 %v8010_v61  ;;  %v2553_v0 = vpop.f32.mrf.mxu0  ;;  %v8183_v45 = vld [vmem:[#allocation65_spill] sm:$0xff] }
 0x1e6   : > { %v2086_v54 = vpop.f32.mrf.mxu1 }
 0x1e7   : > { %8176 = vst [vmem:[#allocation94_spill] sm:$0xff] %v7188_v26  ;;  %v7193_v27 = vadd.f32 %v2551_v25, %v2267_v6  ;;  %v2268_v22 = vadd.f32 %v2086_v54, %v8179_v56  ;;  %v2557_v35 = vpop.f32.mrf.mxu0  ;;  %5293 = vmatmul.mubr.msk.f32.gmra.mxu0 %vm253_vm1, %v8181_v33  ;;  %v8185_v54 = vld [vmem:[#allocation9_spill] sm:$0xff]  ;;  %v8187_v33 = vld [vmem:[#allocation15_spill] sm:$0xff] }
 0x1e8   : > { %v2090_v12 = vpop.f32.mrf.mxu1  ;;  %5258 = vmatmul.mubr.msk.f32.gmra.mxu1 %vm253_vm1, %v8180_v10  ;;  %4327 = vmatprep.mubr.f32.mxu0 %v8010_v61  ;;  %v8186_v10 = vld [vmem:[#allocation14_spill] sm:$0xff] }
 0x1e9   : > { %8178 = vst [vmem:[#allocation37_spill] sm:$0xff] %v7193_v27  ;;  %v7200_v17 = vadd.f32 %v2553_v0, %v2268_v22  ;;  %v2269_v40 = vadd.f32 %v2090_v12, %v8183_v45  ;;  %3861 = vmatprep.mubr.f32.mxu1 %v8010_v61  ;;  %v2559_v62 = vpop.f32.mrf.mxu0  ;;  %v8189_v12 = vld [vmem:[#allocation66_spill] sm:$0xff] }
 0x1ea   : > { %v2092_v25 = vpop.f32.mrf.mxu1 }
 0x1eb   : > { %8182 = vst [vmem:[#allocation39_spill] sm:$0xff] %v7200_v17  ;;  %v7205_v6 = vadd.f32 %v2557_v35, %v2269_v40  ;;  %v2270_v56 = vadd.f32 %v2092_v25, %v8185_v54  ;;  %v2563_v26 = vpop.f32.mrf.mxu0  ;;  %5294 = vmatmul.mubr.msk.f32.gmra.mxu0 %vm253_vm1, %v8187_v33  ;;  %v8191_v25 = vld [vmem:[#allocation67_spill] sm:$0xff]  ;;  %v8193_v33 = vld [vmem:[#allocation17_spill] sm:$0xff] }
 0x1ec   : > { %v2096_v27 = vpop.f32.mrf.mxu1  ;;  %5259 = vmatmul.mubr.msk.f32.gmra.mxu1 %vm253_vm1, %v8186_v10  ;;  %4333 = vmatprep.mubr.f32.mxu0 %v8010_v61  ;;  %v8192_v10 = vld [vmem:[#allocation16_spill] sm:$0xff] }
 0x1ed   : > { %8184 = vst [vmem:[#allocation41_spill] sm:$0xff] %v7205_v6  ;;  %v7212_v0 = vadd.f32 %v2559_v62, %v2270_v56  ;;  %v2271_v22 = vadd.f32 %v2096_v27, %v8189_v12  ;;  %3867 = vmatprep.mubr.f32.mxu1 %v8010_v61  ;;  %v2565_v45 = vpop.f32.mrf.mxu0  ;;  %v8195_v27 = vld [vmem:[#allocation68_spill] sm:$0xff] }
 0x1ee   : > { %v2098_v35 = vpop.f32.mrf.mxu1 }
 0x1ef   : > { %8188 = vst [vmem:[#allocation43_spill] sm:$0xff] %v7212_v0  ;;  %v7217_v40 = vadd.f32 %v2563_v26, %v2271_v22  ;;  %v2272_v54 = vadd.f32 %v2098_v35, %v8191_v25  ;;  %v2569_v17 = vpop.f32.mrf.mxu0  ;;  %5295 = vmatmul.mubr.msk.f32.gmra.mxu0 %vm253_vm1, %v8193_v33  ;;  %v8197_v35 = vld [vmem:[#allocation69_spill] sm:$0xff]  ;;  %v8199_v33 = vld [vmem:[#allocation19_spill] sm:$0xff] }
 0x1f0   : > { %v2102_v6 = vpop.f32.mrf.mxu1  ;;  %5260 = vmatmul.mubr.msk.f32.gmra.mxu1 %vm253_vm1, %v8192_v10  ;;  %4339 = vmatprep.mubr.f32.mxu0 %v8010_v61  ;;  %v8198_v10 = vld [vmem:[#allocation18_spill] sm:$0xff] }
 0x1f1   : > { %8190 = vst [vmem:[#allocation45_spill] sm:$0xff] %v7217_v40  ;;  %v7224_v62 = vadd.f32 %v2565_v45, %v2272_v54  ;;  %v2273_v56 = vadd.f32 %v2102_v6, %v8195_v27  ;;  %3873 = vmatprep.mubr.f32.mxu1 %v8010_v61  ;;  %v2571_v12 = vpop.f32.mrf.mxu0  ;;  %v8201_v6 = vld [vmem:[#allocation70_spill] sm:$0xff] }
 0x1f2   : > { %v2104_v26 = vpop.f32.mrf.mxu1 }
 0x1f3   : > { %8194 = vst [vmem:[#allocation47_spill] sm:$0xff] %v7224_v62  ;;  %v7229_v22 = vadd.f32 %v2569_v17, %v2273_v56  ;;  %v2274_v25 = vadd.f32 %v2104_v26, %v8197_v35  ;;  %v2575_v0 = vpop.f32.mrf.mxu0  ;;  %5296 = vmatmul.mubr.msk.f32.gmra.mxu0 %vm253_vm1, %v8199_v33  ;;  %v8203_v26 = vld [vmem:[#allocation71_spill] sm:$0xff]  ;;  %v8205_v33 = vld [vmem:[#allocation21_spill] sm:$0xff] }
 0x1f4   : > { %v2108_v40 = vpop.f32.mrf.mxu1  ;;  %5261 = vmatmul.mubr.msk.f32.gmra.mxu1 %vm253_vm1, %v8198_v10  ;;  %4345 = vmatprep.mubr.f32.mxu0 %v8010_v61  ;;  %v8204_v10 = vld [vmem:[#allocation20_spill] sm:$0xff] }
 0x1f5   : > { %8196 = vst [vmem:[#allocation49_spill] sm:$0xff] %v7229_v22  ;;  %v7236_v45 = vadd.f32 %v2571_v12, %v2274_v25  ;;  %v2275_v54 = vadd.f32 %v2108_v40, %v8201_v6  ;;  %3879 = vmatprep.mubr.f32.mxu1 %v8010_v61  ;;  %v2577_v27 = vpop.f32.mrf.mxu0  ;;  %v8207_v40 = vld [vmem:[#allocation72_spill] sm:$0xff] }
 0x1f6   : > { %v2110_v17 = vpop.f32.mrf.mxu1 }
 0x1f7   : > { %8200 = vst [vmem:[#allocation51_spill] sm:$0xff] %v7236_v45  ;;  %v7241_v56 = vadd.f32 %v2575_v0, %v2275_v54  ;;  %v2276_v35 = vadd.f32 %v2110_v17, %v8203_v26  ;;  %v2581_v62 = vpop.f32.mrf.mxu0  ;;  %5297 = vmatmul.mubr.msk.f32.gmra.mxu0 %vm253_vm1, %v8205_v33  ;;  %v8209_v17 = vld [vmem:[#allocation73_spill] sm:$0xff]  ;;  %v8211_v33 = vld [vmem:[#allocation23_spill] sm:$0xff] }
 0x1f8   : > { %v2114_v22 = vpop.f32.mrf.mxu1  ;;  %5262 = vmatmul.mubr.msk.f32.gmra.mxu1 %vm253_vm1, %v8204_v10  ;;  %4351 = vmatprep.mubr.f32.mxu0 %v8010_v61  ;;  %v8210_v10 = vld [vmem:[#allocation22_spill] sm:$0xff] }
 0x1f9   : > { %8202 = vst [vmem:[#allocation53_spill] sm:$0xff] %v7241_v56  ;;  %v7248_v12 = vadd.f32 %v2577_v27, %v2276_v35  ;;  %v2277_v25 = vadd.f32 %v2114_v22, %v8207_v40  ;;  %3885 = vmatprep.mubr.f32.mxu1 %v8010_v61  ;;  %v2583_v6 = vpop.f32.mrf.mxu0  ;;  %v8213_v22 = vld [vmem:[#allocation74_spill] sm:$0xff] }
 0x1fa   : > { %v2116_v0 = vpop.f32.mrf.mxu1 }
 0x1fb   : > { %8206 = vst [vmem:[#allocation55_spill] sm:$0xff] %v7248_v12  ;;  %v7253_v54 = vadd.f32 %v2581_v62, %v2277_v25  ;;  %v2278_v26 = vadd.f32 %v2116_v0, %v8209_v17  ;;  %v2587_v45 = vpop.f32.mrf.mxu0  ;;  %5298 = vmatmul.mubr.msk.f32.gmra.mxu0 %vm253_vm1, %v8211_v33  ;;  %v8215_v0 = vld [vmem:[#allocation75_spill] sm:$0xff]  ;;  %v8217_v33 = vld [vmem:[#allocation25_spill] sm:$0xff] }
 0x1fc   : > { %v2120_v56 = vpop.f32.mrf.mxu1  ;;  %5263 = vmatmul.mubr.msk.f32.gmra.mxu1 %vm253_vm1, %v8210_v10  ;;  %4357 = vmatprep.mubr.f32.mxu0 %v8010_v61  ;;  %v8216_v10 = vld [vmem:[#allocation24_spill] sm:$0xff] }
 0x1fd   : > { %8208 = vst [vmem:[#allocation57_spill] sm:$0xff] %v7253_v54  ;;  %v7260_v27 = vadd.f32 %v2583_v6, %v2278_v26  ;;  %v2279_v35 = vadd.f32 %v2120_v56, %v8213_v22  ;;  %3891 = vmatprep.mubr.f32.mxu1 %v8010_v61  ;;  %v2589_v40 = vpop.f32.mrf.mxu0  ;;  %v8219_v56 = vld [vmem:[#allocation76_spill] sm:$0xff] }
 0x1fe   : > { %v2122_v62 = vpop.f32.mrf.mxu1 }
 0x1ff   : > { %8212 = vst [vmem:[#allocation99_spill] sm:$0xff] %v7260_v27  ;;  %v7265_v25 = vadd.f32 %v2587_v45, %v2279_v35  ;;  %v2280_v17 = vadd.f32 %v2122_v62, %v8215_v0  ;;  %v2593_v12 = vpop.f32.mrf.mxu0  ;;  %5299 = vmatmul.mubr.msk.f32.gmra.mxu0 %vm253_vm1, %v8217_v33  ;;  %v8221_v62 = vld [vmem:[#allocation77_spill] sm:$0xff]  ;;  %v8223_v33 = vld [vmem:[#allocation27_spill] sm:$0xff] }
 0x200   : > { %v2126_v54 = vpop.f32.mrf.mxu1  ;;  %5264 = vmatmul.mubr.msk.f32.gmra.mxu1 %vm253_vm1, %v8216_v10  ;;  %4363 = vmatprep.mubr.f32.mxu0 %v8010_v61  ;;  %v8222_v10 = vld [vmem:[#allocation26_spill] sm:$0xff] }
 0x201   : > { %8214 = vst [vmem:[#allocation96_spill] sm:$0xff] %v7265_v25  ;;  %v7272_v6 = vadd.f32 %v2589_v40, %v2280_v17  ;;  %v2281_v26 = vadd.f32 %v2126_v54, %v8219_v56  ;;  %3897 = vmatprep.mubr.f32.mxu1 %v8010_v61  ;;  %v2595_v22 = vpop.f32.mrf.mxu0  ;;  %v8225_v54 = vld [vmem:[#allocation78_spill] sm:$0xff] }
 0x202   : > { %v2128_v45 = vpop.f32.mrf.mxu1 }
 0x203   : > { %8218 = vst [vmem:[#allocation97_spill] sm:$0xff] %v7272_v6  ;;  %v7277_v35 = vadd.f32 %v2593_v12, %v2281_v26  ;;  %v2282_v0 = vadd.f32 %v2128_v45, %v8221_v62  ;;  %v2599_v27 = vpop.f32.mrf.mxu0  ;;  %5300 = vmatmul.mubr.msk.f32.gmra.mxu0 %vm253_vm1, %v8223_v33  ;;  %v8227_v45 = vld [vmem:[#allocation79_spill] sm:$0xff]  ;;  %v8229_v33 = vld [vmem:[#allocation29_spill] sm:$0xff] }
 0x204   : > { %v2132_v25 = vpop.f32.mrf.mxu1  ;;  %5265 = vmatmul.mubr.msk.f32.gmra.mxu1 %vm253_vm1, %v8222_v10  ;;  %4369 = vmatprep.mubr.f32.mxu0 %v8010_v61  ;;  %v8228_v10 = vld [vmem:[#allocation28_spill] sm:$0xff] }
 0x205   : > { %8220 = vst [vmem:[#allocation59_spill] sm:$0xff] %v7277_v35  ;;  %v7284_v40 = vadd.f32 %v2595_v22, %v2282_v0  ;;  %v2283_v17 = vadd.f32 %v2132_v25, %v8225_v54  ;;  %3903 = vmatprep.mubr.f32.mxu1 %v8010_v61  ;;  %v2601_v56 = vpop.f32.mrf.mxu0  ;;  %v8230_v25 = vld [vmem:[#allocation80_spill] sm:$0xff] }
 0x206   : > { %v2134_v12 = vpop.f32.mrf.mxu1 }
 0x207   : > { %8224 = vst [vmem:[#allocation98_spill] sm:$0xff] %v7284_v40  ;;  %v7289_v26 = vadd.f32 %v2599_v27, %v2283_v17  ;;  %v2284_v62 = vadd.f32 %v2134_v12, %v8227_v45  ;;  %v2605_v6 = vpop.f32.mrf.mxu0  ;;  %5301 = vmatmul.mubr.msk.f32.gmra.mxu0 %vm253_vm1, %v8229_v33  ;;  %v8232_v12 = vld [vmem:[#allocation81_spill] sm:$0xff] }
 0x208   : > { %v2138_v35 = vpop.f32.mrf.mxu1  ;;  %5266 = vmatmul.mubr.msk.f32.gmra.mxu1 %vm253_vm1, %v8228_v10  ;;  %4375 = vmatprep.mubr.f32.mxu0 %v8010_v61  ;;  %v8233_v10 = vld [vmem:[#allocation30_spill] sm:$0xff] }
 0x209   : > { %8226 = vst [vmem:[#allocation61_spill] sm:$0xff] %v7289_v26  ;;  %v7296_v22 = vadd.f32 %v2601_v56, %v2284_v62  ;;  %v2285_v0 = vadd.f32 %v2138_v35, %v8230_v25  ;;  %3909 = vmatprep.mubr.f32.mxu1 %v8010_v61  ;;  %v2607_v54 = vpop.f32.mrf.mxu0  ;;  %v8235_v35 = vld [vmem:[#allocation82_spill] sm:$0xff] }
 0x20a   : > { %v2140_v27 = vpop.f32.mrf.mxu1 }
 0x20b   : > { %v7301_v17 = vadd.f32 %v2605_v6, %v2285_v0  ;;  %v2286_v45 = vadd.f32 %v2140_v27, %v8232_v12  ;;  %v2611_v40 = vpop.f32.mrf.mxu0  ;;  %5302 = vmatmul.mubr.msk.f32.gmra.mxu0 %vm253_vm1, %v8132_v49  ;;  %v8237_v0 = vld [vmem:[#allocation83_spill] sm:$0xff]  ;;  %v8239_v49 = vld [vmem:[#allocation33_spill] sm:$0xff] }
 0x20c   : > { %v2144_v26 = vpop.f32.mrf.mxu1  ;;  %5267 = vmatmul.mubr.msk.f32.gmra.mxu1 %vm253_vm1, %v8233_v10  ;;  %4381 = vmatprep.mubr.f32.mxu0 %v8010_v61  ;;  %v8238_v10 = vld [vmem:[#allocation32_spill] sm:$0xff] }
 0x20d   : > { %8231 = vst [vmem:[#allocation6_spill] sm:$0xff] %v7301_v17  ;;  %v7308_v56 = vadd.f32 %v2607_v54, %v2286_v45  ;;  %v2287_v62 = vadd.f32 %v2144_v26, %v8235_v35  ;;  %3915 = vmatprep.mubr.f32.mxu1 %v8010_v61  ;;  %v2613_v33 = vpop.f32.mrf.mxu0  ;;  %v8240_v26 = vld [vmem:[#allocation89_spill] sm:$0xff] }
 0x20e   : > { %v2146_v6 = vpop.f32.mrf.mxu1 }
 0x20f   : > { %8234 = vst [vmem:[#allocation8_spill] sm:$0xff] %v7308_v56  ;;  %v7313_v25 = vadd.f32 %v2611_v40, %v2287_v62  ;;  %v2288_v27 = vadd.f32 %v2146_v6, %v8237_v0  ;;  %v2617_v17 = vpop.f32.mrf.mxu0  ;;  %5303 = vmatmul.mubr.msk.f32.gmra.mxu0 %vm253_vm1, %v8239_v49  ;;  %v8241_v6 = vld [vmem:[#allocation84_spill] sm:$0xff] }
 0x210   : > { %v2150_v12 = vpop.f32.mrf.mxu1  ;;  %5268 = vmatmul.mubr.msk.f32.gmra.mxu1 %vm253_vm1, %v8238_v10  ;;  %4387 = vmatprep.mubr.f32.mxu0 %v8010_v61  ;;  %v8242_v10 = vld [vmem:[#allocation34_spill] sm:$0xff] }
 0x211   : > { %8236 = vst [vmem:[#allocation62_spill] sm:$0xff] %v7313_v25  ;;  %v7320_v54 = vadd.f32 %v2613_v33, %v2288_v27  ;;  %v2289_v45 = vadd.f32 %v2150_v12, %v8240_v26  ;;  %3921 = vmatprep.mubr.f32.mxu1 %v8010_v61  ;;  %v2619_v35 = vpop.f32.mrf.mxu0  ;;  %v8243_v27 = vld [vmem:[#allocation85_spill] sm:$0xff] }
 0x212   : > { %v2152_v40 = vpop.f32.mrf.mxu1 }
 0x213   : > { %v7325_v62 = vadd.f32 %v2617_v17, %v2289_v45  ;;  %v2290_v0 = vadd.f32 %v2152_v40, %v8241_v6  ;;  %v2623_v56 = vpop.f32.mrf.mxu0  ;;  %5304 = vmatmul.mubr.msk.f32.gmra.mxu0 %vm253_vm1, %v8142_v19 }
 0x214   : > { %v2156_v25 = vpop.f32.mrf.mxu1  ;;  %5269 = vmatmul.mubr.msk.f32.gmra.mxu1 %vm253_vm1, %v8242_v10  ;;  %4393 = vmatprep.mubr.f32.mxu0 %v8010_v61  ;;  %v8244_v10 = vld [vmem:[#allocation36_spill] sm:$0xff] }
 0x215   : > { %v7332_v33 = vadd.f32 %v2619_v35, %v2290_v0  ;;  %v2291_v12 = vadd.f32 %v2156_v25, %v8243_v27  ;;  %3927 = vmatprep.mubr.f32.mxu1 %v8010_v61  ;;  %v2625_v49 = vpop.f32.mrf.mxu0  ;;  %v8245_v25 = vld [vmem:[#allocation92_spill] sm:$0xff] }
 0x216   : > { %v2158_v17 = vpop.f32.mrf.mxu1 }
 0x217   : > { %v7337_v26 = vadd.f32 %v2623_v56, %v2291_v12  ;;  %v2292_v45 = vadd.f32 %v2158_v17, %v6945_v4  ;;  %v2629_v6 = vpop.f32.mrf.mxu0  ;;  %5305 = vmatmul.mubr.msk.f32.gmra.mxu0 %vm253_vm1, %v8144_v39 }
 0x218   : > { %v2162_v40 = vpop.f32.mrf.mxu1  ;;  %5270 = vmatmul.mubr.msk.f32.gmra.mxu1 %vm253_vm1, %v8244_v10  ;;  %4399 = vmatprep.mubr.f32.mxu0 %v8010_v61  ;;  %v8246_v10 = vld [vmem:[#allocation38_spill] sm:$0xff] }
 0x219   : > { %v7344_v19 = vadd.f32 %v2625_v49, %v2292_v45  ;;  %v2293_v35 = vadd.f32 %v2162_v40, %v8245_v25  ;;  %3933 = vmatprep.mubr.f32.mxu1 %v8010_v61  ;;  %v2631_v0 = vpop.f32.mrf.mxu0 }
 0x21a   : > { %v2164_v56 = vpop.f32.mrf.mxu1 }
 0x21b   : > { %v7349_v27 = vadd.f32 %v2629_v6, %v2293_v35  ;;  %v2294_v4 = vadd.f32 %v2164_v56, %v6957_v7  ;;  %v3372_v17 = vpop.f32.mrf.mxu0  ;;  %5306 = vmatmul.mubr.msk.f32.gmra.mxu0 %vm253_vm1, %v8145_v11  ;;  %v8247_v56 = vld [vmem:[#allocation40_spill] sm:$0xff] }
 0x21c   : > { %v2909_v12 = vpop.f32.mrf.mxu1  ;;  %5271 = vmatmul.mubr.msk.f32.gmra.mxu1 %vm253_vm1, %v8246_v10  ;;  %4405 = vmatprep.mubr.f32.mxu0 %v8010_v61 }
 0x21d   : > { %v7356_v39 = vadd.f32 %v2631_v0, %v2294_v4  ;;  %v3164_v49 = vadd.f32 %v2909_v12, %v6962_v46  ;;  %3939 = vmatprep.mubr.f32.mxu1 %v8010_v61  ;;  %v3374_v40 = vpop.f32.mrf.mxu0 }
 0x21e   : > { %v2911_v45 = vpop.f32.mrf.mxu1 }
 0x21f   : > { %v7361_v6 = vadd.f32 %v3372_v17, %v3164_v49  ;;  %v3165_v7 = vadd.f32 %v2911_v45, %v6969_v63  ;;  %v3378_v35 = vpop.f32.mrf.mxu0  ;;  %5307 = vmatmul.mubr.msk.f32.gmra.mxu0 %vm253_vm1, %v8146_v55  ;;  %v8248_v49 = vld [vmem:[#allocation42_spill] sm:$0xff] }
 0x220   : > { %v2915_v25 = vpop.f32.mrf.mxu1  ;;  %5272 = vmatmul.mubr.msk.f32.gmra.mxu1 %vm253_vm1, %v8247_v56  ;;  %4411 = vmatprep.mubr.f32.mxu0 %v8010_v61  ;;  %v8249_v56 = vld [vmem:[#allocation44_spill] sm:$0xff] }
 0x221   : > { %v7368_v11 = vadd.f32 %v3374_v40, %v3165_v7  ;;  %v3166_v46 = vadd.f32 %v2915_v25, %v6974_v23  ;;  %3945 = vmatprep.mubr.f32.mxu1 %v8010_v61  ;;  %v3380_v4 = vpop.f32.mrf.mxu0 }
 0x222   : > { %v2917_v0 = vpop.f32.mrf.mxu1 }
 0x223   : > { %v7373_v12 = vadd.f32 %v3378_v35, %v3166_v46  ;;  %v3167_v63 = vadd.f32 %v2917_v0, %v6981_v44  ;;  %v3384_v10 = vpop.f32.mrf.mxu0  ;;  %5308 = vmatmul.mubr.msk.f32.gmra.mxu0 %vm253_vm1, %v8147_v1 }
 0x224   : > { %v2921_v17 = vpop.f32.mrf.mxu1  ;;  %5273 = vmatmul.mubr.msk.f32.gmra.mxu1 %vm253_vm1, %v8248_v49  ;;  %4417 = vmatprep.mubr.f32.mxu0 %v8010_v61 }
 0x225   : > { %v7380_v55 = vadd.f32 %v3380_v4, %v3167_v63  ;;  %v3168_v23 = vadd.f32 %v2921_v17, %v6986_v2  ;;  %3951 = vmatprep.mubr.f32.mxu1 %v8010_v61  ;;  %v3386_v40 = vpop.f32.mrf.mxu0 }
 0x226   : > { %v2923_v45 = vpop.f32.mrf.mxu1 }
 0x227   : > { %v7385_v7 = vadd.f32 %v3384_v10, %v3168_v23  ;;  %v3169_v44 = vadd.f32 %v2923_v45, %v6993_v5  ;;  %v3390_v35 = vpop.f32.mrf.mxu0  ;;  %5309 = vmatmul.mubr.msk.f32.gmra.mxu0 %vm253_vm1, %v8148_v38  ;;  %v8250_v10 = vld [vmem:[#allocation46_spill] sm:$0xff] }
 0x228   : > { %v2927_v25 = vpop.f32.mrf.mxu1  ;;  %5274 = vmatmul.mubr.msk.f32.gmra.mxu1 %vm253_vm1, %v8249_v56  ;;  %4423 = vmatprep.mubr.f32.mxu0 %v8010_v61 }
 0x229   : > { %v7392_v1 = vadd.f32 %v3386_v40, %v3169_v44  ;;  %v3170_v2 = vadd.f32 %v2927_v25, %v6998_v37  ;;  %3957 = vmatprep.mubr.f32.mxu1 %v8010_v61  ;;  %v3392_v0 = vpop.f32.mrf.mxu0  ;;  %v8251_v25 = vld [vmem:[#allocation48_spill] sm:$0xff] }
 0x22a   : > { %v2929_v46 = vpop.f32.mrf.mxu1 }
 0x22b   : > { %v7397_v4 = vadd.f32 %v3390_v35, %v3170_v2  ;;  %v3171_v5 = vadd.f32 %v2929_v46, %v7005_v9  ;;  %v3396_v17 = vpop.f32.mrf.mxu0  ;;  %5310 = vmatmul.mubr.msk.f32.gmra.mxu0 %vm253_vm1, %v8149_v29 }
 0x22c   : > { %v2933_v63 = vpop.f32.mrf.mxu1  ;;  %5275 = vmatmul.mubr.msk.f32.gmra.mxu1 %vm253_vm1, %v8250_v10  ;;  %4429 = vmatprep.mubr.f32.mxu0 %v8010_v61 }
 0x22d   : > { %v7404_v38 = vadd.f32 %v3392_v0, %v3171_v5  ;;  %v3172_v37 = vadd.f32 %v2933_v63, %v7010_v21  ;;  %3963 = vmatprep.mubr.f32.mxu1 %v8010_v61  ;;  %v3398_v23 = vpop.f32.mrf.mxu0  ;;  %v8252_v5 = vld [vmem:[#allocation50_spill] sm:$0xff] }
 0x22e   : > { %v2935_v49 = vpop.f32.mrf.mxu1 }
 0x22f   : > { %v7409_v45 = vadd.f32 %v3396_v17, %v3172_v37  ;;  %v3173_v9 = vadd.f32 %v2935_v49, %v7017_v14  ;;  %v3402_v44 = vpop.f32.mrf.mxu0  ;;  %5311 = vmatmul.mubr.msk.f32.gmra.mxu0 %vm253_vm1, %v8150_v51 }
 0x230   : > { %v2939_v40 = vpop.f32.mrf.mxu1  ;;  %5276 = vmatmul.mubr.msk.f32.gmra.mxu1 %vm253_vm1, %v8251_v25  ;;  %4435 = vmatprep.mubr.f32.mxu0 %v8010_v61 }
 0x231   : > { %v7416_v29 = vadd.f32 %v3398_v23, %v3173_v9  ;;  %v3174_v21 = vadd.f32 %v2939_v40, %v7022_v28  ;;  %3969 = vmatprep.mubr.f32.mxu1 %v8010_v61  ;;  %v3404_v56 = vpop.f32.mrf.mxu0  ;;  %v8253_v23 = vld [vmem:[#allocation52_spill] sm:$0xff] }
 0x232   : > { %v2941_v35 = vpop.f32.mrf.mxu1 }
 0x233   : > { %v7421_v2 = vadd.f32 %v3402_v44, %v3174_v21  ;;  %v3175_v14 = vadd.f32 %v2941_v35, %v7029_v16  ;;  %v3408_v0 = vpop.f32.mrf.mxu0  ;;  %5312 = vmatmul.mubr.msk.f32.gmra.mxu0 %vm253_vm1, %v8151_v13  ;;  %v8254_v35 = vld [vmem:[#allocation54_spill] sm:$0xff] }
 0x234   : > { %v2945_v46 = vpop.f32.mrf.mxu1  ;;  %5277 = vmatmul.mubr.msk.f32.gmra.mxu1 %vm253_vm1, %v8252_v5  ;;  %4441 = vmatprep.mubr.f32.mxu0 %v8010_v61 }
 0x235   : > { %v7428_v51 = vadd.f32 %v3404_v56, %v3175_v14  ;;  %v3176_v28 = vadd.f32 %v2945_v46, %v7034_v52  ;;  %3975 = vmatprep.mubr.f32.mxu1 %v8010_v61  ;;  %v3410_v17 = vpop.f32.mrf.mxu0 }
 0x236   : > { %v2947_v63 = vpop.f32.mrf.mxu1 }
 0x237   : > { %v7433_v10 = vadd.f32 %v3408_v0, %v3176_v28  ;;  %v3177_v16 = vadd.f32 %v2947_v63, %v7041_v50  ;;  %v3414_v49 = vpop.f32.mrf.mxu0  ;;  %5313 = vmatmul.mubr.msk.f32.gmra.mxu0 %vm253_vm1, %v8152_v43  ;;  %v8255_v28 = vld [vmem:[#allocation56_spill] sm:$0xff] }
 0x238   : > { %v2951_v37 = vpop.f32.mrf.mxu1  ;;  %5278 = vmatmul.mubr.msk.f32.gmra.mxu1 %vm253_vm1, %v8253_v23  ;;  %4447 = vmatprep.mubr.f32.mxu0 %v8010_v61 }
 0x239   : > { %v7440_v13 = vadd.f32 %v3410_v17, %v3177_v16  ;;  %v3178_v52 = vadd.f32 %v2951_v37, %v7046_v18  ;;  %3981 = vmatprep.mubr.f32.mxu1 %v8010_v61  ;;  %v3416_v40 = vpop.f32.mrf.mxu0 }
 0x23a   : > { %v2953_v9 = vpop.f32.mrf.mxu1 }
 0x23b   : > { %v7445_v44 = vadd.f32 %v3414_v49, %v3178_v52  ;;  %v3179_v50 = vadd.f32 %v2953_v9, %v7053_v30  ;;  %v3420_v21 = vpop.f32.mrf.mxu0  ;;  %5314 = vmatmul.mubr.msk.f32.gmra.mxu0 %vm253_vm1, %v8154_v15  ;;  %v8258_v9 = vld [vmem:[#allocation58_spill] sm:$0xff] }
 0x23c   : > { %v2957_v25 = vpop.f32.mrf.mxu1  ;;  %5279 = vmatmul.mubr.msk.f32.gmra.mxu1 %vm253_vm1, %v8254_v35  ;;  %4453 = vmatprep.mubr.f32.mxu0 %v8010_v61 }
 0x23d   : > { %v7452_v43 = vadd.f32 %v3416_v40, %v3179_v50  ;;  %v3180_v18 = vadd.f32 %v2957_v25, %v7058_v60  ;;  %3987 = vmatprep.mubr.f32.mxu1 %v8010_v61  ;;  %v3422_v14 = vpop.f32.mrf.mxu0  ;;  %v8256_v60 = vld [vmem:[#allocation86_spill] sm:$0xff]  ;;  %v8259_v40 = vld [vmem:[#allocation31_spill] sm:$0xff] }
 0x23e   : > { %v2959_v56 = vpop.f32.mrf.mxu1 }
 0x23f   : > { %v7457_v46 = vadd.f32 %v3420_v21, %v3180_v18  ;;  %v3181_v30 = vadd.f32 %v2959_v56, %v7065_v58  ;;  %v3426_v5 = vpop.f32.mrf.mxu0  ;;  %5315 = vmatmul.mubr.msk.f32.gmra.mxu0 %vm253_vm1, %v8157_v36  ;;  %v8257_v58 = vld [vmem:[#allocation87_spill] sm:$0xff]  ;;  %v8260_v18 = vld [vmem:[#allocation88_spill] sm:$0xff] }
 0x240   : > { %v2963_v0 = vpop.f32.mrf.mxu1  ;;  %5280 = vmatmul.mubr.msk.f32.gmra.mxu1 %vm253_vm1, %v8255_v28  ;;  %4459 = vmatprep.mubr.f32.mxu0 %v8010_v61 }
 0x241   : > { %v7464_v15 = vadd.f32 %v3422_v14, %v3181_v30  ;;  %v3182_v63 = vadd.f32 %v2963_v0, %v8256_v60  ;;  %3993 = vmatprep.mubr.f32.mxu1 %v8010_v61  ;;  %v3428_v16 = vpop.f32.mrf.mxu0  ;;  %v8261_v0 = vld [vmem:[#allocation60_spill] sm:$0xff] }
 0x242   : > { %v2965_v17 = vpop.f32.mrf.mxu1 }
 0x243   : > { %v7469_v37 = vadd.f32 %v3426_v5, %v3182_v63  ;;  %v3183_v49 = vadd.f32 %v2965_v17, %v8257_v58  ;;  %v3432_v52 = vpop.f32.mrf.mxu0  ;;  %5316 = vmatmul.mubr.msk.f32.gmra.mxu0 %vm253_vm1, %v8163_v8  ;;  %v8262_v5 = vld [vmem:[#allocation90_spill] sm:$0xff]  ;;  %v3758_v58 = vrot.slane %v7124_v42, 1 }
 0x244   : > { %v2969_v23 = vpop.f32.mrf.mxu1  ;;  %5281 = vmatmul.mubr.msk.f32.gmra.mxu1 %vm253_vm1, %v8258_v9  ;;  %4465 = vmatprep.mubr.f32.mxu0 %v8010_v61  ;;  %v4224_v9 = vrot.slane %v7124_v42, 2  ;;  %v8264_v42 = vld [vmem:[#allocation101_spill] sm:$0xff] }
 0x245   : > { %v7476_v36 = vadd.f32 %v3428_v16, %v3183_v49  ;;  %v3184_v50 = vadd.f32 %v2969_v23, %v8259_v40  ;;  %3999 = vmatprep.mubr.f32.mxu1 %v8010_v61  ;;  %v3434_v21 = vpop.f32.mrf.mxu0  ;;  %v3759_v49 = vrot.slane %v7143_v41, 1  ;;  %v4225_v40 = vrot.slane %v7143_v41, 2 }
 0x246   : > { %v2971_v25 = vpop.f32.mrf.mxu1 }
 0x247   : > { %v7481_v35 = vadd.f32 %v3432_v52, %v3184_v50  ;;  %v3185_v56 = vadd.f32 %v2971_v25, %v8260_v18  ;;  %v3438_v30 = vpop.f32.mrf.mxu0  ;;  %5317 = vmatmul.mubr.msk.f32.gmra.mxu0 %vm253_vm1, %v8165_v48  ;;  %v8263_v52 = vld [vmem:[#allocation100_spill] sm:$0xff]  ;;  %v249_v25 = vld [vmem:[%s5583_s20 + $0x1a8] sm:$0x3]  ;;  %s4940_s20 = sshll.u32 %s7666_s13, 4  ;;  %s7826_s20 = int_to_ptr.vmem [resolvable:$true] %s4940_s20 }
 0x248   : > { %v2975_v14 = vpop.f32.mrf.mxu1  ;;  %5282 = vmatmul.mubr.msk.f32.gmra.mxu1 %vm253_vm1, %v8261_v0  ;;  %4471 = vmatprep.mubr.f32.mxu0 %v8010_v61  ;;  %v3761_v41 = vrot.slane %v249_v25, 1  ;;  %s5412_s19 = scalar_lea.vmem %s7826_s20, 4096  ;;  %p5419_p0 = scmp.lt.s32.totalorder %s7826_s20, %s5417_s30 }
 0x249   : > { %v7488_v8 = vadd.f32 %v3434_v21, %v3185_v56  ;;  %v3186_v28 = vadd.f32 %v2975_v14, %v8262_v5  ;;  %4005 = vmatprep.mubr.f32.mxu1 %v8010_v61  ;;  %v3440_v63 = vpop.f32.mrf.mxu0  ;;  %v8265_v5 = vld [vmem:[#allocation95_spill] sm:$0xff]  ;;  %p5413_p11 = scmp.ne.s32.totalorder %s7826_s20, %s5412_s19  ;;  %p5420_p1 = scmp.lt.s32.totalorder %s5418_s5, %s5412_s19 }
 0x24a   : > { %v2977_v60 = vpop.f32.mrf.mxu1 }
 0x24b   : > { %v7493_v17 = vadd.f32 %v3438_v30, %v3186_v28  ;;  %v3187_v16 = vadd.f32 %v2977_v60, %v7102_v53  ;;  %v3444_v23 = vpop.f32.mrf.mxu0  ;;  %5318 = vmatmul.mubr.msk.f32.gmra.mxu0 %vm253_vm1, %v7121_v3  ;;  %v4227_v60 = vrot.slane %v249_v25, 2  ;;  %p5414_p12 = pnand %p5413_p11, %p5541_p5  ;;  %p5421_p2 = por %p5420_p1, %p5419_p0 }
 0x24c   : > { %v2981_v48 = vpop.f32.mrf.mxu1  ;;  %5283 = vmatmul.mubr.msk.f32.gmra.mxu1 %vm253_vm1, %v8263_v52  ;;  %4477 = vmatprep.mubr.f32.mxu0 %v8010_v61  ;;  %v3762_v52 = vsel %vm694_vm2, %v3759_v49, %v3761_v41 }
 0x24d   : > { %v7504_v50 = vadd.f32 %v3440_v63, %v3187_v16  ;;  %v3188_v53 = vadd.f32 %v2981_v48, %v7108_v57  ;;  %4011 = vmatprep.mubr.f32.mxu1 %v8010_v61  ;;  %v3446_v18 = vpop.f32.mrf.mxu0  ;;  %v3760_v57 = vsel %vm694_vm2, %v3758_v58, %v3759_v49  ;;  %p5415_p13 = pneg %p5414_p12 }
 0x24e   : > { %v2983_v21 = vpop.f32.mrf.mxu1 }
 0x24f   : > { %v7510_v56 = vadd.f32 %v3444_v23, %v3188_v53  ;;  %v3189_v14 = vadd.f32 %v2983_v21, %v7115_v32  ;;  %v3450_v30 = vpop.f32.mrf.mxu0  ;;  %5319 = vmatmul.mubr.msk.f32.gmra.mxu0 %vm253_vm1, %v7140_v34  ;;  %v4226_v32 = vsel %vm1296_vm3, %v4224_v9, %v4225_v40  ;;  %v4228_v9 = vsel %vm1296_vm3, %v4225_v40, %v4227_v60  ;;  %p5422_p3 = pnand %p5421_p2, %p5415_p13 }
 0x250   : > { %v2987_v3 = vpop.f32.mrf.mxu1  ;;  %5284 = vmatmul.mubr.msk.f32.gmra.mxu1 %vm253_vm1, %v8264_v42  ;;  %4483 = vmatprep.mubr.f32.mxu0 %v8010_v61 }
 0x251   : > { %v7518_v0 = vadd.f32 %v3446_v18, %v3189_v14  ;;  %v3190_v28 = vadd.f32 %v2987_v3, %v8265_v5  ;;  %4017 = vmatprep.mubr.f32.mxu1 %v8010_v61  ;;  %v3452_v16 = vpop.f32.mrf.mxu0 }
 0x252   : > { %v2989_v63 = vpop.f32.mrf.mxu1 }
 0x253   : > { %v7524_v48 = vadd.f32 %v3450_v30, %v3190_v28  ;;  %v3191_v34 = vadd.f32 %v2989_v63, %v7134_v24  ;;  %v3456_v58 = vpop.f32.mrf.mxu0  ;;  %5320 = vmatmul.mubr.msk.f32.gmra.mxu0 %vm253_vm1, %v4226_v32 }
 0x254   : > { %v2993_v23 = vpop.f32.mrf.mxu1  ;;  %5285 = vmatmul.mubr.msk.f32.gmra.mxu1 %vm253_vm1, %v3760_v57  ;;  %4489 = vmatprep.mubr.f32.mxu0 %v8010_v61 }
 0x255   : > { %v7530_v53 = vadd.f32 %v3452_v16, %v3191_v34  ;;  %v3192_v21 = vadd.f32 %v2993_v23, %v7145_v20  ;;  %4023 = vmatprep.mubr.f32.mxu1 %v8010_v61  ;;  %v3458_v24 = vpop.f32.mrf.mxu0  ;;  %v8267_v34 = vld [vmem:[#allocation93_spill] sm:$0xff] }
 0x256   : > { %v2995_v25 = vpop.f32.mrf.mxu1 }
 0x257   : > { %v7536_v18 = vadd.f32 %v3456_v58, %v3192_v21  ;;  %v3193_v14 = vadd.f32 %v2995_v25, %v7152_v31  ;;  %v3462_v30 = vpop.f32.mrf.mxu0  ;;  %5321 = vmatmul.mubr.msk.f32.gmra.mxu0 %vm253_vm1, %v4228_v9  ;;  %v8266_v31 = vld [vmem:[#allocation91_spill] sm:$0xff] }
 0x258   : > { %v2999_v3 = vpop.f32.mrf.mxu1  ;;  %5286 = vmatmul.mubr.msk.f32.gmra.mxu1 %vm253_vm1, %v3762_v52  ;;  %v8268_v21 = vld [vmem:[#allocation35_spill] sm:$0xff] }
 0x259   : > { %v7541_v49 = vadd.f32 %v3458_v24, %v3193_v14  ;;  %v3194_v20 = vadd.f32 %v2999_v3, %v7157_v47  ;;  %v3464_v61 = vpop.f32.mrf.mxu0  ;;  %v8269_v14 = vld [vmem:[#allocation94_spill] sm:$0xff] }
 0x25a   : > { %v3001_v42 = vpop.f32.mrf.mxu1 }
 0x25b   : > { %v7544_v57 = vadd.f32 %v3462_v30, %v3194_v20  ;;  %v3195_v40 = vadd.f32 %v3001_v42, %v7164_v59  ;;  %v3468_v5 = vpop.f32.mrf.mxu0 }
 0x25c   : > { %v3005_v41 = vpop.f32.mrf.mxu1 }
 0x25d   : > { %v7547_v28 = vadd.f32 %v3464_v61, %v3195_v40  ;;  %v3196_v32 = vadd.f32 %v3005_v41, %v8266_v31  ;;  %v3470_v63 = vpop.f32.mrf.mxu0  ;;  %v8270_v61 = vld [vmem:[#allocation37_spill] sm:$0xff] }
 0x25e   : > { %v3007_v60 = vpop.f32.mrf.mxu1 }
 0x25f   : > { %v7550_v16 = vadd.f32 %v3468_v5, %v3196_v32  ;;  %v3197_v23 = vadd.f32 %v3007_v60, %v8267_v34  ;;  %v3474_v47 = vpop.f32.mrf.mxu0  ;;  %v8272_v32 = vld [vmem:[#allocation39_spill] sm:$0xff] }
 0x260   : > { %v3011_v58 = vpop.f32.mrf.mxu1 }
 0x261   : > { %v7553_v52 = vadd.f32 %v3470_v63, %v3197_v23  ;;  %v3198_v9 = vadd.f32 %v3011_v58, %v8268_v21  ;;  %v3476_v59 = vpop.f32.mrf.mxu0  ;;  %v8274_v58 = vld [vmem:[#allocation41_spill] sm:$0xff] }
 0x262   : > { %v3013_v25 = vpop.f32.mrf.mxu1 }
 0x263   : > { %v7556_v24 = vadd.f32 %v3474_v47, %v3198_v9  ;;  %v3199_v3 = vadd.f32 %v3013_v25, %v8269_v14  ;;  %v3480_v20 = vpop.f32.mrf.mxu0 }
 0x264   : > { %v3017_v30 = vpop.f32.mrf.mxu1 }
 0x265   : > { %v7559_v42 = vadd.f32 %v3476_v59, %v3199_v3  ;;  %v3200_v40 = vadd.f32 %v3017_v30, %v8270_v61  ;;  %v3482_v5 = vpop.f32.mrf.mxu0  ;;  %v8276_v59 = vld [vmem:[#allocation43_spill] sm:$0xff] }
 0x266   : > { %v3019_v41 = vpop.f32.mrf.mxu1 }
 0x267   : > { %v7562_v31 = vadd.f32 %v3480_v20, %v3200_v40  ;;  %v3201_v60 = vadd.f32 %v3019_v41, %v8272_v32  ;;  %v3486_v34 = vpop.f32.mrf.mxu0  ;;  %v8278_v20 = vld [vmem:[#allocation45_spill] sm:$0xff] }
 0x268   : > { %v3023_v63 = vpop.f32.mrf.mxu1 }
 0x269   : > { %8271 = vst [vmem:[#allocation63_spill] sm:$0xff] %v7562_v31  ;;  %v7565_v23 = vadd.f32 %v3482_v5, %v3201_v60  ;;  %v3202_v47 = vadd.f32 %v3023_v63, %v8274_v58  ;;  %v3488_v9 = vpop.f32.mrf.mxu0  ;;  %v8280_v5 = vld [vmem:[#allocation47_spill] sm:$0xff] }
 0x26a   : > { %v3025_v21 = vpop.f32.mrf.mxu1 }
 0x26b   : > { %8273 = vst [vmem:[#allocation10_spill] sm:$0xff] %v7565_v23  ;;  %v7568_v25 = vadd.f32 %v3486_v34, %v3202_v47  ;;  %v3203_v14 = vadd.f32 %v3025_v21, %v8276_v59  ;;  %v3492_v30 = vpop.f32.mrf.mxu0  ;;  %v8282_v34 = vld [vmem:[#allocation49_spill] sm:$0xff] }
 0x26c   : > { %v3029_v3 = vpop.f32.mrf.mxu1 }
 0x26d   : > { %8275 = vst [vmem:[#allocation11_spill] sm:$0xff] %v7568_v25  ;;  %v7571_v61 = vadd.f32 %v3488_v9, %v3203_v14  ;;  %v3204_v40 = vadd.f32 %v3029_v3, %v8278_v20  ;;  %v3494_v41 = vpop.f32.mrf.mxu0  ;;  %v8284_v9 = vld [vmem:[#allocation51_spill] sm:$0xff] }
 0x26e   : > { %v3031_v31 = vpop.f32.mrf.mxu1 }
 0x26f   : > { %8277 = vst [vmem:[#allocation7_spill] sm:$0xff] %v7571_v61  ;;  %v7574_v32 = vadd.f32 %v3492_v30, %v3204_v40  ;;  %v3205_v60 = vadd.f32 %v3031_v31, %v8280_v5  ;;  %v3498_v63 = vpop.f32.mrf.mxu0  ;;  %v8286_v30 = vld [vmem:[#allocation53_spill] sm:$0xff] }
 0x270   : > { %v3035_v23 = vpop.f32.mrf.mxu1 }
 0x271   : > { %8279 = vst [vmem:[#allocation64_spill] sm:$0xff] %v7574_v32  ;;  %v7577_v58 = vadd.f32 %v3494_v41, %v3205_v60  ;;  %v3206_v47 = vadd.f32 %v3035_v23, %v8282_v34  ;;  %v3500_v21 = vpop.f32.mrf.mxu0  ;;  %v8288_v41 = vld [vmem:[#allocation55_spill] sm:$0xff] }
 0x272   : > { %v3037_v25 = vpop.f32.mrf.mxu1 }
 0x273   : > { %8281 = vst [vmem:[#allocation12_spill] sm:$0xff] %v7577_v58  ;;  %v7580_v59 = vadd.f32 %v3498_v63, %v3206_v47  ;;  %v3207_v14 = vadd.f32 %v3037_v25, %v8284_v9  ;;  %v3504_v3 = vpop.f32.mrf.mxu0  ;;  %v8290_v63 = vld [vmem:[#allocation57_spill] sm:$0xff] }
 0x274   : > { %v3041_v61 = vpop.f32.mrf.mxu1 }
 0x275   : > { %8283 = vst [vmem:[#allocation13_spill] sm:$0xff] %v7580_v59  ;;  %v7583_v20 = vadd.f32 %v3500_v21, %v3207_v14  ;;  %v3208_v40 = vadd.f32 %v3041_v61, %v8286_v30  ;;  %v3506_v31 = vpop.f32.mrf.mxu0  ;;  %v8292_v21 = vld [vmem:[#allocation99_spill] sm:$0xff] }
 0x276   : > { %v3043_v32 = vpop.f32.mrf.mxu1 }
 0x277   : > { %8285 = vst [vmem:[#allocation65_spill] sm:$0xff] %v7583_v20  ;;  %v7586_v5 = vadd.f32 %v3504_v3, %v3208_v40  ;;  %v3209_v60 = vadd.f32 %v3043_v32, %v8288_v41  ;;  %v3510_v23 = vpop.f32.mrf.mxu0  ;;  %v8294_v3 = vld [vmem:[#allocation96_spill] sm:$0xff] }
 0x278   : > { %v3047_v58 = vpop.f32.mrf.mxu1 }
 0x279   : > { %8287 = vst [vmem:[#allocation9_spill] sm:$0xff] %v7586_v5  ;;  %v7589_v34 = vadd.f32 %v3506_v31, %v3209_v60  ;;  %v3210_v47 = vadd.f32 %v3047_v58, %v8290_v63  ;;  %v3512_v25 = vpop.f32.mrf.mxu0  ;;  %v8296_v31 = vld [vmem:[#allocation97_spill] sm:$0xff] }
 0x27a   : > { %v3049_v59 = vpop.f32.mrf.mxu1 }
 0x27b   : > { %8289 = vst [vmem:[#allocation14_spill] sm:$0xff] %v7589_v34  ;;  %v7592_v9 = vadd.f32 %v3510_v23, %v3210_v47  ;;  %v3211_v14 = vadd.f32 %v3049_v59, %v8292_v21  ;;  %v3516_v61 = vpop.f32.mrf.mxu0  ;;  %v8297_v23 = vld [vmem:[#allocation59_spill] sm:$0xff] }
 0x27c   : > { %v3053_v20 = vpop.f32.mrf.mxu1 }
 0x27d   : > { %8291 = vst [vmem:[#allocation15_spill] sm:$0xff] %v7592_v9  ;;  %v7595_v30 = vadd.f32 %v3512_v25, %v3211_v14  ;;  %v3212_v40 = vadd.f32 %v3053_v20, %v8294_v3  ;;  %v3518_v32 = vpop.f32.mrf.mxu0  ;;  %v8299_v25 = vld [vmem:[#allocation98_spill] sm:$0xff] }
 0x27e   : > { %v3055_v5 = vpop.f32.mrf.mxu1 }
 0x27f   : > { %8293 = vst [vmem:[#allocation66_spill] sm:$0xff] %v7595_v30  ;;  %v7598_v41 = vadd.f32 %v3516_v61, %v3212_v40  ;;  %v3213_v60 = vadd.f32 %v3055_v5, %v8296_v31  ;;  %v3522_v58 = vpop.f32.mrf.mxu0  ;;  %v8301_v61 = vld [vmem:[#allocation61_spill] sm:$0xff] }
 0x280   : > { %v3059_v34 = vpop.f32.mrf.mxu1 }
 0x281   : > { %8295 = vst [vmem:[#allocation67_spill] sm:$0xff] %v7598_v41  ;;  %v7601_v63 = vadd.f32 %v3518_v32, %v3213_v60  ;;  %v3214_v47 = vadd.f32 %v3059_v34, %v8297_v23  ;;  %v3524_v59 = vpop.f32.mrf.mxu0 }
 0x282   : > { %v3061_v9 = vpop.f32.mrf.mxu1 }
 0x283   : > { %v7604_v21 = vadd.f32 %v3522_v58, %v3214_v47  ;;  %v3215_v14 = vadd.f32 %v3061_v9, %v8299_v25  ;;  %v3528_v20 = vpop.f32.mrf.mxu0  ;;  %v8303_v58 = vld [vmem:[#allocation6_spill] sm:$0xff] }
 0x284   : > { %v3065_v30 = vpop.f32.mrf.mxu1 }
 0x285   : > { %8298 = vst [vmem:[#allocation16_spill] sm:$0xff] %v7604_v21  ;;  %v7607_v3 = vadd.f32 %v3524_v59, %v3215_v14  ;;  %v3216_v40 = vadd.f32 %v3065_v30, %v8301_v61  ;;  %v3530_v5 = vpop.f32.mrf.mxu0  ;;  %v8304_v59 = vld [vmem:[#allocation8_spill] sm:$0xff] }
 0x286   : > { %v3067_v41 = vpop.f32.mrf.mxu1 }
 0x287   : > { %8300 = vst [vmem:[#allocation17_spill] sm:$0xff] %v7607_v3  ;;  %v7610_v31 = vadd.f32 %v3528_v20, %v3216_v40  ;;  %v3217_v32 = vadd.f32 %v3067_v41, %v7296_v22  ;;  %v3534_v34 = vpop.f32.mrf.mxu0  ;;  %v8305_v20 = vld [vmem:[#allocation62_spill] sm:$0xff] }
 0x288   : > { %v3071_v60 = vpop.f32.mrf.mxu1 }
 0x289   : > { %8302 = vst [vmem:[#allocation68_spill] sm:$0xff] %v7610_v31  ;;  %v7613_v23 = vadd.f32 %v3530_v5, %v3217_v32  ;;  %v3218_v47 = vadd.f32 %v3071_v60, %v8303_v58  ;;  %v3536_v9 = vpop.f32.mrf.mxu0 }
 0x28a   : > { %v3073_v21 = vpop.f32.mrf.mxu1 }
 0x28b   : > { %v7616_v25 = vadd.f32 %v3534_v34, %v3218_v47  ;;  %v3219_v14 = vadd.f32 %v3073_v21, %v8304_v59  ;;  %v3540_v30 = vpop.f32.mrf.mxu0 }
 0x28c   : > { %v3077_v3 = vpop.f32.mrf.mxu1 }
 0x28d   : > { %v7619_v61 = vadd.f32 %v3536_v9, %v3219_v14  ;;  %v3220_v40 = vadd.f32 %v3077_v3, %v8305_v20  ;;  %v3542_v22 = vpop.f32.mrf.mxu0 }
 0x28e   : > { %v3079_v31 = vpop.f32.mrf.mxu1 }
 0x28f   : > { %v7622_v41 = vadd.f32 %v3540_v30, %v3220_v40  ;;  %v3221_v5 = vadd.f32 %v3079_v31, %v7320_v54  ;;  %v3546_v60 = vpop.f32.mrf.mxu0 }
 0x290   : > { %v3083_v32 = vpop.f32.mrf.mxu1 }
 0x291   : > { %v7625_v58 = vadd.f32 %v3542_v22, %v3221_v5  ;;  %v3222_v34 = vadd.f32 %v3083_v32, %v7325_v62  ;;  %v3548_v21 = vpop.f32.mrf.mxu0 }
 0x292   : > { %v3085_v47 = vpop.f32.mrf.mxu1 }
 0x293   : > { %v7628_v59 = vadd.f32 %v3546_v60, %v3222_v34  ;;  %v3223_v9 = vadd.f32 %v3085_v47, %v7332_v33  ;;  %v3552_v3 = vpop.f32.mrf.mxu0 }
 0x294   : > { %v3089_v14 = vpop.f32.mrf.mxu1 }
 0x295   : > { %v7631_v20 = vadd.f32 %v3548_v21, %v3223_v9  ;;  %v3224_v30 = vadd.f32 %v3089_v14, %v7337_v26  ;;  %v3554_v54 = vpop.f32.mrf.mxu0 }
 0x296   : > { %v3091_v40 = vpop.f32.mrf.mxu1 }
 0x297   : > { %v7634_v31 = vadd.f32 %v3552_v3, %v3224_v30  ;;  %v3225_v22 = vadd.f32 %v3091_v40, %v7344_v19  ;;  %v3558_v5 = vpop.f32.mrf.mxu0  ;;  %v7649_v19 = vld [vmem:[%s7873_s2] ss:$0 sm:$0xff] }
 0x298   : > { %v3095_v62 = vpop.f32.mrf.mxu1 }
 0x299   : > { %8306 = vst [vmem:[#allocation69_spill] sm:$0xff] %v7634_v31  ;;  %v7637_v32 = vadd.f32 %v3554_v54, %v3225_v22  ;;  %v3226_v60 = vadd.f32 %v3095_v62, %v7349_v27  ;;  %v3560_v34 = vpop.f32.mrf.mxu0 }
 0x29a   : > { %v3097_v33 = vpop.f32.mrf.mxu1 }
 0x29b   : > { %8307 = vst [vmem:[#allocation18_spill] sm:$0xff] %v7637_v32  ;;  %v7640_v47 = vadd.f32 %v3558_v5, %v3226_v60  ;;  %v3227_v26 = vadd.f32 %v3097_v33, %v7356_v39  ;;  %v4305_v9 = vpop.f32.mrf.mxu0  ;;  %v7656_v39 = vld [vmem:[%s7874_s3] ss:$0 sm:$0xff] }
 0x29c   : > { %v3839_v21 = vpop.f32.mrf.mxu1 }
 0x29d   : > { %8308 = vst [vmem:[#allocation19_spill] sm:$0xff] %v7640_v47  ;;  %v7643_v14 = vadd.f32 %v3560_v34, %v3227_v26  ;;  %v4094_v3 = vadd.f32 %v3839_v21, %v7361_v6  ;;  %v4307_v27 = vpop.f32.mrf.mxu0 }
 0x29e   : > { %v3841_v30 = vpop.f32.mrf.mxu1 }
 0x29f   : > { %8309 = vst [vmem:[#allocation70_spill] sm:$0xff] %v7643_v14  ;;  %v4560_v40 = vadd.f32 %v4305_v9, %v4094_v3  ;;  %v4095_v54 = vadd.f32 %v3841_v30, %v7368_v11  ;;  %v4311_v62 = vpop.f32.mrf.mxu0 }
 0x2a0   : > { %v3845_v22 = vpop.f32.mrf.mxu1 }
 0x2a1   : > { %v4727_v6 = vadd.f32 %v7649_v19, %v4560_v40  ;;  %v4561_v5 = vadd.f32 %v4307_v27, %v4095_v54  ;;  %v4096_v60 = vadd.f32 %v3845_v22, %v7373_v12  ;;  %v4313_v34 = vpop.f32.mrf.mxu0 }
 0x2a2   : > { %v3847_v33 = vpop.f32.mrf.mxu1 }
 0x2a3   : > { %v4759_v26 = vmax.f32 %v4727_v6, 0.0  ;;  %v4830_v21 = vadd.f32 %v7656_v39, %v4561_v5  ;;  %v4562_v11 = vadd.f32 %v4311_v62, %v4096_v60  ;;  %v4097_v9 = vadd.f32 %v3847_v33, %v7380_v55  ;;  %v4317_v30 = vpop.f32.mrf.mxu0 }
 0x2a4   : > { %v3851_v3 = vpop.f32.mrf.mxu1 }
 0x2a5   : > { %v4862_v14 = vadd.f32 %v4830_v21, %v4759_v26  ;;  %v4728_v47 = vadd.f32 %v7649_v19, %v4562_v11  ;;  %v4563_v32 = vadd.f32 %v4313_v34, %v4097_v9  ;;  %v4098_v40 = vadd.f32 %v3851_v3, %v7385_v7  ;;  %v4319_v27 = vpop.f32.mrf.mxu0 }
 0x2a6   : > { %v3853_v31 = vpop.f32.mrf.mxu1 }
 0x2a7   : > { %4894 = vst [vmem:[%s7666_s13] sm:$0xff] %v4862_v14  ;;  %v4760_v12 = vmax.f32 %v4728_v47, 0.0  ;;  %v4831_v54 = vadd.f32 %v7656_v39, %v4563_v32  ;;  %v4564_v22 = vadd.f32 %v4317_v30, %v4098_v40  ;;  %v4099_v55 = vadd.f32 %v3853_v31, %v7392_v1  ;;  %v4323_v6 = vpop.f32.mrf.mxu0 }
 0x2a8   : > { %v3857_v62 = vpop.f32.mrf.mxu1 }
 0x2a9   : > { %v4863_v5 = vadd.f32 %v4831_v54, %v4760_v12  ;;  %v4729_v60 = vadd.f32 %v7649_v19, %v4564_v22  ;;  %v4565_v33 = vadd.f32 %v4319_v27, %v4099_v55  ;;  %v4100_v7 = vadd.f32 %v3857_v62, %v7397_v4  ;;  %v4325_v26 = vpop.f32.mrf.mxu0 }
 0x2aa   : > { %v3859_v34 = vpop.f32.mrf.mxu1 }
 0x2ab   : > { %4895 = vst [vmem:[%s7666_s13 + $0x8] sm:$0xff] %v4863_v5  ;;  %v4761_v21 = vmax.f32 %v4729_v60, 0.0  ;;  %v4832_v47 = vadd.f32 %v7656_v39, %v4565_v33  ;;  %v4566_v14 = vadd.f32 %v4323_v6, %v4100_v7  ;;  %v4101_v32 = vadd.f32 %v3859_v34, %v7404_v38  ;;  %v4329_v1 = vpop.f32.mrf.mxu0 }
 0x2ac   : > { %v3863_v11 = vpop.f32.mrf.mxu1 }
 0x2ad   : > { %v4864_v31 = vadd.f32 %v4832_v47, %v4761_v21  ;;  %v4730_v9 = vadd.f32 %v7649_v19, %v4566_v14  ;;  %v4567_v3 = vadd.f32 %v4325_v26, %v4101_v32  ;;  %v4102_v30 = vadd.f32 %v3863_v11, %v7409_v45  ;;  %v4331_v40 = vpop.f32.mrf.mxu0 }
 0x2ae   : > { %v3865_v4 = vpop.f32.mrf.mxu1 }
 0x2af   : > { %4896 = vst [vmem:[%s7666_s13 + $0x10] sm:$0xff] %v4864_v31  ;;  %v4762_v27 = vmax.f32 %v4730_v9, 0.0  ;;  %v4833_v12 = vadd.f32 %v7656_v39, %v4567_v3  ;;  %v4568_v54 = vadd.f32 %v4329_v1, %v4102_v30  ;;  %v4103_v22 = vadd.f32 %v3865_v4, %v7416_v29  ;;  %v4335_v38 = vpop.f32.mrf.mxu0 }
 0x2b0   : > { %v3869_v55 = vpop.f32.mrf.mxu1 }
 0x2b1   : > { %v4865_v62 = vadd.f32 %v4833_v12, %v4762_v27  ;;  %v4731_v6 = vadd.f32 %v7649_v19, %v4568_v54  ;;  %v4569_v5 = vadd.f32 %v4331_v40, %v4103_v22  ;;  %v4104_v60 = vadd.f32 %v3869_v55, %v7421_v2  ;;  %v4337_v33 = vpop.f32.mrf.mxu0 }
 0x2b2   : > { %v3871_v45 = vpop.f32.mrf.mxu1 }
 0x2b3   : > { %4897 = vst [vmem:[%s7666_s13 + $0x18] sm:$0xff] %v4865_v62  ;;  %v4763_v7 = vmax.f32 %v4731_v6, 0.0  ;;  %v4834_v34 = vadd.f32 %v7656_v39, %v4569_v5  ;;  %v4570_v26 = vadd.f32 %v4335_v38, %v4104_v60  ;;  %v4105_v21 = vadd.f32 %v3871_v45, %v7428_v51  ;;  %v4341_v29 = vpop.f32.mrf.mxu0 }
 0x2b4   : > { %v3875_v47 = vpop.f32.mrf.mxu1 }
 0x2b5   : > { %v4866_v14 = vadd.f32 %v4834_v34, %v4763_v7  ;;  %v4732_v32 = vadd.f32 %v7649_v19, %v4570_v26  ;;  %v4571_v11 = vadd.f32 %v4337_v33, %v4105_v21  ;;  %v4106_v1 = vadd.f32 %v3875_v47, %v7433_v10  ;;  %v4343_v31 = vpop.f32.mrf.mxu0 }
 0x2b6   : > { %v3877_v2 = vpop.f32.mrf.mxu1 }
 0x2b7   : > { %4898 = vst [vmem:[%s7666_s13 + $0x20] sm:$0xff] %v4866_v14  ;;  %v4764_v9 = vmax.f32 %v4732_v32, 0.0  ;;  %v4835_v3 = vadd.f32 %v7656_v39, %v4571_v11  ;;  %v4572_v30 = vadd.f32 %v4341_v29, %v4106_v1  ;;  %v4107_v4 = vadd.f32 %v3877_v2, %v7440_v13  ;;  %v4347_v51 = vpop.f32.mrf.mxu0 }
 0x2b8   : > { %v3881_v40 = vpop.f32.mrf.mxu1 }
 0x2b9   : > { %v4867_v27 = vadd.f32 %v4835_v3, %v4764_v9  ;;  %v4733_v12 = vadd.f32 %v7649_v19, %v4572_v30  ;;  %v4573_v54 = vadd.f32 %v4343_v31, %v4107_v4  ;;  %v4108_v22 = vadd.f32 %v3881_v40, %v7445_v44  ;;  %v4349_v55 = vpop.f32.mrf.mxu0 }
 0x2ba   : > { %v3883_v10 = vpop.f32.mrf.mxu1 }
 0x2bb   : > { %4899 = vst [vmem:[%s7666_s13 + $0x28] sm:$0xff] %v4867_v27  ;;  %v4765_v38 = vmax.f32 %v4733_v12, 0.0  ;;  %v4836_v62 = vadd.f32 %v7656_v39, %v4573_v54  ;;  %v4574_v6 = vadd.f32 %v4347_v51, %v4108_v22  ;;  %v4109_v5 = vadd.f32 %v3883_v10, %v7452_v43  ;;  %v4353_v13 = vpop.f32.mrf.mxu0 }
 0x2bc   : > { %v3887_v60 = vpop.f32.mrf.mxu1 }
 0x2bd   : > { %v4868_v45 = vadd.f32 %v4836_v62, %v4765_v38  ;;  %v4734_v33 = vadd.f32 %v7649_v19, %v4574_v6  ;;  %v4575_v7 = vadd.f32 %v4349_v55, %v4109_v5  ;;  %v4110_v34 = vadd.f32 %v3887_v60, %v7457_v46  ;;  %v4355_v26 = vpop.f32.mrf.mxu0 }
 0x2be   : > { %v3889_v44 = vpop.f32.mrf.mxu1 }
 0x2bf   : > { %4900 = vst [vmem:[%s7666_s13 + $0x30] sm:$0xff] %v4868_v45  ;;  %v4766_v21 = vmax.f32 %v4734_v33, 0.0  ;;  %v4837_v47 = vadd.f32 %v7656_v39, %v4575_v7  ;;  %v4576_v29 = vadd.f32 %v4353_v13, %v4110_v34  ;;  %v4111_v14 = vadd.f32 %v3889_v44, %v7464_v15  ;;  %v4359_v43 = vpop.f32.mrf.mxu0 }
 0x2c0   : > { %v3893_v32 = vpop.f32.mrf.mxu1 }
 0x2c1   : > { %v4869_v11 = vadd.f32 %v4837_v47, %v4766_v21  ;;  %v4735_v1 = vadd.f32 %v7649_v19, %v4576_v29  ;;  %v4577_v2 = vadd.f32 %v4355_v26, %v4111_v14  ;;  %v4112_v31 = vadd.f32 %v3893_v32, %v7469_v37  ;;  %v4361_v9 = vpop.f32.mrf.mxu0 }
 0x2c2   : > { %v3895_v46 = vpop.f32.mrf.mxu1 }
 0x2c3   : > { %4901 = vst [vmem:[%s7666_s13 + $0x38] sm:$0xff] %v4869_v11  ;;  %v4767_v3 = vmax.f32 %v4735_v1, 0.0  ;;  %v4838_v30 = vadd.f32 %v7656_v39, %v4577_v2  ;;  %v4578_v4 = vadd.f32 %v4359_v43, %v4112_v31  ;;  %v4113_v40 = vadd.f32 %v3895_v46, %v7476_v36  ;;  %v4365_v15 = vpop.f32.mrf.mxu0 }
 0x2c4   : > { %v3899_v51 = vpop.f32.mrf.mxu1 }
 0x2c5   : > { %v4870_v27 = vadd.f32 %v4838_v30, %v4767_v3  ;;  %v4736_v12 = vadd.f32 %v7649_v19, %v4578_v4  ;;  %v4579_v54 = vadd.f32 %v4361_v9, %v4113_v40  ;;  %v4114_v22 = vadd.f32 %v3899_v51, %v7481_v35  ;;  %v4367_v10 = vpop.f32.mrf.mxu0 }
 0x2c6   : > { %v3901_v37 = vpop.f32.mrf.mxu1 }
 0x2c7   : > { %4902 = vst [vmem:[%s7666_s13 + $0x40] sm:$0xff] %v4870_v27  ;;  %v4768_v55 = vmax.f32 %v4736_v12, 0.0  ;;  %v4839_v38 = vadd.f32 %v7656_v39, %v4579_v54  ;;  %v4580_v62 = vadd.f32 %v4365_v15, %v4114_v22  ;;  %v4115_v6 = vadd.f32 %v3901_v37, %v7488_v8  ;;  %v4371_v36 = vpop.f32.mrf.mxu0 }
 0x2c8   : > { %v3905_v5 = vpop.f32.mrf.mxu1 }
 0x2c9   : > { %v4871_v60 = vadd.f32 %v4839_v38, %v4768_v55  ;;  %v4737_v13 = vadd.f32 %v7649_v19, %v4580_v62  ;;  %v4581_v45 = vadd.f32 %v4367_v10, %v4115_v6  ;;  %v4116_v33 = vadd.f32 %v3905_v5, %v7493_v17  ;;  %v4373_v7 = vpop.f32.mrf.mxu0 }
 0x2ca   : > { %v3907_v35 = vpop.f32.mrf.mxu1 }
 0x2cb   : > { %4903 = vst [vmem:[%s7666_s13 + $0x48] sm:$0xff] %v4871_v60  ;;  %v4769_v34 = vmax.f32 %v4737_v13, 0.0  ;;  %v4840_v44 = vadd.f32 %v7656_v39, %v4581_v45  ;;  %v4582_v26 = vadd.f32 %v4371_v36, %v4116_v33  ;;  %v4117_v21 = vadd.f32 %v3907_v35, %v7504_v50  ;;  %v4377_v8 = vpop.f32.mrf.mxu0 }
 0x2cc   : > { %v3911_v47 = vpop.f32.mrf.mxu1 }
 0x2cd   : > { %v4872_v29 = vadd.f32 %v4840_v44, %v4769_v34  ;;  %v4738_v14 = vadd.f32 %v7649_v19, %v4582_v26  ;;  %v4583_v32 = vadd.f32 %v4373_v7, %v4117_v21  ;;  %v4118_v43 = vadd.f32 %v3911_v47, %v7510_v56  ;;  %v4379_v11 = vpop.f32.mrf.mxu0 }
 0x2ce   : > { %v3913_v17 = vpop.f32.mrf.mxu1 }
 0x2cf   : > { %4904 = vst [vmem:[%s7666_s13 + $0x50] sm:$0xff] %v4872_v29  ;;  %v4770_v1 = vmax.f32 %v4738_v14, 0.0  ;;  %v4841_v2 = vadd.f32 %v7656_v39, %v4583_v32  ;;  %v4584_v31 = vadd.f32 %v4377_v8, %v4118_v43  ;;  %v4119_v46 = vadd.f32 %v3913_v17, %v7518_v0  ;;  %v4383_v50 = vpop.f32.mrf.mxu0 }
 0x2d0   : > { %v3917_v9 = vpop.f32.mrf.mxu1 }
 0x2d1   : > { %v4873_v3 = vadd.f32 %v4841_v2, %v4770_v1  ;;  %v4739_v30 = vadd.f32 %v7649_v19, %v4584_v31  ;;  %v4585_v4 = vadd.f32 %v4379_v11, %v4119_v46  ;;  %v4120_v40 = vadd.f32 %v3917_v9, %v7524_v48  ;;  %v4385_v51 = vpop.f32.mrf.mxu0 }
 0x2d2   : > { %v3919_v56 = vpop.f32.mrf.mxu1 }
 0x2d3   : > { %4905 = vst [vmem:[%s7666_s13 + $0x58] sm:$0xff] %v4873_v3  ;;  %v4771_v15 = vmax.f32 %v4739_v30, 0.0  ;;  %v4842_v27 = vadd.f32 %v7656_v39, %v4585_v4  ;;  %v4586_v12 = vadd.f32 %v4383_v50, %v4120_v40  ;;  %v4121_v54 = vadd.f32 %v3919_v56, %v7530_v53  ;;  %v4389_v0 = vpop.f32.mrf.mxu0 }
 0x2d4   : > { %v3923_v22 = vpop.f32.mrf.mxu1 }
 0x2d5   : > { %v4874_v37 = vadd.f32 %v4842_v27, %v4771_v15  ;;  %v4740_v10 = vadd.f32 %v7649_v19, %v4586_v12  ;;  %v4587_v55 = vadd.f32 %v4385_v51, %v4121_v54  ;;  %v4122_v38 = vadd.f32 %v3923_v22, %v7536_v18  ;;  %v4391_v62 = vpop.f32.mrf.mxu0 }
 0x2d6   : > { %v3925_v48 = vpop.f32.mrf.mxu1 }
 0x2d7   : > { %4906 = vst [vmem:[%s7666_s13 + $0x60] sm:$0xff] %v4874_v37  ;;  %v4772_v6 = vmax.f32 %v4740_v10, 0.0  ;;  %v4843_v5 = vadd.f32 %v7656_v39, %v4587_v55  ;;  %v4588_v36 = vadd.f32 %v4389_v0, %v4122_v38  ;;  %v4123_v60 = vadd.f32 %v3925_v48, %v7541_v49  ;;  %v4395_v53 = vpop.f32.mrf.mxu0  ;;  %v8310_v0 = vld [vmem:[#allocation63_spill] sm:$0xff] }
 0x2d8   : > { %v3929_v13 = vpop.f32.mrf.mxu1 }
 0x2d9   : > { %v4875_v45 = vadd.f32 %v4843_v5, %v4772_v6  ;;  %v4741_v33 = vadd.f32 %v7649_v19, %v4588_v36  ;;  %v4589_v35 = vadd.f32 %v4391_v62, %v4123_v60  ;;  %v4124_v7 = vadd.f32 %v3929_v13, %v7544_v57  ;;  %v4397_v34 = vpop.f32.mrf.mxu0  ;;  %v8311_v62 = vld [vmem:[#allocation10_spill] sm:$0xff] }
 0x2da   : > { %v3931_v18 = vpop.f32.mrf.mxu1 }
 0x2db   : > { %4907 = vst [vmem:[%s7666_s13 + $0x68] sm:$0xff] %v4875_v45  ;;  %v4773_v44 = vmax.f32 %v4741_v33, 0.0  ;;  %v4844_v26 = vadd.f32 %v7656_v39, %v4589_v35  ;;  %v4590_v21 = vadd.f32 %v4395_v53, %v4124_v7  ;;  %v4125_v47 = vadd.f32 %v3931_v18, %v7547_v28  ;;  %v4401_v49 = vpop.f32.mrf.mxu0  ;;  %v8312_v53 = vld [vmem:[#allocation11_spill] sm:$0xff] }
 0x2dc   : > { %v3935_v8 = vpop.f32.mrf.mxu1 }
 0x2dd   : > { %v4876_v29 = vadd.f32 %v4844_v26, %v4773_v44  ;;  %v4742_v14 = vadd.f32 %v7649_v19, %v4590_v21  ;;  %v4591_v32 = vadd.f32 %v4397_v34, %v4125_v47  ;;  %v4126_v43 = vadd.f32 %v3935_v8, %v7550_v16  ;;  %v4403_v17 = vpop.f32.mrf.mxu0  ;;  %v8313_v44 = vld [vmem:[#allocation7_spill] sm:$0xff] }
 0x2de   : > { %v3937_v57 = vpop.f32.mrf.mxu1 }
 0x2df   : > { %4908 = vst [vmem:[%s7666_s13 + $0x70] sm:$0xff] %v4876_v29  ;;  %v4774_v11 = vmax.f32 %v4742_v14, 0.0  ;;  %v4845_v1 = vadd.f32 %v7656_v39, %v4591_v32  ;;  %v4592_v2 = vadd.f32 %v4401_v49, %v4126_v43  ;;  %v4127_v31 = vadd.f32 %v3937_v57, %v7553_v52  ;;  %v4407_v28 = vpop.f32.mrf.mxu0  ;;  %v8314_v14 = vld [vmem:[#allocation64_spill] sm:$0xff] }
 0x2e0   : > { %v3941_v46 = vpop.f32.mrf.mxu1 }
 0x2e1   : > { %v4877_v9 = vadd.f32 %v4845_v1, %v4774_v11  ;;  %v4743_v50 = vadd.f32 %v7649_v19, %v4592_v2  ;;  %v4593_v3 = vadd.f32 %v4403_v17, %v4127_v31  ;;  %v4128_v30 = vadd.f32 %v3941_v46, %v7556_v24  ;;  %v4409_v4 = vpop.f32.mrf.mxu0  ;;  %v8315_v2 = vld [vmem:[#allocation12_spill] sm:$0xff] }
 0x2e2   : > { %v3943_v16 = vpop.f32.mrf.mxu1 }
 0x2e3   : > { %4909 = vst [vmem:[%s7666_s13 + $0x78] sm:$0xff] %v4877_v9  ;;  %v4775_v40 = vmax.f32 %v4743_v50, 0.0  ;;  %v4846_v56 = vadd.f32 %v7656_v39, %v4593_v3  ;;  %v4594_v51 = vadd.f32 %v4407_v28, %v4128_v30  ;;  %v4129_v15 = vadd.f32 %v3943_v16, %v7559_v42  ;;  %v4413_v52 = vpop.f32.mrf.mxu0  ;;  %v8316_v30 = vld [vmem:[#allocation13_spill] sm:$0xff] }
 0x2e4   : > { %v3947_v27 = vpop.f32.mrf.mxu1 }
 0x2e5   : > { %v4878_v12 = vadd.f32 %v4846_v56, %v4775_v40  ;;  %v4744_v54 = vadd.f32 %v7649_v19, %v4594_v51  ;;  %v4595_v22 = vadd.f32 %v4409_v4, %v4129_v15  ;;  %v4130_v37 = vadd.f32 %v3947_v27, %v8310_v0  ;;  %v4415_v10 = vpop.f32.mrf.mxu0  ;;  %v8317_v27 = vld [vmem:[#allocation65_spill] sm:$0xff] }
 0x2e6   : > { %v3949_v24 = vpop.f32.mrf.mxu1 }
 0x2e7   : > { %4910 = vst [vmem:[%s7666_s13 + $0x80] sm:$0xff] %v4878_v12  ;;  %v4776_v55 = vmax.f32 %v4744_v54, 0.0  ;;  %v4847_v38 = vadd.f32 %v7656_v39, %v4595_v22  ;;  %v4596_v48 = vadd.f32 %v4413_v52, %v4130_v37  ;;  %v4131_v6 = vadd.f32 %v3949_v24, %v8311_v62  ;;  %v4419_v42 = vpop.f32.mrf.mxu0  ;;  %v8318_v24 = vld [vmem:[#allocation9_spill] sm:$0xff] }
 0x2e8   : > { %v3953_v5 = vpop.f32.mrf.mxu1 }
 0x2e9   : > { %v4879_v36 = vadd.f32 %v4847_v38, %v4776_v55  ;;  %v4745_v60 = vadd.f32 %v7649_v19, %v4596_v48  ;;  %v4597_v13 = vadd.f32 %v4415_v10, %v4131_v6  ;;  %v4132_v45 = vadd.f32 %v3953_v5, %v8312_v53  ;;  %v4421_v35 = vpop.f32.mrf.mxu0  ;;  %v8319_v5 = vld [vmem:[#allocation14_spill] sm:$0xff] }
 0x2ea   : > { %v3955_v33 = vpop.f32.mrf.mxu1 }
 0x2eb   : > { %4911 = vst [vmem:[%s7666_s13 + $0x88] sm:$0xff] %v4879_v36  ;;  %v4777_v7 = vmax.f32 %v4745_v60, 0.0  ;;  %v4848_v18 = vadd.f32 %v7656_v39, %v4597_v13  ;;  %v4598_v34 = vadd.f32 %v4419_v42, %v4132_v45  ;;  %v4133_v26 = vadd.f32 %v3955_v33, %v8313_v44  ;;  %v4425_v47 = vpop.f32.mrf.mxu0  ;;  %v8320_v33 = vld [vmem:[#allocation15_spill] sm:$0xff] }
 0x2ec   : > { %v3959_v21 = vpop.f32.mrf.mxu1 }
 0x2ed   : > { %v4880_v8 = vadd.f32 %v4848_v18, %v4777_v7  ;;  %v4746_v49 = vadd.f32 %v7649_v19, %v4598_v34  ;;  %v4599_v29 = vadd.f32 %v4421_v35, %v4133_v26  ;;  %v4134_v32 = vadd.f32 %v3959_v21, %v8314_v14  ;;  %v4427_v57 = vpop.f32.mrf.mxu0  ;;  %v8321_v21 = vld [vmem:[#allocation66_spill] sm:$0xff] }
 0x2ee   : > { %v3961_v43 = vpop.f32.mrf.mxu1 }
 0x2ef   : > { %4912 = vst [vmem:[%s7666_s13 + $0x90] sm:$0xff] %v4880_v8  ;;  %v4778_v17 = vmax.f32 %v4746_v49, 0.0  ;;  %v4849_v11 = vadd.f32 %v7656_v39, %v4599_v29  ;;  %v4600_v1 = vadd.f32 %v4425_v47, %v4134_v32  ;;  %v4135_v31 = vadd.f32 %v3961_v43, %v8315_v2  ;;  %v4431_v28 = vpop.f32.mrf.mxu0  ;;  %v8322_v43 = vld [vmem:[#allocation67_spill] sm:$0xff] }
 0x2f0   : > { %v3965_v46 = vpop.f32.mrf.mxu1 }
 0x2f1   : > { %v4881_v9 = vadd.f32 %v4849_v11, %v4778_v17  ;;  %v4747_v50 = vadd.f32 %v7649_v19, %v4600_v1  ;;  %v4601_v3 = vadd.f32 %v4427_v57, %v4135_v31  ;;  %v4136_v16 = vadd.f32 %v3965_v46, %v8316_v30  ;;  %v4433_v40 = vpop.f32.mrf.mxu0 }
 0x2f2   : > { %v3967_v4 = vpop.f32.mrf.mxu1 }
 0x2f3   : > { %4913 = vst [vmem:[%s7666_s13 + $0x98] sm:$0xff] %v4881_v9  ;;  %v4779_v56 = vmax.f32 %v4747_v50, 0.0  ;;  %v4850_v51 = vadd.f32 %v7656_v39, %v4601_v3  ;;  %v4602_v15 = vadd.f32 %v4431_v28, %v4136_v16  ;;  %v4137_v52 = vadd.f32 %v3967_v4, %v8317_v27  ;;  %v4437_v54 = vpop.f32.mrf.mxu0  ;;  %v8323_v16 = vld [vmem:[#allocation16_spill] sm:$0xff] }
 0x2f4   : > { %v3971_v12 = vpop.f32.mrf.mxu1 }
 0x2f5   : > { %v4882_v22 = vadd.f32 %v4850_v51, %v4779_v56  ;;  %v4748_v0 = vadd.f32 %v7649_v19, %v4602_v15  ;;  %v4603_v37 = vadd.f32 %v4433_v40, %v4137_v52  ;;  %v4138_v10 = vadd.f32 %v3971_v12, %v8318_v24  ;;  %v4439_v38 = vpop.f32.mrf.mxu0  ;;  %v8324_v52 = vld [vmem:[#allocation17_spill] sm:$0xff]  ;;  %v8325_v24 = vld [vmem:[#allocation68_spill] sm:$0xff] }
 0x2f6   : > { %v3973_v55 = vpop.f32.mrf.mxu1 }
 0x2f7   : > { %4914 = vst [vmem:[%s7666_s13 + $0xa0] sm:$0xff] %v4882_v22  ;;  %v4780_v48 = vmax.f32 %v4748_v0, 0.0  ;;  %v4851_v62 = vadd.f32 %v7656_v39, %v4603_v37  ;;  %v4604_v6 = vadd.f32 %v4437_v54, %v4138_v10  ;;  %v4139_v42 = vadd.f32 %v3973_v55, %v8319_v5  ;;  %v4443_v60 = vpop.f32.mrf.mxu0 }
 0x2f8   : > { %v3977_v36 = vpop.f32.mrf.mxu1 }
 0x2f9   : > { %v4883_v13 = vadd.f32 %v4851_v62, %v4780_v48  ;;  %v4749_v53 = vadd.f32 %v7649_v19, %v4604_v6  ;;  %v4605_v45 = vadd.f32 %v4439_v38, %v4139_v42  ;;  %v4140_v35 = vadd.f32 %v3977_v36, %v8320_v33  ;;  %v4445_v18 = vpop.f32.mrf.mxu0 }
 0x2fa   : > { %v3979_v7 = vpop.f32.mrf.mxu1 }
 0x2fb   : > { %4915 = vst [vmem:[%s7666_s13 + $0xa8] sm:$0xff] %v4883_v13  ;;  %v4781_v34 = vmax.f32 %v4749_v53, 0.0  ;;  %v4852_v44 = vadd.f32 %v7656_v39, %v4605_v45  ;;  %v4606_v26 = vadd.f32 %v4443_v60, %v4140_v35  ;;  %v4141_v47 = vadd.f32 %v3979_v7, %v8321_v21  ;;  %v4449_v49 = vpop.f32.mrf.mxu0 }
 0x2fc   : > { %v3983_v8 = vpop.f32.mrf.mxu1 }
 0x2fd   : > { %v4884_v29 = vadd.f32 %v4852_v44, %v4781_v34  ;;  %v4750_v14 = vadd.f32 %v7649_v19, %v4606_v26  ;;  %v4607_v32 = vadd.f32 %v4445_v18, %v4141_v47  ;;  %v4142_v57 = vadd.f32 %v3983_v8, %v8322_v43  ;;  %v4451_v11 = vpop.f32.mrf.mxu0 }
 0x2fe   : > { %v3985_v17 = vpop.f32.mrf.mxu1 }
 0x2ff   : > { %4916 = vst [vmem:[%s7666_s13 + $0xb0] sm:$0xff] %v4884_v29  ;;  %v4782_v1 = vmax.f32 %v4750_v14, 0.0  ;;  %v4853_v2 = vadd.f32 %v7656_v39, %v4607_v32  ;;  %v4608_v31 = vadd.f32 %v4449_v49, %v4142_v57  ;;  %v4143_v46 = vadd.f32 %v3985_v17, %v7601_v63  ;;  %v4455_v9 = vpop.f32.mrf.mxu0 }
 0x300   : > { %v3989_v28 = vpop.f32.mrf.mxu1 }
 0x301   : > { %v4885_v50 = vadd.f32 %v4853_v2, %v4782_v1  ;;  %v4751_v3 = vadd.f32 %v7649_v19, %v4608_v31  ;;  %v4609_v30 = vadd.f32 %v4451_v11, %v4143_v46  ;;  %v4144_v4 = vadd.f32 %v3989_v28, %v8323_v16  ;;  %v4457_v56 = vpop.f32.mrf.mxu0 }
 0x302   : > { %v3991_v40 = vpop.f32.mrf.mxu1 }
 0x303   : > { %4917 = vst [vmem:[%s7666_s13 + $0xb8] sm:$0xff] %v4885_v50  ;;  %v4783_v51 = vmax.f32 %v4751_v3, 0.0  ;;  %v4854_v15 = vadd.f32 %v7656_v39, %v4609_v30  ;;  %v4610_v27 = vadd.f32 %v4455_v9, %v4144_v4  ;;  %v4145_v12 = vadd.f32 %v3991_v40, %v8324_v52  ;;  %v4461_v63 = vpop.f32.mrf.mxu0 }
 0x304   : > { %v3995_v54 = vpop.f32.mrf.mxu1 }
 0x305   : > { %v4886_v22 = vadd.f32 %v4854_v15, %v4783_v51  ;;  %v4752_v0 = vadd.f32 %v7649_v19, %v4610_v27  ;;  %v4611_v37 = vadd.f32 %v4457_v56, %v4145_v12  ;;  %v4146_v10 = vadd.f32 %v3995_v54, %v8325_v24  ;;  %v4463_v38 = vpop.f32.mrf.mxu0  ;;  %v8326_v56 = vld [vmem:[#allocation69_spill] sm:$0xff]  ;;  %v8327_v54 = vld [vmem:[#allocation18_spill] sm:$0xff] }
 0x306   : > { %v3997_v55 = vpop.f32.mrf.mxu1 }
 0x307   : > { %4918 = vst [vmem:[%s7666_s13 + $0xc0] sm:$0xff] %v4886_v22  ;;  %v4784_v48 = vmax.f32 %v4752_v0, 0.0  ;;  %v4855_v62 = vadd.f32 %v7656_v39, %v4611_v37  ;;  %v4612_v6 = vadd.f32 %v4461_v63, %v4146_v10  ;;  %v4147_v5 = vadd.f32 %v3997_v55, %v7613_v23  ;;  %v4467_v36 = vpop.f32.mrf.mxu0  ;;  %v8328_v10 = vld [vmem:[#allocation19_spill] sm:$0xff] }
 0x308   : > { %v4001_v42 = vpop.f32.mrf.mxu1 }
 0x309   : > { %v4887_v60 = vadd.f32 %v4855_v62, %v4784_v48  ;;  %v4753_v13 = vadd.f32 %v7649_v19, %v4612_v6  ;;  %v4613_v53 = vadd.f32 %v4463_v38, %v4147_v5  ;;  %v4148_v45 = vadd.f32 %v4001_v42, %v7616_v25  ;;  %v4469_v35 = vpop.f32.mrf.mxu0  ;;  %v8329_v5 = vld [vmem:[#allocation70_spill] sm:$0xff] }
 0x30a   : > { %v4003_v33 = vpop.f32.mrf.mxu1 }
 0x30b   : > { %4919 = vst [vmem:[%s7666_s13 + $0xc8] sm:$0xff] %v4887_v60  ;;  %v4785_v7 = vmax.f32 %v4753_v13, 0.0  ;;  %v4856_v18 = vadd.f32 %v7656_v39, %v4613_v53  ;;  %v4614_v34 = vadd.f32 %v4467_v36, %v4148_v45  ;;  %v4149_v44 = vadd.f32 %v4003_v33, %v7619_v61  ;;  %v4473_v23 = vpop.f32.mrf.mxu0 }
 0x30c   : > { %v4007_v26 = vpop.f32.mrf.mxu1 }
 0x30d   : > { %v4888_v21 = vadd.f32 %v4856_v18, %v4785_v7  ;;  %v4754_v47 = vadd.f32 %v7649_v19, %v4614_v34  ;;  %v4615_v8 = vadd.f32 %v4469_v35, %v4149_v44  ;;  %v4150_v49 = vadd.f32 %v4007_v26, %v7622_v41  ;;  %v4475_v29 = vpop.f32.mrf.mxu0 }
 0x30e   : > { %v4009_v25 = vpop.f32.mrf.mxu1 }
 0x30f   : > { %4920 = vst [vmem:[%s7666_s13 + $0xd0] sm:$0xff] %v4888_v21  ;;  %v4786_v14 = vmax.f32 %v4754_v47, 0.0  ;;  %v4857_v32 = vadd.f32 %v7656_v39, %v4615_v8  ;;  %v4616_v43 = vadd.f32 %v4473_v23, %v4150_v49  ;;  %v4151_v57 = vadd.f32 %v4009_v25, %v7625_v58  ;;  %v4479_v61 = vpop.f32.mrf.mxu0 }
 0x310   : > { %v4013_v17 = vpop.f32.mrf.mxu1 }
 0x311   : > { %v4889_v11 = vadd.f32 %v4857_v32, %v4786_v14  ;;  %v4755_v1 = vadd.f32 %v7649_v19, %v4616_v43  ;;  %v4617_v2 = vadd.f32 %v4475_v29, %v4151_v57  ;;  %v4152_v31 = vadd.f32 %v4013_v17, %v7628_v59  ;;  %v4481_v46 = vpop.f32.mrf.mxu0 }
 0x312   : > { %v4015_v41 = vpop.f32.mrf.mxu1 }
 0x313   : > { %4921 = vst [vmem:[%s7666_s13 + $0xd8] sm:$0xff] %v4889_v11  ;;  %v4787_v28 = vmax.f32 %v4755_v1, 0.0  ;;  %v4858_v9 = vadd.f32 %v7656_v39, %v4617_v2  ;;  %v4618_v50 = vadd.f32 %v4479_v61, %v4152_v31  ;;  %v4153_v3 = vadd.f32 %v4015_v41, %v7631_v20  ;;  %v4485_v58 = vpop.f32.mrf.mxu0 }
 0x314   : > { %v4019_v30 = vpop.f32.mrf.mxu1 }
 0x315   : > { %v4890_v16 = vadd.f32 %v4858_v9, %v4787_v28  ;;  %v4756_v4 = vadd.f32 %v7649_v19, %v4618_v50  ;;  %v4619_v40 = vadd.f32 %v4481_v46, %v4153_v3  ;;  %v4154_v51 = vadd.f32 %v4019_v30, %v8326_v56  ;;  %v4487_v15 = vpop.f32.mrf.mxu0 }
 0x316   : > { %v4021_v59 = vpop.f32.mrf.mxu1 }
 0x317   : > { %4922 = vst [vmem:[%s7666_s13 + $0xe0] sm:$0xff] %v4890_v16  ;;  %v4788_v27 = vmax.f32 %v4756_v4, 0.0  ;;  %v4859_v52 = vadd.f32 %v7656_v39, %v4619_v40  ;;  %v4620_v12 = vadd.f32 %v4485_v58, %v4154_v51  ;;  %v4155_v63 = vadd.f32 %v4021_v59, %v8327_v54  ;;  %v4491_v20 = vpop.f32.mrf.mxu0 }
 0x318   : > { %v4025_v22 = vpop.f32.mrf.mxu1 }
 0x319   : > { %v4891_v0 = vadd.f32 %v4859_v52, %v4788_v27  ;;  %v4757_v37 = vadd.f32 %v7649_v19, %v4620_v12  ;;  %v4621_v24 = vadd.f32 %v4487_v15, %v4155_v63  ;;  %v4156_v55 = vadd.f32 %v4025_v22, %v8328_v10  ;;  %v4493_v36 = vpop.f32.mrf.mxu0 }
 0x31a   : > { %v4027_v38 = vpop.f32.mrf.mxu1 }
 0x31b   : > { %4923 = vst [vmem:[%s7666_s13 + $0xe8] sm:$0xff] %v4891_v0  ;;  %v4789_v48 = vmax.f32 %v4757_v37, 0.0  ;;  %v4860_v62 = vadd.f32 %v7656_v39, %v4621_v24  ;;  %v4622_v6 = vadd.f32 %v4491_v20, %v4156_v55  ;;  %v4157_v42 = vadd.f32 %v4027_v38, %v8329_v5 }
 0x31d   : > { %v4892_v60 = vadd.f32 %v4860_v62, %v4789_v48  ;;  %v4758_v13 = vadd.f32 %v7649_v19, %v4622_v6  ;;  %v4623_v53 = vadd.f32 %v4493_v36, %v4157_v42 }
 0x31f   : > { %4924 = vst [vmem:[%s7666_s13 + $0xf0] sm:$0xff] %v4892_v60  ;;  %v4790_v45 = vmax.f32 %v4758_v13, 0.0  ;;  %v4861_v33 = vadd.f32 %v7656_v39, %v4623_v53 }
 0x321   : > { %v4893_v35 = vadd.f32 %v4861_v33, %v4790_v45 }
 0x323   : > { %4925 = vst [vmem:[%s7666_s13 + $0xf8] sm:$0xff] %v4893_v35 }
 0x324   : > { %5425 = shalt.err (!%p5422_p3)
}
 0x325   : > { %s5426_s6 = scalar_lea.hbm %s7824_s27, 4096  ;;  %s5430_s9 = scalar_lea.hbm %s7875_s4, 8192 }
 0x326   : > { %p5427_p4 = scmp.ne.s32.totalorder %s7824_s27, %s5426_s6  ;;  %p5431_p9 = scmp.lt.s32.totalorder %s7824_s27, %s7875_s4 }
 0x327   : > { %p5432_p10 = scmp.lt.s32.totalorder %s5430_s9, %s5426_s6 }
 0x328   : > { %p5428_p7 = pnand %p5427_p4, %p5541_p5 }
 0x329   : > { %p5433_p11 = por %p5432_p10, %p5431_p9 }
 0x32a   : > { %p5429_p8 = pneg %p5428_p7 }
 0x32c   : > { %p5434_p12 = pnand %p5433_p11, %p5429_p8 }
 0x32e   : > { %5437 = shalt.err (!%p5434_p12)
}
 0x32f   : > { %s5476_s12 = smov 128   ;;  %s5477_s13 = smov 8  }
 0x330   : > { %5333 = dma.vmem_to_hbm [thread:$0]  (%p5541_p5), %s7826_s20, 4096, %s7824_s27, %s7831_s28, %s5476_s12, %s5476_s12, %s5477_s13  }
 0x331 PF: > { %p5339_p13 = scmp.ge.s32.totalorder %s5472_s18, 2  ;;  %s4955_s14 = sand.u32 1, %s5460_s15  }
 0x332   : > { %s4956_s22 = scalar_lea.sflag [#allocation4], %s4955_s14 }
 0x333   : > { %p5336_p0 = pnand %p5339_p13, %p5545_p6 }
 0x335   : > { %p5337_p1 = pneg %p5336_p0 }
 0x337   : > { %5455 = dma.done.wait (%p5337_p1), %s4956_s22, 4096  }
 0x338   : > { %5457 = vsyncadd (%p5337_p1), %s4956_s22, 4294963200  ;;  %p14_p2 = scmp.ge.s32.totalorder %s5528_s21, 4   ;;  %s8330_s15 = smov %s5464_s16 }
 0x339   : > { %s8331_s16 = smov %s5468_s17  ;;  %s8332_s17 = smov %s5539_s24 }
 0x33a   : > { %s8333_s18 = smov %s5528_s21  ;;  %16 = sbr.rel (!%p14_p2) target bundleno = 3 (0x3), region = 79 }
 0x33f   :  { %4961 = vsyncpa [#allocation4], 1 }
 0x340   :  { %4963 = vsyncpa [#allocation4 + $0x1], 1 }

</bundles_post_ra>
